<compile_context>
chip_gen: v5e
topology: v5e:2x2
jax: 0.10.0
libtpu: 0.0.40
codegen_flags: <defaults>
</compile_context>

<pallas_src>
import numpy as np
import jax
import jax.numpy as jnp
from jax.experimental import pallas as pl
from jax.experimental.pallas import tpu as pltpu

# ----- model configuration (small shapes, consistent with the module) -----
IN_PTS = 3                      # input_ch
IN_VIEWS = 3                    # input_ch_views
N_SRC = 3                       # number of source views -> feat dim = 8 + 4*N_SRC
IN_FEAT = 8 + 4 * N_SRC         # 20
DIM = IN_PTS + IN_FEAT + IN_VIEWS   # 26
W = 64                          # hidden width (module default 256; small for the demo)
D_DEPTH = 8                     # D
N_HEAD = 4
D_K = 4
D_V = 4
D_MODEL = 4 + 8                 # attension_dim = 12
TEMPERATURE = float(D_K ** 0.5)
LN_EPS = 1e-6
OUT_DIM = 3 + 1 + 3 + 3         # [rgb, alpha, colors] cat colors again = 10

TILE = 2048                     # max rows (lanes) per grid step
PACK_COLS = 128                 # lane width of the packed weight slabs (full vreg width)


def _pad8(r):
    return -(-r // 8) * 8


# --------------------------------------------------------------------------
# weight packing (wrapper side): fuse / permute / block-diagonalize, pad, record layout
# --------------------------------------------------------------------------
def pack_weights(p):
    f32 = np.float32

    def A(k):
        return np.asarray(p[k], f32)

    def V(k):
        return np.asarray(p[k], f32).reshape(-1)

    # permutation head-major (h*D_K+d) -> d-major (d*N_HEAD+h); makes per-head score a
    # contiguous-sublane sum and the value head-expansion a plain sublane copy (no MXU).
    perm = np.arange(N_HEAD * D_K).reshape(N_HEAD, D_K).T.reshape(-1)

    wq = (A("wq") / TEMPERATURE)[:, perm]       # fold 1/temperature into the q weights
    wk = A("wk")[:, perm]
    wv = A("wv")[:, perm]                       # d_v-major value rows
    wqkv = np.concatenate([wq.T, wk.T, wv.T], axis=0)     # (48,12), token = [color(4), feats8(8)]

    # single fused QKV projection for all 3 tokens; input xin = x[3:23] = [feats8, col0, col1, col2]
    wbig = np.zeros((N_SRC * 48, 8 + 4 * N_SRC), f32)     # (144, 20)
    for v in range(N_SRC):
        wbig[48 * v:48 * v + 48, 0:8] = wqkv[:, 4:12]
        wbig[48 * v:48 * v + 48, 8 + 4 * v:12 + 4 * v] = wqkv[:, 0:4]

    # wfc fused over the 3 query tokens (block-diagonal), inputs permuted to d_v-major
    wfc_k = A("wfc").T[:, perm]                            # (12, 16)
    wfc3 = np.zeros((N_SRC * D_MODEL, N_SRC * 16), f32)    # (36, 48)
    for v in range(N_SRC):
        wfc3[12 * v:12 * v + 12, 16 * v:16 * v + 16] = wfc_k

    wout_k = A("wout").T                                   # (3, 12)
    wout3 = np.zeros((N_SRC * 3, N_SRC * D_MODEL), f32)    # (9, 36)
    for v in range(N_SRC):
        wout3[3 * v:3 * v + 3, 12 * v:12 * v + 12] = wout_k

    # ---- NeRF MLP weights ----
    wb = A("wb")                                           # (11, W)
    w0b8 = np.zeros((2 * W, IN_PTS + 8), f32)              # (128, 11): w0@pts and wb8@feats8 in one launch
    w0b8[0:W, 0:IN_PTS] = A("w0").T
    w0b8[W:2 * W, IN_PTS:] = wb[:8].T

    wfwa = np.concatenate([A("wf").T, A("wa").T], axis=0)  # (65, W): feature rows 0..63, alpha row 64

    mats = {
        "wbig":  wbig,                 # (144, 20)
        "wfc3":  wfc3,                 # (36, 48)
        "wout3": wout3,                # (9, 36)
        "w0b8":  w0b8,                 # (128, 11)
        "wbc":   wb[8:].T,             # (W, 3)    pts_bias, colors part
        "w1":    A("w1").T,            # (W, W)    shared pts_linears[1..D-1]
        "wfwa":  wfwa,                 # (W+1, W)
        "wvw_f": A("wvw")[:W].T,       # (W//2, W) views_linears[0], feature part
        "wvw_v": A("wvw")[W:].T,       # (W//2, 3) views_linears[0], views part
        "wr":    A("wr").T,            # (3, W//2)
    }
    wlayout, blocks, off = {}, [], 0
    for name, m in mats.items():
        r, c = m.shape
        rpad = _pad8(r)
        wlayout[name] = (off, r, c)
        blocks.append(np.pad(m, ((0, rpad - r), (0, PACK_COLS - c))))
        off += rpad
    wpack = jnp.asarray(np.concatenate(blocks, axis=0))    # (600, 128) f32

    # ---- bias / layernorm columns (loop-invariant combinations pre-folded) ----
    vecs = {
        "ln_g3": np.tile(V("ln_g"), N_SRC),                # (36,) per-token tiled LN gamma
        "ln_b3": np.tile(V("ln_b"), N_SRC),                # (36,)
        "bout3": np.tile(V("bout"), N_SRC),                # (9,)
        "bb0":   V("bb") + V("b0"),                        # (64,)
        "bb1":   V("bb") + V("b1"),                        # (64,)
        "bfa":   np.concatenate([V("bf"), V("ba")]),       # (65,)
        "bvw":   V("bvw"),                                 # (32,)
        "br":    V("br"),                                  # (3,)
    }
    nrow = _pad8(max(v.shape[0] for v in vecs.values()))
    blayout, cols = {}, []
    for j, (name, v) in enumerate(vecs.items()):
        blayout[name] = (j, v.shape[0])
        cols.append(np.pad(v, (0, nrow - v.shape[0]))[:, None])
    bmat = np.concatenate(cols, axis=1)
    bmat = np.pad(bmat, ((0, 0), (0, PACK_COLS - bmat.shape[1])))
    bpack = jnp.asarray(bmat)                              # (72, 128) f32
    return wpack, bpack, wlayout, blayout


# --------------------------------------------------------------------------
# kernel (closure over the static packing layout and the activation carry dtype)
# --------------------------------------------------------------------------
def make_kernel(wlayout, blayout, act_dtype):
    def kernel(x_ref, w_ref, b_ref, o_ref):
        def getw(name):
            off, r, c = wlayout[name]
            return w_ref[off:off + r, 0:c]

        def getb(name):
            col, r = blayout[name]
            return b_ref[0:r, col:col + 1]                 # (r, 1) column, lane-broadcast on add

        x = x_ref[...]                                     # (26, T) lane-dense slab
        t = x.shape[1]
        feats8 = x[IN_PTS:IN_PTS + 8, :]                   # (8, T)
        views = x[IN_PTS + IN_FEAT:, :]                    # (3, T)

        # ---------- multi-head self-attention over the N_SRC "view" tokens ----------
        # One fused QKV launch for all 3 tokens (q rows d-major with 1/temp folded in,
        # k rows d-major, v rows d_v-major -- set up at pack time).
        qkv = jnp.dot(getw("wbig"), x[IN_PTS:IN_PTS + IN_FEAT, :],
                      preferred_element_type=jnp.float32)  # (144, T)

        o_parts = []
        for i in range(N_SRC):                             # query token (unrolled; VPU/EUP only)
            qi = qkv[48 * i:48 * i + 16, :]
            s = []
            for j in range(N_SRC):
                qk = qi * qkv[48 * j + 16:48 * j + 32, :]  # (16, T)
                # per-head score = segmented sum over the 4 d-slices (no hsum matmul)
                s.append(qk[0:4] + qk[4:8] + qk[8:12] + qk[12:16])     # (N_HEAD, T)
            m = jnp.maximum(jnp.maximum(s[0], s[1]), s[2])
            e = [jnp.exp(sj - m) for sj in s]
            inv_d = pl.reciprocal(e[0] + e[1] + e[2], approx=True)     # EUP slot
            oi = jnp.zeros((N_HEAD * D_V, t), jnp.float32)
            for j in range(N_SRC):
                pw = e[j] * inv_d                                       # (N_HEAD, T) softmax weights
                # head-expansion is a plain sublane copy (d_v-major v rows), not an hexp matmul
                pw16 = jnp.concatenate([pw, pw, pw, pw], axis=0)        # (16, T)
                oi = oi + pw16 * qkv[48 * j + 32:48 * j + 48, :]
            o_parts.append(oi)
        o48 = jnp.concatenate(o_parts, axis=0)                          # (48, T)

        # residual tokens [col_i; feats8] stacked for all 3 query tokens
        toks = jnp.concatenate(
            [x[11:15, :], feats8, x[15:19, :], feats8, x[19:23, :], feats8], axis=0)   # (36, T)
        # block-diagonal wfc over the 3 tokens: one launch instead of 3
        u = jnp.dot(getw("wfc3"), o48, preferred_element_type=jnp.float32) + toks      # (36, T)

        # LayerNorm per 12-row token group, then one block-diagonal wout launch
        ln_parts = []
        for g in range(N_SRC):
            ug = u[12 * g:12 * g + 12, :]
            mu = jnp.mean(ug, axis=0, keepdims=True)
            var = jnp.mean(jnp.square(ug - mu), axis=0, keepdims=True)
            ln_parts.append((ug - mu) * jax.lax.rsqrt(var + LN_EPS))
        lnorm = (jnp.concatenate(ln_parts, axis=0) * getb("ln_g3") + getb("ln_b3"))    # (36, T)
        w9 = jax.nn.sigmoid(
            jnp.dot(getw("wout3"), lnorm, preferred_element_type=jnp.float32)
            + getb("bout3"))                                                           # (9, T)
        colors = w9[0:3, :] + w9[3:6, :] + w9[6:9, :]                                  # (3, T)

        # ------------------------------- NeRF-style MLP -------------------------------
        # one launch computes both w0@pts (rows 0..63) and wb8@feats8 (rows 64..127)
        pre = jnp.dot(getw("w0b8"), x[0:IN_PTS + 8, :],
                      preferred_element_type=jnp.float32)                              # (128, T)
        bias_core = pre[W:2 * W, :] + jnp.dot(getw("wbc"), colors,
                                              preferred_element_type=jnp.float32)      # (64, T)
        h = jax.nn.relu(pre[0:W, :] + bias_core + getb("bb0")).astype(act_dtype)
        bias1 = bias_core + getb("bb1")                    # hoisted loop invariant (f32)
        w1 = getw("w1")
        for _ in range(D_DEPTH - 1):                       # shared Linear (as in the PyTorch module)
            h = jax.nn.relu(jnp.dot(w1, h, preferred_element_type=jnp.float32)
                            + bias1).astype(act_dtype)

        # fused feature/alpha head: rows 0..63 = wf@h + bf, row 64 = wa@h + ba
        fa = jnp.dot(getw("wfwa"), h, preferred_element_type=jnp.float32) + getb("bfa")
        feature = fa[0:W, :].astype(act_dtype)
        alpha = jax.nn.relu(fa[W:W + 1, :])

        hv = jax.nn.relu(
            jnp.dot(getw("wvw_f"), feature, preferred_element_type=jnp.float32)
            + jnp.dot(getw("wvw_v"), views, preferred_element_type=jnp.float32)
            + getb("bvw")).astype(act_dtype)
        rgb = jax.nn.sigmoid(jnp.dot(getw("wr"), hv, preferred_element_type=jnp.float32)
                             + getb("br"))

        # NOTE: colors is intentionally written twice, matching the reference's duplicate concat.
        o_ref[...] = jnp.concatenate([rgb, alpha, colors, colors], axis=0)             # (10, T)

    return kernel


# --------------------------------------------------------------------------
# wrapper
# --------------------------------------------------------------------------
def _choose_tile(n, max_tile=TILE, min_blocks=8):
    # keep >= ~min_blocks grid steps when the problem allows it (pipeline overlap and
    # >=2 steps per TensorCore on v7x megacore); otherwise the smallest 128-multiple tile.
    t = -(-n // min_blocks)
    t = -(-t // 128) * 128
    return int(max(128, min(max_tile, t)))


def _act_dtype():
    # bf16 activation carry only where the VPU has native bf16 ALUs (v6e / v7x);
    # keep f32 carry on v5e and older (no bf16 VALUs -> converts would hurt).
    try:
        kind = jax.devices()[0].device_kind.lower()
    except Exception:
        return jnp.float32
    return jnp.bfloat16 if ("v6" in kind or "v7" in kind) else jnp.float32


def renderer_attention_pallas(x, params, tile=None):
    n_ray, n_sample, dim = x.shape
    assert dim == DIM
    n = n_ray * n_sample
    if tile is None:
        tile = _choose_tile(n)
    n_blocks = pl.cdiv(n, tile)
    n_pad = n_blocks * tile

    x_t = x.reshape(n, dim).T.astype(jnp.float32)          # (DIM, n): channels on sublanes, rows on lanes
    if n_pad != n:
        x_t = jnp.pad(x_t, ((0, 0), (0, n_pad - n)))

    wpack, bpack, wlayout, blayout = pack_weights(params)
    kernel = make_kernel(wlayout, blayout, _act_dtype())

    out_t = pl.pallas_call(
        kernel,
        out_shape=jax.ShapeDtypeStruct((OUT_DIM, n_pad), jnp.float32),
        grid_spec=pltpu.PrefetchScalarGridSpec(
            num_scalar_prefetch=0,
            grid=(n_blocks,),
            in_specs=[
                pl.BlockSpec((DIM, tile), lambda i: (0, i)),
                pl.BlockSpec(wpack.shape, lambda i: (0, 0)),
                pl.BlockSpec(bpack.shape, lambda i: (0, 0)),
            ],
            out_specs=pl.BlockSpec((OUT_DIM, tile), lambda i: (0, i)),
        ),
        compiler_params=pltpu.CompilerParams(
            dimension_semantics=("parallel",),
            vmem_limit_bytes=48 * 1024 * 1024),
    )(x_t, wpack, bpack)

    return out_t[:, :n].T.reshape(n_ray, n_sample, OUT_DIM)


# --------------------------------------------------------------------------
# parameters + pure-JAX reference (mirrors the PyTorch forward, use_viewdirs=True)
# --------------------------------------------------------------------------
def init_params(key):
    def dense(k, fan_in, fan_out, scale=None):
        if scale is None:
            scale = (2.0 / fan_in) ** 0.5
        return scale * jax.random.normal(k, (fan_in, fan_out), jnp.float32)

    keys = jax.random.split(key, 16)
    p = {}
    p["wq"] = dense(keys[0], D_MODEL, N_HEAD * D_K, (1.0 / D_MODEL) ** 0.5)
    p["wk"] = dense(keys[1], D_MODEL, N_HEAD * D_K, (1.0 / D_MODEL) ** 0.5)
    p["wv"] = dense(keys[2], D_MODEL, N_HEAD * D_V, (1.0 / D_MODEL) ** 0.5)
    p["wfc"] = dense(keys[3], N_HEAD * D_V, D_MODEL, (1.0 / (N_HEAD * D_V)) ** 0.5)
    p["ln_g"] = jnp.ones((1, D_MODEL), jnp.float32)
    p["ln_b"] = jnp.zeros((1, D_MODEL), jnp.float32)
    p["wout"] = dense(keys[4], D_MODEL, 3, (1.0 / D_MODEL) ** 0.5)
    p["bout"] = jnp.zeros((1, 3), jnp.float32)
    p["w0"] = dense(keys[5], IN_PTS, W)
    p["b0"] = jnp.zeros((1, W), jnp.float32)
    p["w1"] = dense(keys[6], W, W)
    p["b1"] = jnp.zeros((1, W), jnp.float32)
    p["wb"] = dense(keys[7], 11, W, (1.0 / 11.0) ** 0.5)
    p["bb"] = 0.01 * jax.random.normal(keys[8], (1, W), jnp.float32)
    p["wf"] = dense(keys[9], W, W)
    p["bf"] = jnp.zeros((1, W), jnp.float32)
    p["wa"] = dense(keys[10], W, 1)
    p["ba"] = jnp.zeros((1, 1), jnp.float32)
    p["wvw"] = dense(keys[11], IN_VIEWS + W, W // 2)
    p["bvw"] = jnp.zeros((1, W // 2), jnp.float32)
    p["wr"] = dense(keys[12], W // 2, 3)
    p["br"] = jnp.zeros((1, 3), jnp.float32)
    return p


def reference(x, p):
    n_ray, n_sample, dim = x.shape
    n = n_ray * n_sample
    xf = x.reshape(n, dim)
    pts = xf[:, :IN_PTS]
    feats = xf[:, IN_PTS:IN_PTS + IN_FEAT]
    views = xf[:, IN_PTS + IN_FEAT:]
    feats8 = feats[:, :8]

    colors_tok = feats[:, 8:].reshape(n, N_SRC, 4)
    tokens = jnp.concatenate(
        [colors_tok, jnp.broadcast_to(feats8[:, None, :], (n, N_SRC, 8))], axis=-1)

    def proj(t, w):
        return (t @ w).reshape(n, N_SRC, N_HEAD, D_K).transpose(0, 2, 1, 3)

    q = proj(tokens, p["wq"]) / TEMPERATURE
    k = proj(tokens, p["wk"])
    v = proj(tokens, p["wv"])
    attn = jax.nn.softmax(q @ k.transpose(0, 1, 3, 2), axis=-1)
    o = (attn @ v).transpose(0, 2, 1, 3).reshape(n, N_SRC, N_HEAD * D_V)
    o = o @ p["wfc"] + tokens
    mean = o.mean(-1, keepdims=True)
    var = ((o - mean) ** 2).mean(-1, keepdims=True)
    o = (o - mean) / jnp.sqrt(var + LN_EPS) * p["ln_g"].reshape(-1) + p["ln_b"].reshape(-1)
    colors = jnp.sum(jax.nn.sigmoid(o @ p["wout"] + p["bout"].reshape(-1)), axis=-2)

    bias = jnp.concatenate([feats8, colors], axis=-1) @ p["wb"] + p["bb"]
    h = jax.nn.relu(pts @ p["w0"] + p["b0"] + bias)
    for _ in range(D_DEPTH - 1):
        h = jax.nn.relu(h @ p["w1"] + p["b1"] + bias)
    alpha = jax.nn.relu(h @ p["wa"] + p["ba"])
    feature = h @ p["wf"] + p["bf"]
    hv = jax.nn.relu(jnp.concatenate([feature, views], axis=-1) @ p["wvw"] + p["bvw"])
    rgb = jax.nn.sigmoid(hv @ p["wr"] + p["br"])
    out = jnp.concatenate([rgb, alpha, colors, colors], axis=-1)
    return out.reshape(n_ray, n_sample, OUT_DIM)


if __name__ == "__main__":
    key = jax.random.PRNGKey(0)
    pkey, xkey = jax.random.split(key)
    params = init_params(pkey)

    N_ray, N_sample = 64, 48            # 3072 rows -> 8 grid steps of 384 lanes
    x = jax.random.normal(xkey, (N_ray, N_sample, DIM), jnp.float32)

    out = renderer_attention_pallas(x, params)
    out = jax.block_until_ready(out)

    # float32 (highest precision) reference so the check measures kernel error only,
    # not the difference of two bf16-MXU computations.
    with jax.default_matmul_precision("highest"):
        ref = jax.block_until_ready(reference(x, params))

    assert out.shape == (N_ray, N_sample, OUT_DIM)
    err = jnp.abs(out - ref)
    rel = err / (1.0 + jnp.abs(ref))
    tol = 2e-2 + 2e-2 * jnp.abs(ref)    # elementwise bound (kernel runs default bf16-MXU matmuls)
    ok = (bool(jnp.all(jnp.isfinite(out)))
          and bool(jnp.all(err <= tol))
          and float(jnp.mean(rel)) < 5e-3)   # statistical check on top of the elementwise bound
    if not ok:
        raise RuntimeError(
            f"Pallas output mismatch vs reference: max abs err = {float(jnp.max(err))}, "
            f"mean combined rel err = {float(jnp.mean(rel))}")
    print("KERNEL_OK")
</pallas_src>

<mosaic_0001>
module attributes {stable_mosaic.version = 11 : i64} {
  func.func @kernel(%arg0: i32, %arg1: memref<26x384xf32, #tpu.memory_space<vmem>>, %arg2: memref<600x128xf32, #tpu.memory_space<vmem>>, %arg3: memref<72x128xf32, #tpu.memory_space<vmem>>, %arg4: memref<10x384xf32, #tpu.memory_space<vmem>>) attributes {dimension_semantics = [#tpu.dimension_semantics<parallel>], iteration_bounds = array<i64: 8>, scalar_prefetch = 0 : i64, scratch_operands = 0 : i64, tpu.core_type = #tpu.core_type<tc>, window_params = [{transform_indices = @transform_0, window_bounds = array<i64: 26, 384>}, {pipeline_mode = #tpu.pipeline_mode<synchronous>, transform_indices = @transform_1, window_bounds = array<i64: 600, 128>}, {pipeline_mode = #tpu.pipeline_mode<synchronous>, transform_indices = @transform_2, window_bounds = array<i64: 72, 128>}, {transform_indices = @transform_3, window_bounds = array<i64: 10, 384>}]} {
    %c0 = arith.constant 0 : index
    %c0_0 = arith.constant 0 : index
    %0 = vector.load %arg1[%c0, %c0_0] : memref<26x384xf32, #tpu.memory_space<vmem>>, vector<26x384xf32>
    %1 = vector.extract_strided_slice %0 {offsets = [3, 0], sizes = [8, 384], strides = [1, 1]} : vector<26x384xf32> to vector<8x384xf32>
    %2 = vector.extract_strided_slice %0 {offsets = [23, 0], sizes = [3, 384], strides = [1, 1]} : vector<26x384xf32> to vector<3x384xf32>
    %c0_1 = arith.constant 0 : index
    %c0_2 = arith.constant 0 : index
    %3 = vector.load %arg2[%c0_1, %c0_2] : memref<600x128xf32, #tpu.memory_space<vmem>>, vector<144x20xf32>
    %4 = vector.extract_strided_slice %0 {offsets = [3, 0], sizes = [20, 384], strides = [1, 1]} : vector<26x384xf32> to vector<20x384xf32>
    %cst = arith.constant dense<0.000000e+00> : vector<144x384xf32>
    %5 = tpu.matmul %3, %4, %cst {dimension_numbers = #tpu.dot_dimension_numbers<[1], [0], [0], [1], [0, 0, 1, 1], [], []>} : vector<144x20xf32>, vector<20x384xf32>, vector<144x384xf32> -> vector<144x384xf32>
    %6 = vector.extract_strided_slice %5 {offsets = [0, 0], sizes = [16, 384], strides = [1, 1]} : vector<144x384xf32> to vector<16x384xf32>
    %7 = vector.extract_strided_slice %5 {offsets = [16, 0], sizes = [16, 384], strides = [1, 1]} : vector<144x384xf32> to vector<16x384xf32>
    %8 = arith.mulf %6, %7 : vector<16x384xf32>
    %9 = vector.extract_strided_slice %8 {offsets = [0, 0], sizes = [4, 384], strides = [1, 1]} : vector<16x384xf32> to vector<4x384xf32>
    %10 = vector.extract_strided_slice %8 {offsets = [4, 0], sizes = [4, 384], strides = [1, 1]} : vector<16x384xf32> to vector<4x384xf32>
    %11 = arith.addf %9, %10 : vector<4x384xf32>
    %12 = vector.extract_strided_slice %8 {offsets = [8, 0], sizes = [4, 384], strides = [1, 1]} : vector<16x384xf32> to vector<4x384xf32>
    %13 = arith.addf %11, %12 : vector<4x384xf32>
    %14 = vector.extract_strided_slice %8 {offsets = [12, 0], sizes = [4, 384], strides = [1, 1]} : vector<16x384xf32> to vector<4x384xf32>
    %15 = arith.addf %13, %14 : vector<4x384xf32>
    %16 = vector.extract_strided_slice %5 {offsets = [64, 0], sizes = [16, 384], strides = [1, 1]} : vector<144x384xf32> to vector<16x384xf32>
    %17 = arith.mulf %6, %16 : vector<16x384xf32>
    %18 = vector.extract_strided_slice %17 {offsets = [0, 0], sizes = [4, 384], strides = [1, 1]} : vector<16x384xf32> to vector<4x384xf32>
    %19 = vector.extract_strided_slice %17 {offsets = [4, 0], sizes = [4, 384], strides = [1, 1]} : vector<16x384xf32> to vector<4x384xf32>
    %20 = arith.addf %18, %19 : vector<4x384xf32>
    %21 = vector.extract_strided_slice %17 {offsets = [8, 0], sizes = [4, 384], strides = [1, 1]} : vector<16x384xf32> to vector<4x384xf32>
    %22 = arith.addf %20, %21 : vector<4x384xf32>
    %23 = vector.extract_strided_slice %17 {offsets = [12, 0], sizes = [4, 384], strides = [1, 1]} : vector<16x384xf32> to vector<4x384xf32>
    %24 = arith.addf %22, %23 : vector<4x384xf32>
    %25 = vector.extract_strided_slice %5 {offsets = [112, 0], sizes = [16, 384], strides = [1, 1]} : vector<144x384xf32> to vector<16x384xf32>
    %26 = arith.mulf %6, %25 : vector<16x384xf32>
    %27 = vector.extract_strided_slice %26 {offsets = [0, 0], sizes = [4, 384], strides = [1, 1]} : vector<16x384xf32> to vector<4x384xf32>
    %28 = vector.extract_strided_slice %26 {offsets = [4, 0], sizes = [4, 384], strides = [1, 1]} : vector<16x384xf32> to vector<4x384xf32>
    %29 = arith.addf %27, %28 : vector<4x384xf32>
    %30 = vector.extract_strided_slice %26 {offsets = [8, 0], sizes = [4, 384], strides = [1, 1]} : vector<16x384xf32> to vector<4x384xf32>
    %31 = arith.addf %29, %30 : vector<4x384xf32>
    %32 = vector.extract_strided_slice %26 {offsets = [12, 0], sizes = [4, 384], strides = [1, 1]} : vector<16x384xf32> to vector<4x384xf32>
    %33 = arith.addf %31, %32 : vector<4x384xf32>
    %34 = arith.maximumf %15, %24 : vector<4x384xf32>
    %35 = arith.maximumf %34, %33 : vector<4x384xf32>
    %36 = arith.subf %15, %35 : vector<4x384xf32>
    %37 = math.exp %36 : vector<4x384xf32>
    %38 = arith.subf %24, %35 : vector<4x384xf32>
    %39 = math.exp %38 : vector<4x384xf32>
    %40 = arith.subf %33, %35 : vector<4x384xf32>
    %41 = math.exp %40 : vector<4x384xf32>
    %42 = arith.addf %37, %39 : vector<4x384xf32>
    %43 = arith.addf %42, %41 : vector<4x384xf32>
    %44 = tpu.reciprocal %43 {approx = true} : vector<4x384xf32> -> vector<4x384xf32>
    %cst_3 = arith.constant 0.000000e+00 : f32
    %45 = vector.broadcast %cst_3 : f32 to vector<16x384xf32>
    %46 = arith.mulf %37, %44 : vector<4x384xf32>
    %47 = tpu.concatenate %46, %46, %46, %46 in 0 : vector<4x384xf32>, vector<4x384xf32>, vector<4x384xf32>, vector<4x384xf32> -> vector<16x384xf32>
    %48 = vector.extract_strided_slice %5 {offsets = [32, 0], sizes = [16, 384], strides = [1, 1]} : vector<144x384xf32> to vector<16x384xf32>
    %49 = arith.mulf %47, %48 : vector<16x384xf32>
    %50 = arith.addf %45, %49 : vector<16x384xf32>
    %51 = arith.mulf %39, %44 : vector<4x384xf32>
    %52 = tpu.concatenate %51, %51, %51, %51 in 0 : vector<4x384xf32>, vector<4x384xf32>, vector<4x384xf32>, vector<4x384xf32> -> vector<16x384xf32>
    %53 = vector.extract_strided_slice %5 {offsets = [80, 0], sizes = [16, 384], strides = [1, 1]} : vector<144x384xf32> to vector<16x384xf32>
    %54 = arith.mulf %52, %53 : vector<16x384xf32>
    %55 = arith.addf %50, %54 : vector<16x384xf32>
    %56 = arith.mulf %41, %44 : vector<4x384xf32>
    %57 = tpu.concatenate %56, %56, %56, %56 in 0 : vector<4x384xf32>, vector<4x384xf32>, vector<4x384xf32>, vector<4x384xf32> -> vector<16x384xf32>
    %58 = vector.extract_strided_slice %5 {offsets = [128, 0], sizes = [16, 384], strides = [1, 1]} : vector<144x384xf32> to vector<16x384xf32>
    %59 = arith.mulf %57, %58 : vector<16x384xf32>
    %60 = arith.addf %55, %59 : vector<16x384xf32>
    %61 = vector.extract_strided_slice %5 {offsets = [48, 0], sizes = [16, 384], strides = [1, 1]} : vector<144x384xf32> to vector<16x384xf32>
    %62 = vector.extract_strided_slice %5 {offsets = [16, 0], sizes = [16, 384], strides = [1, 1]} : vector<144x384xf32> to vector<16x384xf32>
    %63 = arith.mulf %61, %62 : vector<16x384xf32>
    %64 = vector.extract_strided_slice %63 {offsets = [0, 0], sizes = [4, 384], strides = [1, 1]} : vector<16x384xf32> to vector<4x384xf32>
    %65 = vector.extract_strided_slice %63 {offsets = [4, 0], sizes = [4, 384], strides = [1, 1]} : vector<16x384xf32> to vector<4x384xf32>
    %66 = arith.addf %64, %65 : vector<4x384xf32>
    %67 = vector.extract_strided_slice %63 {offsets = [8, 0], sizes = [4, 384], strides = [1, 1]} : vector<16x384xf32> to vector<4x384xf32>
    %68 = arith.addf %66, %67 : vector<4x384xf32>
    %69 = vector.extract_strided_slice %63 {offsets = [12, 0], sizes = [4, 384], strides = [1, 1]} : vector<16x384xf32> to vector<4x384xf32>
    %70 = arith.addf %68, %69 : vector<4x384xf32>
    %71 = vector.extract_strided_slice %5 {offsets = [64, 0], sizes = [16, 384], strides = [1, 1]} : vector<144x384xf32> to vector<16x384xf32>
    %72 = arith.mulf %61, %71 : vector<16x384xf32>
    %73 = vector.extract_strided_slice %72 {offsets = [0, 0], sizes = [4, 384], strides = [1, 1]} : vector<16x384xf32> to vector<4x384xf32>
    %74 = vector.extract_strided_slice %72 {offsets = [4, 0], sizes = [4, 384], strides = [1, 1]} : vector<16x384xf32> to vector<4x384xf32>
    %75 = arith.addf %73, %74 : vector<4x384xf32>
    %76 = vector.extract_strided_slice %72 {offsets = [8, 0], sizes = [4, 384], strides = [1, 1]} : vector<16x384xf32> to vector<4x384xf32>
    %77 = arith.addf %75, %76 : vector<4x384xf32>
    %78 = vector.extract_strided_slice %72 {offsets = [12, 0], sizes = [4, 384], strides = [1, 1]} : vector<16x384xf32> to vector<4x384xf32>
    %79 = arith.addf %77, %78 : vector<4x384xf32>
    %80 = vector.extract_strided_slice %5 {offsets = [112, 0], sizes = [16, 384], strides = [1, 1]} : vector<144x384xf32> to vector<16x384xf32>
    %81 = arith.mulf %61, %80 : vector<16x384xf32>
    %82 = vector.extract_strided_slice %81 {offsets = [0, 0], sizes = [4, 384], strides = [1, 1]} : vector<16x384xf32> to vector<4x384xf32>
    %83 = vector.extract_strided_slice %81 {offsets = [4, 0], sizes = [4, 384], strides = [1, 1]} : vector<16x384xf32> to vector<4x384xf32>
    %84 = arith.addf %82, %83 : vector<4x384xf32>
    %85 = vector.extract_strided_slice %81 {offsets = [8, 0], sizes = [4, 384], strides = [1, 1]} : vector<16x384xf32> to vector<4x384xf32>
    %86 = arith.addf %84, %85 : vector<4x384xf32>
    %87 = vector.extract_strided_slice %81 {offsets = [12, 0], sizes = [4, 384], strides = [1, 1]} : vector<16x384xf32> to vector<4x384xf32>
    %88 = arith.addf %86, %87 : vector<4x384xf32>
    %89 = arith.maximumf %70, %79 : vector<4x384xf32>
    %90 = arith.maximumf %89, %88 : vector<4x384xf32>
    %91 = arith.subf %70, %90 : vector<4x384xf32>
    %92 = math.exp %91 : vector<4x384xf32>
    %93 = arith.subf %79, %90 : vector<4x384xf32>
    %94 = math.exp %93 : vector<4x384xf32>
    %95 = arith.subf %88, %90 : vector<4x384xf32>
    %96 = math.exp %95 : vector<4x384xf32>
    %97 = arith.addf %92, %94 : vector<4x384xf32>
    %98 = arith.addf %97, %96 : vector<4x384xf32>
    %99 = tpu.reciprocal %98 {approx = true} : vector<4x384xf32> -> vector<4x384xf32>
    %cst_4 = arith.constant 0.000000e+00 : f32
    %100 = vector.broadcast %cst_4 : f32 to vector<16x384xf32>
    %101 = arith.mulf %92, %99 : vector<4x384xf32>
    %102 = tpu.concatenate %101, %101, %101, %101 in 0 : vector<4x384xf32>, vector<4x384xf32>, vector<4x384xf32>, vector<4x384xf32> -> vector<16x384xf32>
    %103 = vector.extract_strided_slice %5 {offsets = [32, 0], sizes = [16, 384], strides = [1, 1]} : vector<144x384xf32> to vector<16x384xf32>
    %104 = arith.mulf %102, %103 : vector<16x384xf32>
    %105 = arith.addf %100, %104 : vector<16x384xf32>
    %106 = arith.mulf %94, %99 : vector<4x384xf32>
    %107 = tpu.concatenate %106, %106, %106, %106 in 0 : vector<4x384xf32>, vector<4x384xf32>, vector<4x384xf32>, vector<4x384xf32> -> vector<16x384xf32>
    %108 = vector.extract_strided_slice %5 {offsets = [80, 0], sizes = [16, 384], strides = [1, 1]} : vector<144x384xf32> to vector<16x384xf32>
    %109 = arith.mulf %107, %108 : vector<16x384xf32>
    %110 = arith.addf %105, %109 : vector<16x384xf32>
    %111 = arith.mulf %96, %99 : vector<4x384xf32>
    %112 = tpu.concatenate %111, %111, %111, %111 in 0 : vector<4x384xf32>, vector<4x384xf32>, vector<4x384xf32>, vector<4x384xf32> -> vector<16x384xf32>
    %113 = vector.extract_strided_slice %5 {offsets = [128, 0], sizes = [16, 384], strides = [1, 1]} : vector<144x384xf32> to vector<16x384xf32>
    %114 = arith.mulf %112, %113 : vector<16x384xf32>
    %115 = arith.addf %110, %114 : vector<16x384xf32>
    %116 = vector.extract_strided_slice %5 {offsets = [96, 0], sizes = [16, 384], strides = [1, 1]} : vector<144x384xf32> to vector<16x384xf32>
    %117 = vector.extract_strided_slice %5 {offsets = [16, 0], sizes = [16, 384], strides = [1, 1]} : vector<144x384xf32> to vector<16x384xf32>
    %118 = arith.mulf %116, %117 : vector<16x384xf32>
    %119 = vector.extract_strided_slice %118 {offsets = [0, 0], sizes = [4, 384], strides = [1, 1]} : vector<16x384xf32> to vector<4x384xf32>
    %120 = vector.extract_strided_slice %118 {offsets = [4, 0], sizes = [4, 384], strides = [1, 1]} : vector<16x384xf32> to vector<4x384xf32>
    %121 = arith.addf %119, %120 : vector<4x384xf32>
    %122 = vector.extract_strided_slice %118 {offsets = [8, 0], sizes = [4, 384], strides = [1, 1]} : vector<16x384xf32> to vector<4x384xf32>
    %123 = arith.addf %121, %122 : vector<4x384xf32>
    %124 = vector.extract_strided_slice %118 {offsets = [12, 0], sizes = [4, 384], strides = [1, 1]} : vector<16x384xf32> to vector<4x384xf32>
    %125 = arith.addf %123, %124 : vector<4x384xf32>
    %126 = vector.extract_strided_slice %5 {offsets = [64, 0], sizes = [16, 384], strides = [1, 1]} : vector<144x384xf32> to vector<16x384xf32>
    %127 = arith.mulf %116, %126 : vector<16x384xf32>
    %128 = vector.extract_strided_slice %127 {offsets = [0, 0], sizes = [4, 384], strides = [1, 1]} : vector<16x384xf32> to vector<4x384xf32>
    %129 = vector.extract_strided_slice %127 {offsets = [4, 0], sizes = [4, 384], strides = [1, 1]} : vector<16x384xf32> to vector<4x384xf32>
    %130 = arith.addf %128, %129 : vector<4x384xf32>
    %131 = vector.extract_strided_slice %127 {offsets = [8, 0], sizes = [4, 384], strides = [1, 1]} : vector<16x384xf32> to vector<4x384xf32>
    %132 = arith.addf %130, %131 : vector<4x384xf32>
    %133 = vector.extract_strided_slice %127 {offsets = [12, 0], sizes = [4, 384], strides = [1, 1]} : vector<16x384xf32> to vector<4x384xf32>
    %134 = arith.addf %132, %133 : vector<4x384xf32>
    %135 = vector.extract_strided_slice %5 {offsets = [112, 0], sizes = [16, 384], strides = [1, 1]} : vector<144x384xf32> to vector<16x384xf32>
    %136 = arith.mulf %116, %135 : vector<16x384xf32>
    %137 = vector.extract_strided_slice %136 {offsets = [0, 0], sizes = [4, 384], strides = [1, 1]} : vector<16x384xf32> to vector<4x384xf32>
    %138 = vector.extract_strided_slice %136 {offsets = [4, 0], sizes = [4, 384], strides = [1, 1]} : vector<16x384xf32> to vector<4x384xf32>
    %139 = arith.addf %137, %138 : vector<4x384xf32>
    %140 = vector.extract_strided_slice %136 {offsets = [8, 0], sizes = [4, 384], strides = [1, 1]} : vector<16x384xf32> to vector<4x384xf32>
    %141 = arith.addf %139, %140 : vector<4x384xf32>
    %142 = vector.extract_strided_slice %136 {offsets = [12, 0], sizes = [4, 384], strides = [1, 1]} : vector<16x384xf32> to vector<4x384xf32>
    %143 = arith.addf %141, %142 : vector<4x384xf32>
    %144 = arith.maximumf %125, %134 : vector<4x384xf32>
    %145 = arith.maximumf %144, %143 : vector<4x384xf32>
    %146 = arith.subf %125, %145 : vector<4x384xf32>
    %147 = math.exp %146 : vector<4x384xf32>
    %148 = arith.subf %134, %145 : vector<4x384xf32>
    %149 = math.exp %148 : vector<4x384xf32>
    %150 = arith.subf %143, %145 : vector<4x384xf32>
    %151 = math.exp %150 : vector<4x384xf32>
    %152 = arith.addf %147, %149 : vector<4x384xf32>
    %153 = arith.addf %152, %151 : vector<4x384xf32>
    %154 = tpu.reciprocal %153 {approx = true} : vector<4x384xf32> -> vector<4x384xf32>
    %cst_5 = arith.constant 0.000000e+00 : f32
    %155 = vector.broadcast %cst_5 : f32 to vector<16x384xf32>
    %156 = arith.mulf %147, %154 : vector<4x384xf32>
    %157 = tpu.concatenate %156, %156, %156, %156 in 0 : vector<4x384xf32>, vector<4x384xf32>, vector<4x384xf32>, vector<4x384xf32> -> vector<16x384xf32>
    %158 = vector.extract_strided_slice %5 {offsets = [32, 0], sizes = [16, 384], strides = [1, 1]} : vector<144x384xf32> to vector<16x384xf32>
    %159 = arith.mulf %157, %158 : vector<16x384xf32>
    %160 = arith.addf %155, %159 : vector<16x384xf32>
    %161 = arith.mulf %149, %154 : vector<4x384xf32>
    %162 = tpu.concatenate %161, %161, %161, %161 in 0 : vector<4x384xf32>, vector<4x384xf32>, vector<4x384xf32>, vector<4x384xf32> -> vector<16x384xf32>
    %163 = vector.extract_strided_slice %5 {offsets = [80, 0], sizes = [16, 384], strides = [1, 1]} : vector<144x384xf32> to vector<16x384xf32>
    %164 = arith.mulf %162, %163 : vector<16x384xf32>
    %165 = arith.addf %160, %164 : vector<16x384xf32>
    %166 = arith.mulf %151, %154 : vector<4x384xf32>
    %167 = tpu.concatenate %166, %166, %166, %166 in 0 : vector<4x384xf32>, vector<4x384xf32>, vector<4x384xf32>, vector<4x384xf32> -> vector<16x384xf32>
    %168 = vector.extract_strided_slice %5 {offsets = [128, 0], sizes = [16, 384], strides = [1, 1]} : vector<144x384xf32> to vector<16x384xf32>
    %169 = arith.mulf %167, %168 : vector<16x384xf32>
    %170 = arith.addf %165, %169 : vector<16x384xf32>
    %171 = tpu.concatenate %60, %115, %170 in 0 : vector<16x384xf32>, vector<16x384xf32>, vector<16x384xf32> -> vector<48x384xf32>
    %172 = vector.extract_strided_slice %0 {offsets = [11, 0], sizes = [4, 384], strides = [1, 1]} : vector<26x384xf32> to vector<4x384xf32>
    %173 = vector.extract_strided_slice %0 {offsets = [15, 0], sizes = [4, 384], strides = [1, 1]} : vector<26x384xf32> to vector<4x384xf32>
    %174 = vector.extract_strided_slice %0 {offsets = [19, 0], sizes = [4, 384], strides = [1, 1]} : vector<26x384xf32> to vector<4x384xf32>
    %175 = tpu.concatenate %172, %1, %173, %1, %174, %1 in 0 : vector<4x384xf32>, vector<8x384xf32>, vector<4x384xf32>, vector<8x384xf32>, vector<4x384xf32>, vector<8x384xf32> -> vector<36x384xf32>
    %c144 = arith.constant 144 : index
    %c0_6 = arith.constant 0 : index
    %176 = vector.load %arg2[%c144, %c0_6] : memref<600x128xf32, #tpu.memory_space<vmem>>, vector<36x48xf32>
    %cst_7 = arith.constant dense<0.000000e+00> : vector<36x384xf32>
    %177 = tpu.matmul %176, %171, %cst_7 {dimension_numbers = #tpu.dot_dimension_numbers<[1], [0], [0], [1], [0, 0, 1, 1], [], []>} : vector<36x48xf32>, vector<48x384xf32>, vector<36x384xf32> -> vector<36x384xf32>
    %178 = arith.addf %177, %175 : vector<36x384xf32>
    %179 = vector.extract_strided_slice %178 {offsets = [0, 0], sizes = [12, 384], strides = [1, 1]} : vector<36x384xf32> to vector<12x384xf32>
    %cst_8 = arith.constant dense<0.000000e+00> : vector<384xf32>
    %180 = vector.multi_reduction <add>, %179, %cst_8 [0] : vector<12x384xf32> to vector<384xf32>
    %181 = vector.shape_cast %180 : vector<384xf32> to vector<1x384xf32>
    %cst_9 = arith.constant 1.200000e+01 : f32
    %182 = vector.broadcast %cst_9 : f32 to vector<1x384xf32>
    %183 = arith.divf %181, %182 : vector<1x384xf32>
    %184 = vector.broadcast %183 : vector<1x384xf32> to vector<12x384xf32>
    %185 = arith.subf %179, %184 : vector<12x384xf32>
    %186 = arith.mulf %185, %185 : vector<12x384xf32>
    %cst_10 = arith.constant dense<0.000000e+00> : vector<384xf32>
    %187 = vector.multi_reduction <add>, %186, %cst_10 [0] : vector<12x384xf32> to vector<384xf32>
    %188 = vector.shape_cast %187 : vector<384xf32> to vector<1x384xf32>
    %cst_11 = arith.constant 1.200000e+01 : f32
    %189 = vector.broadcast %cst_11 : f32 to vector<1x384xf32>
    %190 = arith.divf %188, %189 : vector<1x384xf32>
    %191 = vector.broadcast %183 : vector<1x384xf32> to vector<12x384xf32>
    %192 = arith.subf %179, %191 : vector<12x384xf32>
    %cst_12 = arith.constant 9.99999997E-7 : f32
    %193 = vector.broadcast %cst_12 : f32 to vector<1x384xf32>
    %194 = arith.addf %190, %193 : vector<1x384xf32>
    %195 = math.rsqrt %194 : vector<1x384xf32>
    %196 = vector.broadcast %195 : vector<1x384xf32> to vector<12x384xf32>
    %197 = arith.mulf %192, %196 : vector<12x384xf32>
    %198 = vector.extract_strided_slice %178 {offsets = [12, 0], sizes = [12, 384], strides = [1, 1]} : vector<36x384xf32> to vector<12x384xf32>
    %cst_13 = arith.constant dense<0.000000e+00> : vector<384xf32>
    %199 = vector.multi_reduction <add>, %198, %cst_13 [0] : vector<12x384xf32> to vector<384xf32>
    %200 = vector.shape_cast %199 : vector<384xf32> to vector<1x384xf32>
    %cst_14 = arith.constant 1.200000e+01 : f32
    %201 = vector.broadcast %cst_14 : f32 to vector<1x384xf32>
    %202 = arith.divf %200, %201 : vector<1x384xf32>
    %203 = vector.broadcast %202 : vector<1x384xf32> to vector<12x384xf32>
    %204 = arith.subf %198, %203 : vector<12x384xf32>
    %205 = arith.mulf %204, %204 : vector<12x384xf32>
    %cst_15 = arith.constant dense<0.000000e+00> : vector<384xf32>
    %206 = vector.multi_reduction <add>, %205, %cst_15 [0] : vector<12x384xf32> to vector<384xf32>
    %207 = vector.shape_cast %206 : vector<384xf32> to vector<1x384xf32>
    %cst_16 = arith.constant 1.200000e+01 : f32
    %208 = vector.broadcast %cst_16 : f32 to vector<1x384xf32>
    %209 = arith.divf %207, %208 : vector<1x384xf32>
    %210 = vector.broadcast %202 : vector<1x384xf32> to vector<12x384xf32>
    %211 = arith.subf %198, %210 : vector<12x384xf32>
    %cst_17 = arith.constant 9.99999997E-7 : f32
    %212 = vector.broadcast %cst_17 : f32 to vector<1x384xf32>
    %213 = arith.addf %209, %212 : vector<1x384xf32>
    %214 = math.rsqrt %213 : vector<1x384xf32>
    %215 = vector.broadcast %214 : vector<1x384xf32> to vector<12x384xf32>
    %216 = arith.mulf %211, %215 : vector<12x384xf32>
    %217 = vector.extract_strided_slice %178 {offsets = [24, 0], sizes = [12, 384], strides = [1, 1]} : vector<36x384xf32> to vector<12x384xf32>
    %cst_18 = arith.constant dense<0.000000e+00> : vector<384xf32>
    %218 = vector.multi_reduction <add>, %217, %cst_18 [0] : vector<12x384xf32> to vector<384xf32>
    %219 = vector.shape_cast %218 : vector<384xf32> to vector<1x384xf32>
    %cst_19 = arith.constant 1.200000e+01 : f32
    %220 = vector.broadcast %cst_19 : f32 to vector<1x384xf32>
    %221 = arith.divf %219, %220 : vector<1x384xf32>
    %222 = vector.broadcast %221 : vector<1x384xf32> to vector<12x384xf32>
    %223 = arith.subf %217, %222 : vector<12x384xf32>
    %224 = arith.mulf %223, %223 : vector<12x384xf32>
    %cst_20 = arith.constant dense<0.000000e+00> : vector<384xf32>
    %225 = vector.multi_reduction <add>, %224, %cst_20 [0] : vector<12x384xf32> to vector<384xf32>
    %226 = vector.shape_cast %225 : vector<384xf32> to vector<1x384xf32>
    %cst_21 = arith.constant 1.200000e+01 : f32
    %227 = vector.broadcast %cst_21 : f32 to vector<1x384xf32>
    %228 = arith.divf %226, %227 : vector<1x384xf32>
    %229 = vector.broadcast %221 : vector<1x384xf32> to vector<12x384xf32>
    %230 = arith.subf %217, %229 : vector<12x384xf32>
    %cst_22 = arith.constant 9.99999997E-7 : f32
    %231 = vector.broadcast %cst_22 : f32 to vector<1x384xf32>
    %232 = arith.addf %228, %231 : vector<1x384xf32>
    %233 = math.rsqrt %232 : vector<1x384xf32>
    %234 = vector.broadcast %233 : vector<1x384xf32> to vector<12x384xf32>
    %235 = arith.mulf %230, %234 : vector<12x384xf32>
    %236 = tpu.concatenate %197, %216, %235 in 0 : vector<12x384xf32>, vector<12x384xf32>, vector<12x384xf32> -> vector<36x384xf32>
    %c0_23 = arith.constant 0 : index
    %c0_24 = arith.constant 0 : index
    %237 = vector.load %arg3[%c0_23, %c0_24] : memref<72x128xf32, #tpu.memory_space<vmem>>, vector<36x1xf32>
    %238 = vector.broadcast %237 : vector<36x1xf32> to vector<36x384xf32>
    %239 = arith.mulf %236, %238 : vector<36x384xf32>
    %c0_25 = arith.constant 0 : index
    %c1 = arith.constant 1 : index
    %240 = vector.load %arg3[%c0_25, %c1] : memref<72x128xf32, #tpu.memory_space<vmem>>, vector<36x1xf32>
    %241 = vector.broadcast %240 : vector<36x1xf32> to vector<36x384xf32>
    %242 = arith.addf %239, %241 : vector<36x384xf32>
    %c184 = arith.constant 184 : index
    %c0_26 = arith.constant 0 : index
    %243 = vector.load %arg2[%c184, %c0_26] : memref<600x128xf32, #tpu.memory_space<vmem>>, vector<9x36xf32>
    %cst_27 = arith.constant dense<0.000000e+00> : vector<9x384xf32>
    %244 = tpu.matmul %243, %242, %cst_27 {dimension_numbers = #tpu.dot_dimension_numbers<[1], [0], [0], [1], [0, 0, 1, 1], [], []>} : vector<9x36xf32>, vector<36x384xf32>, vector<9x384xf32> -> vector<9x384xf32>
    %c0_28 = arith.constant 0 : index
    %c2 = arith.constant 2 : index
    %245 = vector.load %arg3[%c0_28, %c2] : memref<72x128xf32, #tpu.memory_space<vmem>>, vector<9x1xf32>
    %246 = vector.broadcast %245 : vector<9x1xf32> to vector<9x384xf32>
    %247 = arith.addf %244, %246 : vector<9x384xf32>
    %248 = arith.negf %247 : vector<9x384xf32>
    %249 = math.exp %248 : vector<9x384xf32>
    %cst_29 = arith.constant 1.000000e+00 : f32
    %250 = vector.broadcast %cst_29 : f32 to vector<9x384xf32>
    %251 = arith.addf %250, %249 : vector<9x384xf32>
    %252 = arith.divf %250, %251 : vector<9x384xf32>
    %253 = vector.extract_strided_slice %252 {offsets = [0, 0], sizes = [3, 384], strides = [1, 1]} : vector<9x384xf32> to vector<3x384xf32>
    %254 = vector.extract_strided_slice %252 {offsets = [3, 0], sizes = [3, 384], strides = [1, 1]} : vector<9x384xf32> to vector<3x384xf32>
    %255 = arith.addf %253, %254 : vector<3x384xf32>
    %256 = vector.extract_strided_slice %252 {offsets = [6, 0], sizes = [3, 384], strides = [1, 1]} : vector<9x384xf32> to vector<3x384xf32>
    %257 = arith.addf %255, %256 : vector<3x384xf32>
    %c200 = arith.constant 200 : index
    %c0_30 = arith.constant 0 : index
    %258 = vector.load %arg2[%c200, %c0_30] : memref<600x128xf32, #tpu.memory_space<vmem>>, vector<128x11xf32>
    %259 = vector.extract_strided_slice %0 {offsets = [0, 0], sizes = [11, 384], strides = [1, 1]} : vector<26x384xf32> to vector<11x384xf32>
    %cst_31 = arith.constant dense<0.000000e+00> : vector<128x384xf32>
    %260 = tpu.matmul %258, %259, %cst_31 {dimension_numbers = #tpu.dot_dimension_numbers<[1], [0], [0], [1], [0, 0, 1, 1], [], []>} : vector<128x11xf32>, vector<11x384xf32>, vector<128x384xf32> -> vector<128x384xf32>
    %261 = vector.extract_strided_slice %260 {offsets = [64, 0], sizes = [64, 384], strides = [1, 1]} : vector<128x384xf32> to vector<64x384xf32>
    %c328 = arith.constant 328 : index
    %c0_32 = arith.constant 0 : index
    %262 = vector.load %arg2[%c328, %c0_32] : memref<600x128xf32, #tpu.memory_space<vmem>>, vector<64x3xf32>
    %cst_33 = arith.constant dense<0.000000e+00> : vector<64x384xf32>
    %263 = tpu.matmul %262, %257, %cst_33 {dimension_numbers = #tpu.dot_dimension_numbers<[1], [0], [0], [1], [0, 0, 1, 1], [], []>} : vector<64x3xf32>, vector<3x384xf32>, vector<64x384xf32> -> vector<64x384xf32>
    %264 = arith.addf %261, %263 : vector<64x384xf32>
    %265 = vector.extract_strided_slice %260 {offsets = [0, 0], sizes = [64, 384], strides = [1, 1]} : vector<128x384xf32> to vector<64x384xf32>
    %266 = arith.addf %265, %264 : vector<64x384xf32>
    %c0_34 = arith.constant 0 : index
    %c3 = arith.constant 3 : index
    %267 = vector.load %arg3[%c0_34, %c3] : memref<72x128xf32, #tpu.memory_space<vmem>>, vector<64x1xf32>
    %268 = vector.broadcast %267 : vector<64x1xf32> to vector<64x384xf32>
    %269 = arith.addf %266, %268 : vector<64x384xf32>
    %cst_35 = arith.constant 0.000000e+00 : f32
    %270 = vector.broadcast %cst_35 : f32 to vector<64x384xf32>
    %271 = arith.maximumf %269, %270 : vector<64x384xf32>
    %c0_36 = arith.constant 0 : index
    %c4 = arith.constant 4 : index
    %272 = vector.load %arg3[%c0_36, %c4] : memref<72x128xf32, #tpu.memory_space<vmem>>, vector<64x1xf32>
    %273 = vector.broadcast %272 : vector<64x1xf32> to vector<64x384xf32>
    %274 = arith.addf %264, %273 : vector<64x384xf32>
    %c392 = arith.constant 392 : index
    %c0_37 = arith.constant 0 : index
    %275 = vector.load %arg2[%c392, %c0_37] : memref<600x128xf32, #tpu.memory_space<vmem>>, vector<64x64xf32>
    %cst_38 = arith.constant dense<0.000000e+00> : vector<64x384xf32>
    %276 = tpu.matmul %275, %271, %cst_38 {dimension_numbers = #tpu.dot_dimension_numbers<[1], [0], [0], [1], [0, 0, 1, 1], [], []>} : vector<64x64xf32>, vector<64x384xf32>, vector<64x384xf32> -> vector<64x384xf32>
    %277 = arith.addf %276, %274 : vector<64x384xf32>
    %cst_39 = arith.constant 0.000000e+00 : f32
    %278 = vector.broadcast %cst_39 : f32 to vector<64x384xf32>
    %279 = arith.maximumf %277, %278 : vector<64x384xf32>
    %cst_40 = arith.constant dense<0.000000e+00> : vector<64x384xf32>
    %280 = tpu.matmul %275, %279, %cst_40 {dimension_numbers = #tpu.dot_dimension_numbers<[1], [0], [0], [1], [0, 0, 1, 1], [], []>} : vector<64x64xf32>, vector<64x384xf32>, vector<64x384xf32> -> vector<64x384xf32>
    %281 = arith.addf %280, %274 : vector<64x384xf32>
    %cst_41 = arith.constant 0.000000e+00 : f32
    %282 = vector.broadcast %cst_41 : f32 to vector<64x384xf32>
    %283 = arith.maximumf %281, %282 : vector<64x384xf32>
    %cst_42 = arith.constant dense<0.000000e+00> : vector<64x384xf32>
    %284 = tpu.matmul %275, %283, %cst_42 {dimension_numbers = #tpu.dot_dimension_numbers<[1], [0], [0], [1], [0, 0, 1, 1], [], []>} : vector<64x64xf32>, vector<64x384xf32>, vector<64x384xf32> -> vector<64x384xf32>
    %285 = arith.addf %284, %274 : vector<64x384xf32>
    %cst_43 = arith.constant 0.000000e+00 : f32
    %286 = vector.broadcast %cst_43 : f32 to vector<64x384xf32>
    %287 = arith.maximumf %285, %286 : vector<64x384xf32>
    %cst_44 = arith.constant dense<0.000000e+00> : vector<64x384xf32>
    %288 = tpu.matmul %275, %287, %cst_44 {dimension_numbers = #tpu.dot_dimension_numbers<[1], [0], [0], [1], [0, 0, 1, 1], [], []>} : vector<64x64xf32>, vector<64x384xf32>, vector<64x384xf32> -> vector<64x384xf32>
    %289 = arith.addf %288, %274 : vector<64x384xf32>
    %cst_45 = arith.constant 0.000000e+00 : f32
    %290 = vector.broadcast %cst_45 : f32 to vector<64x384xf32>
    %291 = arith.maximumf %289, %290 : vector<64x384xf32>
    %cst_46 = arith.constant dense<0.000000e+00> : vector<64x384xf32>
    %292 = tpu.matmul %275, %291, %cst_46 {dimension_numbers = #tpu.dot_dimension_numbers<[1], [0], [0], [1], [0, 0, 1, 1], [], []>} : vector<64x64xf32>, vector<64x384xf32>, vector<64x384xf32> -> vector<64x384xf32>
    %293 = arith.addf %292, %274 : vector<64x384xf32>
    %cst_47 = arith.constant 0.000000e+00 : f32
    %294 = vector.broadcast %cst_47 : f32 to vector<64x384xf32>
    %295 = arith.maximumf %293, %294 : vector<64x384xf32>
    %cst_48 = arith.constant dense<0.000000e+00> : vector<64x384xf32>
    %296 = tpu.matmul %275, %295, %cst_48 {dimension_numbers = #tpu.dot_dimension_numbers<[1], [0], [0], [1], [0, 0, 1, 1], [], []>} : vector<64x64xf32>, vector<64x384xf32>, vector<64x384xf32> -> vector<64x384xf32>
    %297 = arith.addf %296, %274 : vector<64x384xf32>
    %cst_49 = arith.constant 0.000000e+00 : f32
    %298 = vector.broadcast %cst_49 : f32 to vector<64x384xf32>
    %299 = arith.maximumf %297, %298 : vector<64x384xf32>
    %cst_50 = arith.constant dense<0.000000e+00> : vector<64x384xf32>
    %300 = tpu.matmul %275, %299, %cst_50 {dimension_numbers = #tpu.dot_dimension_numbers<[1], [0], [0], [1], [0, 0, 1, 1], [], []>} : vector<64x64xf32>, vector<64x384xf32>, vector<64x384xf32> -> vector<64x384xf32>
    %301 = arith.addf %300, %274 : vector<64x384xf32>
    %cst_51 = arith.constant 0.000000e+00 : f32
    %302 = vector.broadcast %cst_51 : f32 to vector<64x384xf32>
    %303 = arith.maximumf %301, %302 : vector<64x384xf32>
    %c456 = arith.constant 456 : index
    %c0_52 = arith.constant 0 : index
    %304 = vector.load %arg2[%c456, %c0_52] : memref<600x128xf32, #tpu.memory_space<vmem>>, vector<65x64xf32>
    %cst_53 = arith.constant dense<0.000000e+00> : vector<65x384xf32>
    %305 = tpu.matmul %304, %303, %cst_53 {dimension_numbers = #tpu.dot_dimension_numbers<[1], [0], [0], [1], [0, 0, 1, 1], [], []>} : vector<65x64xf32>, vector<64x384xf32>, vector<65x384xf32> -> vector<65x384xf32>
    %c0_54 = arith.constant 0 : index
    %c5 = arith.constant 5 : index
    %306 = vector.load %arg3[%c0_54, %c5] : memref<72x128xf32, #tpu.memory_space<vmem>>, vector<65x1xf32>
    %307 = vector.broadcast %306 : vector<65x1xf32> to vector<65x384xf32>
    %308 = arith.addf %305, %307 : vector<65x384xf32>
    %309 = vector.extract_strided_slice %308 {offsets = [0, 0], sizes = [64, 384], strides = [1, 1]} : vector<65x384xf32> to vector<64x384xf32>
    %310 = vector.extract_strided_slice %308 {offsets = [64, 0], sizes = [1, 384], strides = [1, 1]} : vector<65x384xf32> to vector<1x384xf32>
    %cst_55 = arith.constant 0.000000e+00 : f32
    %311 = vector.broadcast %cst_55 : f32 to vector<1x384xf32>
    %312 = arith.maximumf %310, %311 : vector<1x384xf32>
    %c528 = arith.constant 528 : index
    %c0_56 = arith.constant 0 : index
    %313 = vector.load %arg2[%c528, %c0_56] : memref<600x128xf32, #tpu.memory_space<vmem>>, vector<32x64xf32>
    %cst_57 = arith.constant dense<0.000000e+00> : vector<32x384xf32>
    %314 = tpu.matmul %313, %309, %cst_57 {dimension_numbers = #tpu.dot_dimension_numbers<[1], [0], [0], [1], [0, 0, 1, 1], [], []>} : vector<32x64xf32>, vector<64x384xf32>, vector<32x384xf32> -> vector<32x384xf32>
    %c560 = arith.constant 560 : index
    %c0_58 = arith.constant 0 : index
    %315 = vector.load %arg2[%c560, %c0_58] : memref<600x128xf32, #tpu.memory_space<vmem>>, vector<32x3xf32>
    %cst_59 = arith.constant dense<0.000000e+00> : vector<32x384xf32>
    %316 = tpu.matmul %315, %2, %cst_59 {dimension_numbers = #tpu.dot_dimension_numbers<[1], [0], [0], [1], [0, 0, 1, 1], [], []>} : vector<32x3xf32>, vector<3x384xf32>, vector<32x384xf32> -> vector<32x384xf32>
    %317 = arith.addf %314, %316 : vector<32x384xf32>
    %c0_60 = arith.constant 0 : index
    %c6 = arith.constant 6 : index
    %318 = vector.load %arg3[%c0_60, %c6] : memref<72x128xf32, #tpu.memory_space<vmem>>, vector<32x1xf32>
    %319 = vector.broadcast %318 : vector<32x1xf32> to vector<32x384xf32>
    %320 = arith.addf %317, %319 : vector<32x384xf32>
    %cst_61 = arith.constant 0.000000e+00 : f32
    %321 = vector.broadcast %cst_61 : f32 to vector<32x384xf32>
    %322 = arith.maximumf %320, %321 : vector<32x384xf32>
    %c592 = arith.constant 592 : index
    %c0_62 = arith.constant 0 : index
    %323 = vector.load %arg2[%c592, %c0_62] : memref<600x128xf32, #tpu.memory_space<vmem>>, vector<3x32xf32>
    %cst_63 = arith.constant dense<0.000000e+00> : vector<3x384xf32>
    %324 = tpu.matmul %323, %322, %cst_63 {dimension_numbers = #tpu.dot_dimension_numbers<[1], [0], [0], [1], [0, 0, 1, 1], [], []>} : vector<3x32xf32>, vector<32x384xf32>, vector<3x384xf32> -> vector<3x384xf32>
    %c0_64 = arith.constant 0 : index
    %c7 = arith.constant 7 : index
    %325 = vector.load %arg3[%c0_64, %c7] : memref<72x128xf32, #tpu.memory_space<vmem>>, vector<3x1xf32>
    %326 = vector.broadcast %325 : vector<3x1xf32> to vector<3x384xf32>
    %327 = arith.addf %324, %326 : vector<3x384xf32>
    %328 = arith.negf %327 : vector<3x384xf32>
    %329 = math.exp %328 : vector<3x384xf32>
    %cst_65 = arith.constant 1.000000e+00 : f32
    %330 = vector.broadcast %cst_65 : f32 to vector<3x384xf32>
    %331 = arith.addf %330, %329 : vector<3x384xf32>
    %332 = arith.divf %330, %331 : vector<3x384xf32>
    %333 = tpu.concatenate %332, %312, %257, %257 in 0 : vector<3x384xf32>, vector<1x384xf32>, vector<3x384xf32>, vector<3x384xf32> -> vector<10x384xf32>
    %c0_66 = arith.constant 0 : index
    %c0_67 = arith.constant 0 : index
    %334 = vector.load %arg4[%c0_66, %c0_67] : memref<10x384xf32, #tpu.memory_space<vmem>>, vector<10x384xf32>
    tpu.vector_store %arg4[%c0_66, %c0_67], %333 {strides = array<i32>} : memref<10x384xf32, #tpu.memory_space<vmem>>, vector<10x384xf32>,
    return
  }
  func.func @transform_0(%arg0: i32) -> (i32, i32) {
    %c0_i32 = arith.constant 0 : i32
    %c0_i32_0 = arith.constant 0 : i32
    return %c0_i32, %arg0 : i32, i32
  }
  func.func @transform_1(%arg0: i32) -> (i32, i32) {
    %c0_i32 = arith.constant 0 : i32
    %c0_i32_0 = arith.constant 0 : i32
    %c0_i32_1 = arith.constant 0 : i32
    return %c0_i32, %c0_i32_0 : i32, i32
  }
  func.func @transform_2(%arg0: i32) -> (i32, i32) {
    %c0_i32 = arith.constant 0 : i32
    %c0_i32_0 = arith.constant 0 : i32
    %c0_i32_1 = arith.constant 0 : i32
    return %c0_i32, %c0_i32_0 : i32, i32
  }
  func.func @transform_3(%arg0: i32) -> (i32, i32) {
    %c0_i32 = arith.constant 0 : i32
    %c0_i32_0 = arith.constant 0 : i32
    return %c0_i32, %arg0 : i32, i32
  }
}

</mosaic_0001>

<bundles_post_ra>
// kernel: tpu_custom_call.1
= control target key start
LH: loop header
LB: loop body
LE: loop exit
PB: predicated region body
PF: predicated region fallthrough
CT: control target
= control target key end

     0   :  { %8 = vsyncpa [#allocation3], 0  ;;  %s7867_s0 = inlined_call_operand.hbm [shape: f32[26,3072], index: 0, kind: input, shape index: {}]   ;;  %s7868_s1 = inlined_call_operand.hbm [shape: f32[600,128], index: 1, kind: input, shape index: {}]   ;;  %s7869_s2 = inlined_call_operand.hbm [shape: f32[72,128], index: 2, kind: input, shape index: {}]   ;;  %s7870_s3 = inlined_call_operand.hbm [shape: f32[10,3072], index: 3, kind: output, shape index: {}]  }
   0x1   :  { %10 = vsyncpa [#allocation3 + $0x1], 0 }
   0x2   :  { %11 = vsyncpa [#allocation6], 0 }
   0x3   :  { %12 = vsyncpa [#allocation4], 0 }
   0x4   :  { %14 = vsyncpa [#allocation4 + $0x1], 0  ;;  %s5396_s12 = smov 0   ;;  %s5398_s13 = smov 0  }
   0x5   :  { %s5400_s14 = smov 0   ;;  %s5402_s15 = smov 0  }
   0x6 LB: > { %s5417_s16 = sadd.s32 4294967295, %s5355_s15   ;;  %s4531_s17 = sadd.s32 4294967294, %s5355_s15   ;;  %s5355_s15 = sphi %s5402_s15, %s8008_s15   ;;  %s5351_s14 = sphi %s5400_s14, %s8007_s14   ;;  %s5347_s13 = sphi %s5398_s13, %s8006_s13   ;;  %s5343_s12 = sphi %s5396_s12, %s8005_s12  }
   0x7   : > { %p40_p0 = scmp.ne.s32.totalorder %s5347_s13, %s5343_s12  ;;  %p41_p1 = scmp.eq.s32.totalorder %s5417_s16, 0 }
   0x8   : > { %p106_p2 = scmp.eq.s32.totalorder %s5417_s16, 7  ;;  %p112_p3 = scmp.eq.s32.totalorder %s4531_s17, 7 }
   0x9   : > { %p5426_p4 = por %p41_p1, %p40_p0  ;;  %p4532_p5 = scmp.ge.s32.totalorder %s5355_s15, 1 }
   0xa   : > { %p5431_p6 = por %p112_p3, %p40_p0  ;;  %p119_p7 = scmp.lt.s32.totalorder %s5355_s15, 9 }
   0xb   : > { %s130_s22 = sshll.u32 %s7868_s1, 4  ;;  %s5357_s24 = smov [#allocation5]   ;;  %s131_s22 = int_to_ptr.hbm [resolvable:$true] %s130_s22 }
   0xc   : > { %p5439_p8 = pnand %p4532_p5, %p119_p7  ;;  %s132_s25 = sshll.u32 %s5357_s24, 4  ;;  %s133_s25 = int_to_ptr.vmem [resolvable:$true] %s132_s25 }
   0xd   : > { %s144_s28 = sshll.u32 %s7869_s2, 4  ;;  %s5358_s29 = smov 128   ;;  %s145_s28 = int_to_ptr.hbm [resolvable:$true] %s144_s28 }
   0xe   : > { %p4953_p9 = pneg %p5439_p8  ;;  %s5359_s30 = smov 8  }
   0xf   : > { %s5360_s4 = smov [#allocation7]   ;;  %s5451_s6 = sadd.s32 1, %s5355_s15  }
  0x10   : > { %p4954_p10 = pnand %p4953_p9, %p41_p1  ;;  %s146_s5 = sshll.u32 %s5360_s4, 4  ;;  %s147_s5 = int_to_ptr.vmem [resolvable:$true] %s146_s5 }
  0x11   : > { %s27_s7 = sadd.s32 1, %s5351_s14  ;;  %s24_s8 = ssub.s32 %s5355_s15, %s5451_s6 }
  0x12   : > { %4956 = dma.hbm_to_vmem [thread:$0]  (!%p4954_p10), %s131_s22, 9600, %s133_s25, [#allocation6], %s5358_s29, %s5358_s29, %s5359_s30  }
  0x13   : > { %4959 = dma.hbm_to_vmem [thread:$0]  (!%p4954_p10), %s145_s28, 1152, %s147_s5, [#allocation6], %s5358_s29, %s5358_s29, %s5359_s30  }
  0x14   : > { %p34_p11 = scmp.ne.s32.totalorder %s5351_s14, %s5347_s13  ;;  %p25_p12 = scmp.eq.s32.totalorder %s24_s8, 0 }
  0x15   : > { %p35_p13 = scmp.eq.s32.totalorder %s5355_s15, 0  ;;  %p4970_p3 = scmp.lt.s32.totalorder %s5355_s15, 8 }
  0x16   : > { %p5461_p0 = por %p106_p2, %p34_p11  ;;  %s160_s11 = sand.u32 1, %s5351_s14  }
  0x17   : > { %s5467_s10 = scalar_select %p25_p12, %s5351_s14, %s27_s7  }
  0x18   : > { %p36_p5 = por %p35_p13, %p34_p11  ;;  %s4938_s17 = smul.u32 96, %s160_s11 }
  0x19   : > { %s4936_s20 = smul.u32 24, %s5355_s15  ;;  %s161_s29 = scalar_lea.sflag [#allocation3], %s160_s11 }
  0x1a   : > { %p5471_p7 = pnand %p4970_p3, %p36_p5  ;;  %s164_s26 = scalar_lea.vmem [#allocation2], %s4938_s17 }
  0x1b   : > { %s169_s25 = scalar_lea.hbm %s7867_s0, %s4936_s20  ;;  %s172_s27 = sshll.u32 %s164_s26, 4  ;;  %s173_s27 = int_to_ptr.vmem [resolvable:$true] %s172_s27 }
  0x1c   : > { %s170_s28 = sshll.u32 %s169_s25, 4  ;;  %p5259_p9 = pneg %p5471_p7  ;;  %s171_s28 = int_to_ptr.hbm [resolvable:$true] %s170_s28 }
  0x1d   : > { %s5255_s30 = sshra.s32 %s171_s28, 4  ;;  %s5262_s8 = scalar_lea.hbm %s7867_s0, 768  ;;  %s5256_s30 = int_to_ptr.hbm [resolvable:$true] %s5255_s30 }
  0x1e   : > { %s5257_s4 = scalar_lea.hbm %s5256_s30, 96  ;;  %p5263_p12 = scmp.lt.s32.totalorder %s5256_s30, %s7867_s0 }
  0x1f   : > { %p5258_p2 = scmp.ne.s32.totalorder %s5256_s30, %s5257_s4  ;;  %p5264_p13 = scmp.lt.s32.totalorder %s5262_s8, %s5257_s4 }
  0x21   : > { %p5260_p10 = pnand %p5259_p9, %p5258_p2  ;;  %p5265_p3 = por %p5264_p13, %p5263_p12 }
  0x23   : > { %p5261_p11 = pneg %p5260_p10 }
  0x25   : > { %p5266_p5 = pnand %p5265_p3, %p5261_p11 }
  0x27   : > { %5269 = shalt.err (!%p5266_p5)
}
  0x28   : > { %s5361_s11 = smov 3072   ;;  %s5362_s17 = smov 384  }
  0x29   : > { %s5363_s24 = smov 24   ;;  %184 = sbr.rel (%p5439_p8) target bundleno = 3046 (0xbe6), region = 32 }
  0x2a   : > { %4963 = dma.hbm_to_vmem [thread:$0]  (!%p5471_p7), %s171_s28, 1536, %s173_s27, %s161_s29, %s5361_s11, %s5362_s17, %s5363_s24  }
  0x2e   : > { %s5491_s25 = sand.u32 1, %s5347_s13  }
  0x2f   : > { %s4939_s26 = smul.u32 96, %s5491_s25  ;;  %s187_s30 = scalar_lea.sflag [#allocation3], %s5491_s25 }
  0x31   : > { %s5495_s4 = scalar_lea.vmem [#allocation2], %s4939_s26 }
  0x32   : > { %5330 = dma.done.wait (%p5426_p4), %s187_s30, 1536  }
  0x33   : > { %5332 = vsyncadd (%p5426_p4), %s187_s30, 4294965760 }
  0x34   : > { %5334 = dma.done.wait (%p41_p1), [#allocation6], 10752  }
  0x35   : > { %5336 = vsyncadd (%p41_p1), [#allocation6], 4294956544  ;;  %v232_v0 = vld [vmem:[%s5495_s4 + $0x30] sm:$0xff]  ;;  %vm342_vm0 = vcmask 1043456   ;;  %v233_v1 = vld [vmem:[%s5495_s4 + $0x38] sm:$0xff]  ;;  %vm265_vm1 = vcmask 1044480  }
  0x36   : > { %v234_v2 = vld [vmem:[%s5495_s4 + $0x40] sm:$0xff]  ;;  %v5508_v3 = vrot.slane %v232_v0, 3  ;;  %v5510_v4 = vrot.slane %v233_v1, 3  ;;  %v229_v5 = vld [vmem:[%s5495_s4 + $0x18] sm:$0xff]  ;;  %v231_v10 = vld [vmem:[%s5495_s4 + $0x28] sm:$0xff]  ;;  %vm287_vm2 = vcmask 162816  }
  0x37   : > { %v230_v6 = vld [vmem:[%s5495_s4 + $0x20] sm:$0xff]  ;;  %v5514_v7 = vrot.slane %v234_v2, 3  ;;  %v5516_v8 = vrot.slane %v229_v5, 3  ;;  %v5526_v12 = vrot.slane %v231_v10, 3  ;;  %v227_v14 = vld [vmem:[%s5495_s4 + $0x8] sm:$0xff]  ;;  %v228_v15 = vld [vmem:[%s5495_s4 + $0x10] sm:$0xff] }
  0x38   : > { %7922 = vst [vmem:[#allocation12_spill] sm:$0xff] %v5508_v3  ;;  %v5518_v9 = vrot.slane %v230_v6, 3  ;;  %v226_v11 = vld [vmem:[%s5495_s4] sm:$0xff]  ;;  %4540 = vmatpush.msk.msra.mxu0 %vm342_vm0, %v5508_v3  ;;  %4559 = vmatpush.msk.msra.mxu1 %vm342_vm0, %v5510_v4  ;;  %v269_v18 = vrot.slane %v227_v14, 3  ;;  %v272_v19 = vrot.slane %v228_v15, 3  ;;  %v239_v25 = vld [vmem:[#allocation5 + $0x8] sm:$0xff] }
  0x39   : > { %7923 = vst [vmem:[#allocation13_spill] sm:$0xff] %v5510_v4  ;;  %v266_v13 = vrot.slane %v226_v11, 3  ;;  %4578 = vmatpush.msk.msra.mxu2 %vm342_vm0, %v5514_v7  ;;  %v5535_v16 = vsel %vm265_vm1, %v5516_v8, %v5508_v3  ;;  %v5547_v20 = vsel %vm265_vm1, %v5526_v12, %v5514_v7  ;;  %v238_v22 = vld [vmem:[#allocation5] sm:$0xff]  ;;  %v240_v26 = vld [vmem:[#allocation5 + $0x10] sm:$0xff]  ;;  %v241_v27 = vld [vmem:[#allocation5 + $0x18] sm:$0xff]  ;;  %vm1264_vm3 = vcmask 392192  }
  0x3a   : > { %7924 = vst [vmem:[#allocation14_spill] sm:$0xff] %v5514_v7  ;;  %v5540_v17 = vsel %vm265_vm1, %v5518_v9, %v5510_v4  ;;  %363 = vmatpush.msra.mxu0 %v5535_v16  ;;  %v5556_v23 = vsel %vm265_vm1, %v269_v18, %v5518_v9  ;;  %v5560_v24 = vsel %vm265_vm1, %v272_v19, %v5526_v12  ;;  %v242_v28 = vld [vmem:[#allocation5 + $0x20] sm:$0xff]  ;;  %v243_v29 = vld [vmem:[#allocation5 + $0x28] sm:$0xff]  ;;  %v244_v30 = vld [vmem:[#allocation5 + $0x30] sm:$0xff]  ;;  %vm1231_vm4 = vcmask 1040384   ;;  %s4940_s18 = smul.u32 48, %s5491_s25 }
  0x3b   : > { %7925 = vst [vmem:[#allocation15_spill] sm:$0xff] %v5516_v8  ;;  %434 = vmatpush.msra.mxu1 %v5540_v17  ;;  %v5551_v21 = vsel %vm265_vm1, %v266_v13, %v5516_v8  ;;  %505 = vmatpush.msra.mxu2 %v5547_v20  ;;  %v245_v31 = vld [vmem:[#allocation5 + $0x38] sm:$0xff]  ;;  %v246_v32 = vld [vmem:[#allocation5 + $0x40] sm:$0xff]  ;;  %v247_v33 = vld [vmem:[#allocation5 + $0x48] sm:$0xff]  ;;  %vm1837_vm15 = vcmask 293888   ;;  %s4937_s21 = smul.u32 24, %s5417_s16 }
  0x3c   : > { %7926 = vst [vmem:[#allocation16_spill] sm:$0xff] %v5518_v9  ;;  %364 = vmatpush.msra.mxu0 %v5551_v21  ;;  %v248_v34 = vld [vmem:[#allocation5 + $0x50] sm:$0xff]  ;;  %v249_v35 = vld [vmem:[#allocation5 + $0x58] sm:$0xff]  ;;  %v250_v36 = vld [vmem:[#allocation5 + $0x60] sm:$0xff]  ;;  %s6589_s23 = scalar_lea.vmem [#allocation8], %s4940_s18  ;;  %s4424_s7 = scalar_lea.sflag [#allocation4], %s5491_s25 }
  0x3d   : > { %7927 = vst [vmem:[#allocation17_spill] sm:$0xff] %v5526_v12  ;;  %435 = vmatpush.msra.mxu1 %v5556_v23  ;;  %506 = vmatpush.msra.mxu2 %v5560_v24  ;;  %v251_v37 = vld [vmem:[#allocation5 + $0x68] sm:$0xff]  ;;  %v252_v38 = vld [vmem:[#allocation5 + $0x70] sm:$0xff]  ;;  %v253_v39 = vld [vmem:[#allocation5 + $0x78] sm:$0xff]  ;;  %s4435_s29 = scalar_lea.hbm %s7870_s3, %s4937_s21  ;;  %s4436_s5 = sshll.u32 %s6589_s23, 4  ;;  %s4437_s5 = int_to_ptr.vmem [resolvable:$true] %s4436_s5 }
  0x3e   : > { %7928 = vst [vmem:[#allocation18_spill] sm:$0xff] %v5535_v16  ;;  %4541 = vmatmul.msk.f32.vlgmr.msra.gmra.mxu0 %vm287_vm2, %v238_v22  ;;  %4560 = vmatmul.msk.f32.vlgmr.msra.gmra.mxu1 %vm287_vm2, %v238_v22  ;;  %v254_v41 = vld [vmem:[#allocation5 + $0x80] sm:$0xff]  ;;  %v255_v45 = vld [vmem:[#allocation5 + $0x88] sm:$0xff]  ;;  %s4438_s16 = sshll.u32 %s4435_s29, 4  ;;  %s5305_s17 = scalar_lea.hbm %s7870_s3, 384  ;;  %s4439_s16 = int_to_ptr.hbm [resolvable:$true] %s4438_s16 }
  0x3f   : > { %7929 = vst [vmem:[#allocation19_spill] sm:$0xff] %v5540_v17  ;;  %4579 = vmatmul.msk.f32.vlgmr.msra.gmra.mxu2 %vm287_vm2, %v238_v22  ;;  %s5299_s8 = sshra.s32 %s4439_s16, 4  ;;  %s5300_s8 = int_to_ptr.hbm [resolvable:$true] %s5299_s8 }
  0x40   : > { %7930 = vst [vmem:[#allocation20_spill] sm:$0xff] %v5547_v20  ;;  %s5301_s22 = scalar_lea.hbm %s5300_s8, 48  ;;  %p5306_p7 = scmp.lt.s32.totalorder %s5300_s8, %s7870_s3 }
  0x41   : > { %7931 = vst [vmem:[#allocation21_spill] sm:$0xff] %v5551_v21  ;;  %p5302_p1 = scmp.ne.s32.totalorder %s5300_s8, %s5301_s22  ;;  %p5307_p2 = scmp.lt.s32.totalorder %s5305_s17, %s5301_s22 }
  0x42   : > { %7932 = vst [vmem:[#allocation22_spill] sm:$0xff] %v5556_v23 }
  0x43   : > { %7933 = vst [vmem:[#allocation23_spill] sm:$0xff] %v5560_v24  ;;  %p5303_p4 = pnand %p5302_p1, %p5461_p0  ;;  %p5308_p9 = por %p5307_p2, %p5306_p7 }
  0x45   : > { %p5304_p8 = pneg %p5303_p4 }
  0x46   : > { %4542 = vmatmul.msk.f32.gmra.mxu0 %vm287_vm2, %v239_v25  ;;  %4561 = vmatmul.msk.f32.gmra.mxu1 %vm287_vm2, %v239_v25 }
  0x47   : > { %4580 = vmatmul.msk.f32.gmra.mxu2 %vm287_vm2, %v239_v25  ;;  %p5309_p10 = pnand %p5308_p9, %p5304_p8 }
  0x4e   : > { %4543 = vmatmul.msk.f32.gmra.mxu0 %vm287_vm2, %v240_v26  ;;  %4562 = vmatmul.msk.f32.gmra.mxu1 %vm287_vm2, %v240_v26 }
  0x4f   : > { %4581 = vmatmul.msk.f32.gmra.mxu2 %vm287_vm2, %v240_v26 }
  0x56   : > { %4544 = vmatmul.msk.f32.gmra.mxu0 %vm287_vm2, %v241_v27  ;;  %4563 = vmatmul.msk.f32.gmra.mxu1 %vm287_vm2, %v241_v27 }
  0x57   : > { %4582 = vmatmul.msk.f32.gmra.mxu2 %vm287_vm2, %v241_v27 }
  0x5e   : > { %4545 = vmatmul.msk.f32.gmra.mxu0 %vm287_vm2, %v242_v28  ;;  %4564 = vmatmul.msk.f32.gmra.mxu1 %vm287_vm2, %v242_v28 }
  0x5f   : > { %4583 = vmatmul.msk.f32.gmra.mxu2 %vm287_vm2, %v242_v28 }
  0x66   : > { %4546 = vmatmul.msk.f32.gmra.mxu0 %vm287_vm2, %v243_v29  ;;  %4565 = vmatmul.msk.f32.gmra.mxu1 %vm287_vm2, %v243_v29 }
  0x67   : > { %4584 = vmatmul.msk.f32.gmra.mxu2 %vm287_vm2, %v243_v29 }
  0x6e   : > { %4547 = vmatmul.msk.f32.gmra.mxu0 %vm287_vm2, %v244_v30  ;;  %4566 = vmatmul.msk.f32.gmra.mxu1 %vm287_vm2, %v244_v30 }
  0x6f   : > { %4585 = vmatmul.msk.f32.gmra.mxu2 %vm287_vm2, %v244_v30 }
  0x76   : > { %4548 = vmatmul.msk.f32.gmra.mxu0 %vm287_vm2, %v245_v31  ;;  %4567 = vmatmul.msk.f32.gmra.mxu1 %vm287_vm2, %v245_v31 }
  0x77   : > { %4586 = vmatmul.msk.f32.gmra.mxu2 %vm287_vm2, %v245_v31 }
  0x7e   : > { %4549 = vmatmul.msk.f32.gmra.mxu0 %vm287_vm2, %v246_v32  ;;  %4568 = vmatmul.msk.f32.gmra.mxu1 %vm287_vm2, %v246_v32 }
  0x7f   : > { %4587 = vmatmul.msk.f32.gmra.mxu2 %vm287_vm2, %v246_v32 }
  0x86   : > { %4550 = vmatmul.msk.f32.gmra.mxu0 %vm287_vm2, %v247_v33  ;;  %4569 = vmatmul.msk.f32.gmra.mxu1 %vm287_vm2, %v247_v33 }
  0x87   : > { %4588 = vmatmul.msk.f32.gmra.mxu2 %vm287_vm2, %v247_v33 }
  0x8e   : > { %4551 = vmatmul.msk.f32.gmra.mxu0 %vm287_vm2, %v248_v34  ;;  %4570 = vmatmul.msk.f32.gmra.mxu1 %vm287_vm2, %v248_v34 }
  0x8f   : > { %4589 = vmatmul.msk.f32.gmra.mxu2 %vm287_vm2, %v248_v34 }
  0x96   : > { %4552 = vmatmul.msk.f32.gmra.mxu0 %vm287_vm2, %v249_v35  ;;  %4571 = vmatmul.msk.f32.gmra.mxu1 %vm287_vm2, %v249_v35 }
  0x97   : > { %4590 = vmatmul.msk.f32.gmra.mxu2 %vm287_vm2, %v249_v35 }
  0x9e   : > { %4553 = vmatmul.msk.f32.gmra.mxu0 %vm287_vm2, %v250_v36  ;;  %4572 = vmatmul.msk.f32.gmra.mxu1 %vm287_vm2, %v250_v36 }
  0x9f   : > { %4591 = vmatmul.msk.f32.gmra.mxu2 %vm287_vm2, %v250_v36 }
  0xa6   : > { %4554 = vmatmul.msk.f32.gmra.mxu0 %vm287_vm2, %v251_v37  ;;  %4573 = vmatmul.msk.f32.gmra.mxu1 %vm287_vm2, %v251_v37 }
  0xa7   : > { %4592 = vmatmul.msk.f32.gmra.mxu2 %vm287_vm2, %v251_v37 }
  0xae   : > { %4555 = vmatmul.msk.f32.gmra.mxu0 %vm287_vm2, %v252_v38  ;;  %4574 = vmatmul.msk.f32.gmra.mxu1 %vm287_vm2, %v252_v38 }
  0xaf   : > { %4593 = vmatmul.msk.f32.gmra.mxu2 %vm287_vm2, %v252_v38 }
  0xb6   : > { %4556 = vmatmul.msk.f32.gmra.mxu0 %vm287_vm2, %v253_v39  ;;  %4575 = vmatmul.msk.f32.gmra.mxu1 %vm287_vm2, %v253_v39 }
  0xb7   : > { %4594 = vmatmul.msk.f32.gmra.mxu2 %vm287_vm2, %v253_v39 }
  0xbb   : > { %v5613_v40 = vpop.f32.mrf.mxu0  ;;  %v5615_v42 = vpop.f32.mrf.mxu1 }
  0xbe   : > { %4557 = vmatmul.msk.f32.gmra.mxu0 %vm287_vm2, %v254_v41  ;;  %4576 = vmatmul.msk.f32.gmra.mxu1 %vm287_vm2, %v254_v41 }
  0xbf   : > { %4595 = vmatmul.msk.f32.gmra.mxu2 %vm287_vm2, %v254_v41 }
  0xc2   : > { %v5620_v43 = vpop.f32.mrf.mxu2 }
  0xc3   : > { %v5622_v44 = vpop.f32.mrf.mxu0  ;;  %v5624_v46 = vpop.f32.mrf.mxu1 }
  0xc6   : > { %4558 = vmatmul.msk.f32.gmra.mxu0 %vm287_vm2, %v255_v45  ;;  %4577 = vmatmul.msk.f32.gmra.mxu1 %vm287_vm2, %v255_v45 }
  0xc7   : > { %4596 = vmatmul.msk.f32.gmra.mxu2 %vm287_vm2, %v255_v45 }
  0xca   : > { %v5629_v47 = vpop.f32.mrf.mxu2 }
  0xcb   : > { %v5631_v48 = vpop.f32.mrf.mxu0  ;;  %v5633_v49 = vpop.f32.mrf.mxu1 }
  0xcc   : > { %v562_v18 = vmul.f32 %v5631_v48, %v5613_v40  ;;  %v563_v19 = vmul.f32 %v5633_v49, %v5615_v42 }
  0xce   : > { %v571_v28 = vrot.slane %v562_v18, 4  ;;  %v572_v29 = vrot.slane %v563_v19, 4 }
  0xd0   : > { %v577_v34 = vadd.f32 %v571_v28, %v562_v18  ;;  %v578_v35 = vadd.f32 %v572_v29, %v563_v19 }
  0xd2   : > { %v5635_v50 = vpop.f32.mrf.mxu2 }
  0xd3   : > { %v5637_v51 = vpop.f32.mrf.mxu0  ;;  %v5639_v52 = vpop.f32.mrf.mxu1  ;;  %v564_v25 = vmul.f32 %v5635_v50, %v5620_v43 }
  0xd4   : > { %v565_v32 = vmul.f32 %v5637_v51, %v5622_v44  ;;  %v566_v36 = vmul.f32 %v5639_v52, %v5624_v46 }
  0xd5   : > { %v573_v30 = vrot.slane %v564_v25, 4 }
  0xd6   : > { %v580_v24 = vadd.f32 %v577_v34, %v565_v32  ;;  %v586_v18 = vrot.slane %v565_v32, 4  ;;  %v581_v29 = vadd.f32 %v578_v35, %v566_v36 }
  0xd7   : > { %v579_v37 = vadd.f32 %v573_v30, %v564_v25  ;;  %v587_v30 = vrot.slane %v566_v36, 4 }
  0xd8   : > { %v5729_v36 = vadd.f32 %v586_v18, %v580_v24 }
  0xda   : > { %v5641_v53 = vpop.f32.mrf.mxu2 }
  0xdb   : > { %v5643_v54 = vpop.f32.mrf.mxu0  ;;  %v5645_v55 = vpop.f32.mrf.mxu1  ;;  %v567_v38 = vmul.f32 %v5641_v53, %v5629_v47 }
  0xdc   : > { %7934 = vst [vmem:[#allocation24_spill] sm:$0xff] %v5643_v54 }
  0xdd   : > { %7935 = vst [vmem:[#allocation25_spill] sm:$0xff] %v5645_v55  ;;  %v582_v23 = vadd.f32 %v579_v37, %v567_v38  ;;  %v588_v9 = vrot.slane %v567_v38, 4 }
  0xe2   : > { %v5647_v56 = vpop.f32.mrf.mxu2 }
  0xe3   : > { %7936 = vst [vmem:[#allocation26_spill] sm:$0xff] %v5647_v56  ;;  %v5649_v57 = vpop.f32.mrf.mxu0  ;;  %v5651_v58 = vpop.f32.mrf.mxu1 }
  0xe4   : > { %7937 = vst [vmem:[#allocation27_spill] sm:$0xff] %v5649_v57 }
  0xe5   : > { %7938 = vst [vmem:[#allocation28_spill] sm:$0xff] %v5651_v58 }
  0xea   : > { %v5653_v59 = vpop.f32.mrf.mxu2 }
  0xeb   : > { %7939 = vst [vmem:[#allocation29_spill] sm:$0xff] %v5653_v59  ;;  %v5655_v60 = vpop.f32.mrf.mxu0  ;;  %v5657_v61 = vpop.f32.mrf.mxu1 }
  0xec   : > { %v784_v31 = vmul.f32 %v5655_v60, %v5631_v48  ;;  %v785_v33 = vmul.f32 %v5657_v61, %v5633_v49 }
  0xee   : > { %v793_v39 = vrot.slane %v784_v31, 4  ;;  %v794_v12 = vrot.slane %v785_v33, 4 }
  0xf0   : > { %v799_v32 = vadd.f32 %v793_v39, %v784_v31  ;;  %v800_v3 = vadd.f32 %v794_v12, %v785_v33  ;;  %v5733_v12 = vadd.f32 %v588_v9, %v582_v23 }
  0xf2   : > { %v5659_v62 = vpop.f32.mrf.mxu2  ;;  %7946 = vst [vmem:[#allocation36_spill] sm:$0xff] %v5733_v12 }
  0xf3   : > { %v5661_v63 = vpop.f32.mrf.mxu0  ;;  %v5663_v0 = vpop.f32.mrf.mxu1  ;;  %v786_v41 = vmul.f32 %v5659_v62, %v5635_v50 }
  0xf4   : > { %v787_v4 = vmul.f32 %v5661_v63, %v5637_v51  ;;  %v788_v21 = vmul.f32 %v5663_v0, %v5639_v52 }
  0xf5   : > { %v795_v17 = vrot.slane %v786_v41, 4 }
  0xf6   : > { %v802_v37 = vadd.f32 %v799_v32, %v787_v4  ;;  %v808_v31 = vrot.slane %v787_v4, 4  ;;  %v803_v24 = vadd.f32 %v800_v3, %v788_v21 }
  0xf7   : > { %v801_v33 = vadd.f32 %v795_v17, %v786_v41 }
  0xf8   : > { %v5749_v32 = vadd.f32 %v808_v31, %v802_v37 }
  0xfa   : > { %v5665_v1 = vpop.f32.mrf.mxu2 }
  0xfb   : > { %v5667_v2 = vpop.f32.mrf.mxu0  ;;  %v5669_v5 = vpop.f32.mrf.mxu1  ;;  %v789_v3 = vmul.f32 %v5665_v1, %v5641_v53 }
  0xfc   : > { %v595_v19 = vmul.f32 %v5667_v2, %v5613_v40  ;;  %v817_v25 = vmul.f32 %v5667_v2, %v5655_v60  ;;  %v818_v28 = vmul.f32 %v5669_v5, %v5657_v61  ;;  %v596_v34 = vmul.f32 %v5669_v5, %v5615_v42 }
  0xfe   : > { %v604_v16 = vrot.slane %v595_v19, 4  ;;  %v827_v56 = vrot.slane %v818_v28, 4  ;;  %v605_v38 = vrot.slane %v596_v34, 4 }
 0x100   : > { %v610_v4 = vadd.f32 %v604_v16, %v595_v19  ;;  %v833_v23 = vadd.f32 %v827_v56, %v818_v28  ;;  %v611_v58 = vadd.f32 %v605_v38, %v596_v34 }
 0x102   : > { %v5671_v6 = vpop.f32.mrf.mxu2 }
 0x103   : > { %v5673_v10 = vpop.f32.mrf.mxu0  ;;  %v5675_v11 = vpop.f32.mrf.mxu1  ;;  %v597_v8 = vmul.f32 %v5671_v6, %v5620_v43  ;;  %v819_v35 = vmul.f32 %v5671_v6, %v5659_v62 }
 0x104   : > { %v598_v39 = vmul.f32 %v5673_v10, %v5622_v44  ;;  %v820_v59 = vmul.f32 %v5673_v10, %v5661_v63  ;;  %v821_v17 = vmul.f32 %v5675_v11, %v5663_v0 }
 0x105   : > { %v606_v18 = vrot.slane %v597_v8, 4  ;;  %v828_v55 = vrot.slane %v819_v35, 4 }
 0x106   : > { %v619_v54 = vrot.slane %v598_v39, 4  ;;  %v841_v57 = vrot.slane %v820_v59, 4  ;;  %v836_v19 = vadd.f32 %v833_v23, %v821_v17 }
 0x107   : > { %v612_v12 = vadd.f32 %v606_v18, %v597_v8  ;;  %v834_v16 = vadd.f32 %v828_v55, %v819_v35  ;;  %v804_v55 = vadd.f32 %v801_v33, %v789_v3 }
 0x10a   : > { %v5677_v13 = vpop.f32.mrf.mxu2 }
 0x10b   : > { %v5679_v14 = vpop.f32.mrf.mxu0  ;;  %v5681_v15 = vpop.f32.mrf.mxu1  ;;  %v600_v28 = vmul.f32 %v5677_v13, %v5629_v47 }
 0x10c   : > { %7940 = vst [vmem:[#allocation30_spill] sm:$0xff] %v5679_v14  ;;  %v613_v14 = vadd.f32 %v610_v4, %v598_v39 }
 0x10d   : > { %7941 = vst [vmem:[#allocation31_spill] sm:$0xff] %v5681_v15  ;;  %v615_v18 = vadd.f32 %v612_v12, %v600_v28 }
 0x10e   : > { %v5765_v35 = vadd.f32 %v619_v54, %v613_v14 }
 0x112   : > { %v5687_v22 = vpop.f32.mrf.mxu2 }
 0x113   : > { %7942 = vst [vmem:[#allocation32_spill] sm:$0xff] %v5687_v22  ;;  %v5691_v26 = vpop.f32.mrf.mxu0  ;;  %v5693_v27 = vpop.f32.mrf.mxu1  ;;  %v826_v22 = vrot.slane %v817_v25, 4 }
 0x114   : > { %7943 = vst [vmem:[#allocation33_spill] sm:$0xff] %v5691_v26 }
 0x115   : > { %7944 = vst [vmem:[#allocation34_spill] sm:$0xff] %v5693_v27  ;;  %v832_v9 = vadd.f32 %v826_v22, %v817_v25  ;;  %v809_v27 = vrot.slane %v788_v21, 4  ;;  %v842_v25 = vrot.slane %v821_v17, 4  ;;  %v822_v21 = vmul.f32 %v5677_v13, %v5665_v1 }
 0x117   : > { %v835_v26 = vadd.f32 %v832_v9, %v820_v59  ;;  %v5757_v37 = vadd.f32 %v809_v27, %v803_v24  ;;  %v837_v33 = vadd.f32 %v834_v16, %v822_v21 }
 0x119   : > { %v5769_v39 = vadd.f32 %v841_v57, %v835_v26  ;;  %v661_v57 = vmax.f32 %v5729_v36, %v5765_v35 }
 0x11a   : > { %v5707_v45 = vpop.f32.mrf.mxu2 }
 0x11b   : > { %7945 = vst [vmem:[#allocation35_spill] sm:$0xff] %v5707_v45  ;;  %v5709_v7 = vpop.f32.mrf.mxu0  ;;  %v5711_v20 = vpop.f32.mrf.mxu1  ;;  %v5731_v45 = vadd.f32 %v587_v30, %v581_v29  ;;  %v599_v29 = vmul.f32 %v5675_v11, %v5624_v46  ;;  %v883_v12 = vmax.f32 %v5749_v32, %v5769_v39 }
 0x11c   : > { %v1006_v34 = vmul.f32 %v5709_v7, %v5631_v48  ;;  %v1039_v59 = vmul.f32 %v5709_v7, %v5667_v2  ;;  %v1007_v8 = vmul.f32 %v5711_v20, %v5633_v49  ;;  %v1040_v31 = vmul.f32 %v5711_v20, %v5669_v5 }
 0x11d   : > { %v614_v22 = vadd.f32 %v611_v58, %v599_v29  ;;  %v620_v56 = vrot.slane %v599_v29, 4  ;;  %v810_v58 = vrot.slane %v789_v3, 4  ;;  %v5775_v2 = vadd.f32 %v842_v25, %v836_v19 }
 0x11e   : > { %v621_v49 = vrot.slane %v600_v28, 4  ;;  %v843_v29 = vrot.slane %v822_v21, 4  ;;  %v1015_v54 = vrot.slane %v1006_v34, 4  ;;  %v1048_v14 = vrot.slane %v1039_v59, 4 }
 0x11f   : > { %v5771_v27 = vadd.f32 %v620_v56, %v614_v22  ;;  %v1016_v4 = vrot.slane %v1007_v8, 4  ;;  %v5777_v5 = vadd.f32 %v810_v58, %v804_v55  ;;  %v1049_v26 = vrot.slane %v1040_v31, 4 }
 0x120   : > { %v5791_v22 = vadd.f32 %v621_v49, %v615_v18  ;;  %v5797_v19 = vadd.f32 %v843_v29, %v837_v33  ;;  %v1021_v25 = vadd.f32 %v1015_v54, %v1006_v34  ;;  %v1054_v28 = vadd.f32 %v1048_v14, %v1039_v59 }
 0x121   : > { %7947 = vst [vmem:[#allocation37_spill] sm:$0xff] %v5777_v5  ;;  %v1022_v21 = vadd.f32 %v1016_v4, %v1007_v8  ;;  %v1055_v55 = vadd.f32 %v1049_v26, %v1040_v31 }
 0x122   : > { %v5747_v41 = vpop.f32.mrf.mxu2  ;;  %7948 = vst [vmem:[#allocation38_spill] sm:$0xff] %v5791_v22 }
 0x123   : > { %v5739_v15 = vpop.f32.mrf.mxu0  ;;  %v5743_v30 = vpop.f32.mrf.mxu1  ;;  %v1041_v56 = vmul.f32 %v5747_v41, %v5671_v6 }
 0x124   : > { %v1042_v23 = vmul.f32 %v5739_v15, %v5673_v10  ;;  %v1010_v34 = vmul.f32 %v5743_v30, %v5639_v52 }
 0x12b   : > { %v408_v38 = vpop.f32.mrf.mxu0  ;;  %v479_v9 = vpop.f32.mrf.mxu1 }
 0x12c   : > { %v628_v48 = vmul.f32 %v408_v38, %v5613_v40  ;;  %v850_v24 = vmul.f32 %v408_v38, %v5655_v60  ;;  %v1008_v40 = vmul.f32 %v5747_v41, %v5635_v50  ;;  %v5783_v60 = vpop.f32.mrf.mxu2  ;;  %v1009_v50 = vmul.f32 %v5739_v15, %v5637_v51 }
 0x12d   : > { %v1072_v16 = vmul.f32 %v408_v38, %v5709_v7  ;;  %v1050_v51 = vrot.slane %v1041_v56, 4  ;;  %v851_v59 = vmul.f32 %v479_v9, %v5657_v61  ;;  %v1073_v8 = vmul.f32 %v479_v9, %v5711_v20 }
 0x12e   : > { %v637_v17 = vrot.slane %v628_v48, 4  ;;  %v859_v3 = vrot.slane %v850_v24, 4  ;;  %v1017_v58 = vrot.slane %v1008_v40, 4  ;;  %v1024_v33 = vadd.f32 %v1021_v25, %v1009_v50 }
 0x12f   : > { %v1030_v7 = vrot.slane %v1009_v50, 4  ;;  %v1057_v38 = vadd.f32 %v1054_v28, %v1042_v23  ;;  %v5814_v4 = vadd.f32 %v1050_v51, %v1041_v56  ;;  %v629_v20 = vmul.f32 %v479_v9, %v5615_v42 }
 0x130   : > { %v643_v49 = vadd.f32 %v637_v17, %v628_v48  ;;  %v865_v5 = vadd.f32 %v859_v3, %v850_v24  ;;  %v1063_v48 = vrot.slane %v1042_v23, 4  ;;  %v5808_v54 = vadd.f32 %v1017_v58, %v1008_v40 }
 0x131   : > { %v860_v61 = vrot.slane %v851_v59, 4  ;;  %v1025_v17 = vadd.f32 %v1022_v21, %v1010_v34  ;;  %v1031_v3 = vrot.slane %v1010_v34, 4  ;;  %v1082_v23 = vrot.slane %v1073_v8, 4 }
 0x132   : > { %v5820_v50 = vadd.f32 %v1063_v48, %v1057_v38  ;;  %v638_v9 = vrot.slane %v629_v20, 4 }
 0x133   : > { %v411_v18 = vpop.f32.mrf.mxu0  ;;  %v482_v52 = vpop.f32.mrf.mxu1 }
 0x134   : > { %v631_v6 = vmul.f32 %v411_v18, %v5622_v44  ;;  %v853_v22 = vmul.f32 %v411_v18, %v5661_v63  ;;  %v1043_v44 = vmul.f32 %v5743_v30, %v5675_v11  ;;  %v1081_v63 = vrot.slane %v1072_v16, 4  ;;  %v550_v26 = vpop.f32.mrf.mxu2 }
 0x135   : > { %v1075_v40 = vmul.f32 %v411_v18, %v5739_v15  ;;  %v854_v25 = vmul.f32 %v482_v52, %v5663_v0  ;;  %v1088_v15 = vadd.f32 %v1082_v23, %v1073_v8  ;;  %v630_v18 = vmul.f32 %v550_v26, %v5620_v43 }
 0x136   : > { %v646_v31 = vadd.f32 %v643_v49, %v631_v6  ;;  %v652_v10 = vrot.slane %v631_v6, 4  ;;  %v868_v29 = vadd.f32 %v865_v5, %v853_v22  ;;  %v874_v24 = vrot.slane %v853_v22, 4 }
 0x137   : > { %v5818_v22 = vadd.f32 %v1030_v7, %v1024_v33  ;;  %v1058_v28 = vadd.f32 %v1055_v55, %v1043_v44  ;;  %v1064_v56 = vrot.slane %v1043_v44, 4  ;;  %v1087_v58 = vadd.f32 %v1081_v63, %v1072_v16 }
 0x138   : > { %v5812_v14 = vadd.f32 %v652_v10, %v646_v31  ;;  %v880_v5 = vadd.f32 %v874_v24, %v868_v29  ;;  %v866_v49 = vadd.f32 %v860_v61, %v851_v59  ;;  %v1096_v33 = vrot.slane %v1075_v40, 4 }
 0x139   : > { %v1090_v51 = vadd.f32 %v1087_v58, %v1075_v40  ;;  %v875_v0 = vrot.slane %v854_v25, 4  ;;  %v1076_v55 = vmul.f32 %v482_v52, %v5743_v30  ;;  %v5830_v16 = vadd.f32 %v1031_v3, %v1025_v17 }
 0x13a   : > { %v886_v11 = vmax.f32 %v883_v12, %v880_v5  ;;  %v5824_v42 = vmax.f32 %v661_v57, %v5812_v14  ;;  %v869_v34 = vadd.f32 %v866_v49, %v854_v25  ;;  %v5837_v8 = vadd.f32 %v1064_v56, %v1058_v28 }
 0x13b   : > { %v1011_v43 = vmul.f32 %v5783_v60, %v5641_v53  ;;  %v644_v10 = vadd.f32 %v638_v9, %v629_v20  ;;  %v852_v30 = vmul.f32 %v550_v26, %v5659_v62  ;;  %v1102_v7 = vadd.f32 %v1096_v33, %v1090_v51 }
 0x13c   : > { %v889_v21 = vsub.f32 %v5749_v32, %v886_v11  ;;  %v898_v6 = vsub.f32 %v5769_v39, %v886_v11  ;;  %v667_v57 = vsub.f32 %v5729_v36, %v5824_v42  ;;  %v632_v32 = vmul.f32 %v482_v52, %v5624_v46  ;;  %v553_v48 = vpop.f32.mrf.mxu2 }
 0x13d   : > { %v1105_v39 = vmax.f32 %v5818_v22, %v5820_v50  ;;  %v907_v31 = vsub.f32 %v880_v5, %v886_v11  ;;  %v676_v29 = vsub.f32 %v5765_v35, %v5824_v42  ;;  %v639_v36 = vrot.slane %v630_v18, 4 }
 0x13e   : > { %v892_v12 = vmul.f32 1.442695, %v889_v21  ;;  %v901_v59 = vmul.f32 1.442695, %v898_v6  ;;  %v5844_v38 = vadd.f32 %v875_v0, %v869_v34  ;;  %v1091_v46 = vadd.f32 %v1088_v15, %v1076_v55  ;;  %v7951_v0 = vld [vmem:[#allocation38_spill] sm:$0xff] }
 0x13f   : > { %v670_v24 = vmul.f32 1.442695, %v667_v57  ;;  %v647_v44 = vadd.f32 %v644_v10, %v632_v32  ;;  %v653_v63 = vrot.slane %v632_v32, 4  ;;  %v1044_v53 = vmul.f32 %v5783_v60, %v5677_v13 }
 0x140   : > { %5050 = vpow2.f32 %v892_v12  ;;  %v1074_v52 = vmul.f32 %v550_v26, %v5747_v41  ;;  %v910_v62 = vmul.f32 1.442695, %v907_v31  ;;  %v1097_v20 = vrot.slane %v1076_v55, 4  ;;  %v7952_v55 = vld [vmem:[#allocation36_spill] sm:$0xff] }
 0x141   : > { %5052 = vpow2.f32 %v901_v59  ;;  %v1106_v35 = vmax.f32 %v5830_v16, %v5837_v8  ;;  %v679_v61 = vmul.f32 1.442695, %v676_v29  ;;  %v5851_v5 = vmax.f32 %v1105_v39, %v1102_v7 }
 0x142   : > { %v633_v17 = vmul.f32 %v553_v48, %v5629_v47  ;;  %v1026_v3 = vadd.f32 %v5808_v54, %v1011_v43  ;;  %v861_v23 = vrot.slane %v852_v30, 4  ;;  %v7949_v40 = vmax.f32 %v5757_v37, %v5775_v2 }
 0x143   : > { %v5861_v41 = vadd.f32 %v1097_v20, %v1091_v46  ;;  %v645_v26 = vadd.f32 %v639_v36, %v630_v18  ;;  %5054 = vpow2.f32 %v670_v24  ;;  %v685_v11 = vsub.f32 %v5812_v14, %v5824_v42 }
 0x144   : > { %v5859_v13 = vmax.f32 %v7949_v40, %v5844_v38  ;;  %v659_v25 = vadd.f32 %v653_v63, %v647_v44  ;;  %v1032_v47 = vrot.slane %v1011_v43, 4  ;;  %v1083_v56 = vrot.slane %v1074_v52, 4 }
 0x145   : > { %5056 = vpow2.f32 %v910_v62  ;;  %v5868_v54 = vmax.f32 %v1106_v35, %v5861_v41  ;;  %v1129_v9 = vsub.f32 %v1102_v7, %v5851_v5  ;;  %v648_v49 = vadd.f32 %v645_v26, %v633_v17 }
 0x146   : > { %v5865_v28 = vpop.eup %5050  ;;  %5058 = vpow2.f32 %v679_v61  ;;  %v654_v21 = vrot.slane %v633_v17, 4  ;;  %v1059_v6 = vadd.f32 %v5814_v4, %v1044_v53  ;;  %v867_v15 = vadd.f32 %v861_v23, %v852_v30  ;;  %v7953_v61 = vld [vmem:[#allocation37_spill] sm:$0xff] }
 0x147   : > { %v5870_v58 = vpop.eup %5052  ;;  %v890_v14 = vsub.f32 %v5757_v37, %v5859_v13  ;;  %v855_v42 = vmul.f32 %v553_v48, %v5665_v1  ;;  %v1065_v18 = vrot.slane %v1044_v53, 4  ;;  %v688_v51 = vmul.f32 1.442695, %v685_v11 }
 0x148   : > { %v916_v33 = vadd.f32 %v5870_v58, %v5865_v28  ;;  %v7950_v12 = vmax.f32 %v5731_v45, %v5771_v27  ;;  %v663_v57 = vmax.f32 %v7952_v55, %v7951_v0  ;;  %v1089_v59 = vadd.f32 %v1083_v56, %v1074_v52 }
 0x149   : > { %v1112_v4 = vsub.f32 %v5830_v16, %v5868_v54  ;;  %v1077_v37 = vmul.f32 %v553_v48, %v5783_v60  ;;  %v5887_v32 = vpop.eup %5054  ;;  %v5889_v1 = vadd.f32 %v1032_v47, %v1026_v3  ;;  %v1132_v39 = vmul.f32 1.442695, %v1129_v9 }
 0x14a   : > { %v665_v34 = vmax.f32 %v7950_v12, %v659_v25  ;;  %v1121_v43 = vsub.f32 %v5837_v8, %v5868_v54  ;;  %v5893_v31 = vadd.f32 %v654_v21, %v648_v49  ;;  %v894_v30 = vmul.f32 1.442695, %v890_v14 }
 0x14b   : > { %v5895_v10 = vpop.eup %5056  ;;  %v899_v29 = vsub.f32 %v5775_v2, %v5859_v13  ;;  %v870_v7 = vadd.f32 %v867_v15, %v855_v42  ;;  %v876_v16 = vrot.slane %v855_v42, 4  ;;  %v5901_v60 = vadd.f32 %v1065_v18, %v1059_v6 }
 0x14c   : > { %v5899_v36 = vpop.eup %5058  ;;  %5060 = vpow2.f32 %v688_v51  ;;  %v919_v46 = vadd.f32 %v5895_v10, %v916_v33  ;;  %v668_v48 = vsub.f32 %v5731_v45, %v665_v34  ;;  %v677_v8 = vsub.f32 %v5771_v27, %v665_v34 }
 0x14d   : > { %v1116_v24 = vmul.f32 1.442695, %v1112_v4  ;;  %v1092_v44 = vadd.f32 %v1089_v59, %v1077_v37  ;;  %v1098_v63 = vrot.slane %v1077_v37, 4  ;;  %5062 = vpow2.f32 %v1132_v39 }
 0x14e   : > { %v686_v53 = vsub.f32 %v659_v25, %v665_v34  ;;  %v1125_v52 = vmul.f32 1.442695, %v1121_v43  ;;  %v666_v2 = vmax.f32 %v663_v57, %v5893_v31  ;;  %v694_v62 = vadd.f32 %v5899_v36, %v5887_v32 }
 0x14f   : > { %5064 = vpow2.f32 %v894_v30  ;;  %v903_v20 = vmul.f32 1.442695, %v899_v29  ;;  %v5909_v35 = vadd.f32 %v876_v16, %v870_v7  ;;  %v885_v45 = vmax.f32 %v7953_v61, %v5797_v19 }
 0x150   : > { %5066 = vrcp.f32 %v919_v46  ;;  %v672_v27 = vmul.f32 1.442695, %v668_v48  ;;  %v1130_v17 = vsub.f32 %v5861_v41, %v5868_v54  ;;  %v681_v3 = vmul.f32 1.442695, %v677_v8  ;;  %v5964_v46 = vpop.f32.mrf.mxu0 }
 0x151   : > { %v908_v23 = vsub.f32 %v5844_v38, %v5859_v13  ;;  %5068 = vpow2.f32 %v1116_v24  ;;  %v5917_v40 = vadd.f32 %v1098_v63, %v1092_v44  ;;  %v1107_v11 = vmax.f32 %v5889_v1, %v5901_v60 }
 0x152   : > { %v5919_v26 = vpop.eup %5060  ;;  %v690_v25 = vmul.f32 1.442695, %v686_v53  ;;  %5070 = vpow2.f32 %v1125_v52  ;;  %v669_v47 = vsub.f32 %v7952_v55, %v666_v2  ;;  %v1111_v41 = vsub.f32 %v5818_v22, %v5851_v5 }
 0x153   : > { %v697_v56 = vadd.f32 %v5919_v26, %v694_v62  ;;  %5072 = vpow2.f32 %v903_v20  ;;  %v888_v38 = vmax.f32 %v885_v45, %v5909_v35  ;;  %v5928_v13 = vpop.eup %5062  ;;  %v1120_v54 = vsub.f32 %v5820_v50, %v5851_v5 }
 0x154   : > { %5074 = vpow2.f32 %v672_v27  ;;  %v1134_v9 = vmul.f32 1.442695, %v1130_v17  ;;  %v678_v49 = vsub.f32 %v7951_v0, %v666_v2  ;;  %v912_v6 = vmul.f32 1.442695, %v908_v23 }
 0x155   : > { %v5933_v21 = vpop.eup %5064  ;;  %5076 = vpow2.f32 %v681_v3  ;;  %v687_v15 = vsub.f32 %v5893_v31, %v666_v2  ;;  %v1110_v22 = vmax.f32 %v1107_v11, %v5917_v40  ;;  %v674_v42 = vmul.f32 1.442695, %v669_v47 }
 0x156   : > { %v5067_v14 = vpop.eup %5066  ;;  %5078 = vpow2.f32 %v690_v25  ;;  %v1114_v51 = vmul.f32 1.442695, %v1111_v41  ;;  %v891_v50 = vsub.f32 %v7953_v61, %v888_v38  ;;  %v683_v33 = vmul.f32 1.442695, %v678_v49 }
 0x157   : > { %v5937_v18 = vpop.eup %5068  ;;  %5080 = vrcp.f32 %v697_v56  ;;  %v900_v12 = vsub.f32 %v5797_v19, %v888_v38  ;;  %v1123_v0 = vmul.f32 1.442695, %v1120_v54  ;;  %v692_v55 = vmul.f32 1.442695, %v687_v15  ;;  %v7954_v56 = vld [vmem:[#allocation27_spill] sm:$0xff] }
 0x158   : > { %v5940_v5 = vpop.eup %5070  ;;  %5082 = vpow2.f32 %v1134_v9  ;;  %v1113_v57 = vsub.f32 %v5889_v1, %v1110_v22  ;;  %v1122_v4 = vsub.f32 %v5901_v60, %v1110_v22  ;;  %v925_v37 = vmul.f32 %v5067_v14, %v5865_v28 }
 0x159   : > { %v5943_v34 = vpop.eup %5072  ;;  %5084 = vpow2.f32 %v912_v6  ;;  %v952_v39 = vmul.f32 %v5067_v14, %v5870_v58  ;;  %v1139_v19 = vadd.f32 %v5940_v5, %v5937_v18  ;;  %v896_v31 = vmul.f32 1.442695, %v891_v50  ;;  %v7956_v6 = vld [vmem:[#allocation24_spill] sm:$0xff] }
 0x15a   : > { %v5946_v59 = vpop.eup %5074  ;;  %5086 = vpow2.f32 %v674_v42  ;;  %v917_v1 = vadd.f32 %v5943_v34, %v5933_v21  ;;  %v905_v29 = vmul.f32 1.442695, %v900_v12  ;;  %v909_v28 = vsub.f32 %v5909_v35, %v888_v38  ;;  %v7955_v38 = vld [vmem:[#allocation33_spill] sm:$0xff]  ;;  %v6002_v12 = vpop.f32.mrf.mxu0 }
 0x15b   : > { %v5951_v43 = vpop.eup %5076  ;;  %5088 = vpow2.f32 %v1114_v51  ;;  %v1118_v16 = vmul.f32 1.442695, %v1113_v57  ;;  %v1127_v60 = vmul.f32 1.442695, %v1122_v4  ;;  %v931_v48 = vrot.slane %v925_v37, 4 }
 0x15c   : > { %v5955_v30 = vpop.eup %5078  ;;  %5090 = vpow2.f32 %v683_v33  ;;  %v958_v8 = vrot.slane %v952_v39, 4  ;;  %v1131_v63 = vsub.f32 %v5917_v40, %v1110_v22  ;;  %v979_v2 = vmul.f32 %v5067_v14, %v5895_v10  ;;  %v7957_v22 = vld [vmem:[#allocation30_spill] sm:$0xff] }
 0x15d   : > { %v5959_v7 = vpop.eup %5080  ;;  %5092 = vpow2.f32 %v1123_v0  ;;  %v914_v35 = vmul.f32 1.442695, %v909_v28  ;;  %v937_v61 = vsel %vm342_vm0, %v925_v37, %v931_v48  ;;  %v695_v10 = vadd.f32 %v5951_v43, %v5946_v59 }
 0x15e   : > { %v5962_v58 = vpop.eup %5082  ;;  %5094 = vpow2.f32 %v692_v55  ;;  %v964_v45 = vsel %vm342_vm0, %v952_v39, %v958_v8  ;;  %v1136_v17 = vmul.f32 1.442695, %v1131_v63  ;;  %v703_v3 = vmul.f32 %v5959_v7, %v5887_v32 }
 0x15f   : > { %v5966_v24 = vpop.eup %5084  ;;  %v1142_v44 = vadd.f32 %v5962_v58, %v1139_v19  ;;  %5096 = vpow2.f32 %v896_v31  ;;  %v985_v11 = vrot.slane %v979_v2, 4  ;;  %v943_v41 = vmul.f32 %v937_v61, %v7954_v56 }
 0x160   : > { %v5970_v53 = vpop.eup %5086  ;;  %v920_v52 = vadd.f32 %v5966_v24, %v917_v1  ;;  %5098 = vpow2.f32 %v905_v29  ;;  %v970_v54 = vmul.f32 %v964_v45, %v7955_v38  ;;  %v730_v32 = vmul.f32 %v5959_v7, %v5899_v36 }
 0x161   : > { %v5089_v62 = vpop.eup %5088  ;;  %5100 = vpow2.f32 %v1118_v16  ;;  %v940_v15 = vmul.f32 %v937_v61, %v7956_v6  ;;  %v967_v14 = vmul.f32 %v964_v45, %v7957_v22  ;;  %v709_v51 = vrot.slane %v703_v3, 4 }
 0x162   : > { %v5974_v20 = vpop.eup %5090  ;;  %5102 = vpow2.f32 %v1127_v60  ;;  %v698_v33 = vadd.f32 %v5955_v30, %v695_v10  ;;  %v991_v36 = vsel %vm342_vm0, %v979_v2, %v985_v11  ;;  %v976_v57 = vadd.f32 %v970_v54, %v943_v41 }
 0x163   : > { %v5093_v27 = vpop.eup %5092  ;;  %5104 = vrcp.f32 %v1142_v44  ;;  %v696_v47 = vadd.f32 %v5974_v20, %v5970_v53  ;;  %v736_v4 = vrot.slane %v730_v32, 4  ;;  %v973_v19 = vadd.f32 %v967_v14, %v940_v15 }
 0x164   : > { %v5980_v23 = vpop.eup %5094  ;;  %5106 = vrcp.f32 %v920_v52  ;;  %v1138_v40 = vadd.f32 %v5093_v27, %v5089_v62  ;;  %v997_v1 = vmul.f32 %v991_v36, %v6002_v12  ;;  %v715_v29 = vsel %vm342_vm0, %v703_v3, %v709_v51 }
 0x165   : > { %v5984_v25 = vpop.eup %5096  ;;  %5108 = vpow2.f32 %v914_v35  ;;  %v699_v55 = vadd.f32 %v5980_v23, %v696_v47  ;;  %v994_v16 = vmul.f32 %v991_v36, %v5964_v46  ;;  %v757_v60 = vmul.f32 %v5959_v7, %v5919_v26  ;;  %v6033_v47 = vpop.f32.mrf.mxu1 }
 0x166   : > { %v5992_v9 = vpop.eup %5098  ;;  %v1141_v49 = vadd.f32 %v5928_v13, %v1138_v40  ;;  %5110 = vpow2.f32 %v1136_v17  ;;  %v6020_v44 = vadd.f32 %v997_v1, %v976_v57  ;;  %v742_v63 = vsel %vm342_vm0, %v730_v32, %v736_v4 }
 0x167   : > { %v5997_v42 = vpop.eup %5100  ;;  %v918_v39 = vadd.f32 %v5992_v9, %v5984_v25  ;;  %v6025_v61 = vadd.f32 %v994_v16, %v973_v19  ;;  %v721_v45 = vmul.f32 %v715_v29, %v7954_v56  ;;  %v718_v26 = vmul.f32 %v715_v29, %v7956_v6 }
 0x168   : > { %v5999_v50 = vpop.eup %5102  ;;  %5112 = vrcp.f32 %v1141_v49  ;;  %v748_v10 = vmul.f32 %v742_v63, %v7955_v38  ;;  %v763_v40 = vrot.slane %v757_v60, 4 }
 0x169   : > { %v5105_v0 = vpop.eup %5104  ;;  %v1140_v31 = vadd.f32 %v5999_v50, %v5997_v42  ;;  %5114 = vrcp.f32 %v698_v33 }
 0x16a   : > { %v5107_v37 = vpop.eup %5106  ;;  %v1148_v48 = vmul.f32 %v5105_v0, %v5937_v18  ;;  %5116 = vrcp.f32 %v699_v55  ;;  %v1175_v52 = vmul.f32 %v5105_v0, %v5940_v5  ;;  %v769_v4 = vsel %vm342_vm0, %v757_v60, %v763_v40  ;;  %v7961_v40 = vld [vmem:[#allocation31_spill] sm:$0xff] }
 0x16b   : > { %v6012_v28 = vpop.eup %5108  ;;  %v926_v5 = vmul.f32 %v5107_v37, %v5933_v21 }
 0x16c   : > { %v6018_v8 = vpop.eup %5110  ;;  %v921_v35 = vadd.f32 %v6012_v28, %v918_v39  ;;  %v1154_v11 = vrot.slane %v1148_v48, 4  ;;  %v1181_v49 = vrot.slane %v1175_v52, 4 }
 0x16d   : > { %v1143_v18 = vadd.f32 %v6018_v8, %v1140_v31  ;;  %v932_v29 = vrot.slane %v926_v5, 4 }
 0x16e   : > { %v5113_v2 = vpop.eup %5112  ;;  %5118 = vrcp.f32 %v921_v35  ;;  %v1187_v39 = vsel %vm342_vm0, %v1175_v52, %v1181_v49 }
 0x16f   : > { %v1147_v7 = vmul.f32 %v5113_v2, %v5089_v62  ;;  %v1174_v17 = vmul.f32 %v5113_v2, %v5093_v27  ;;  %v1201_v3 = vmul.f32 %v5113_v2, %v5928_v13  ;;  %v6035_v15 = vpop.eup %5114  ;;  %v745_v62 = vmul.f32 %v742_v63, %v7957_v22 }
 0x170   : > { %v1202_v27 = vmul.f32 %v5105_v0, %v5962_v58  ;;  %v953_v13 = vmul.f32 %v5107_v37, %v5943_v34  ;;  %v6040_v14 = vpop.eup %5116  ;;  %5120 = vrcp.f32 %v1143_v18  ;;  %v754_v34 = vadd.f32 %v748_v10, %v721_v45  ;;  %v7958_v18 = vld [vmem:[#allocation28_spill] sm:$0xff] }
 0x171   : > { %v1153_v41 = vrot.slane %v1147_v7, 4  ;;  %v1180_v54 = vrot.slane %v1174_v17, 4  ;;  %v1207_v32 = vrot.slane %v1201_v3, 4  ;;  %v1160_v0 = vsel %vm342_vm0, %v1148_v48, %v1154_v11 }
 0x172   : > { %v1208_v1 = vrot.slane %v1202_v27, 4  ;;  %v775_v48 = vmul.f32 %v769_v4, %v6002_v12  ;;  %v731_v52 = vmul.f32 %v6035_v15, %v5951_v43  ;;  %v751_v35 = vadd.f32 %v745_v62, %v718_v26 }
 0x173   : > { %v1159_v21 = vsel %vm342_vm0, %v1147_v7, %v1153_v41  ;;  %v1186_v51 = vsel %vm342_vm0, %v1174_v17, %v1180_v54  ;;  %v1213_v33 = vsel %vm342_vm0, %v1201_v3, %v1207_v32  ;;  %v772_v45 = vmul.f32 %v769_v4, %v5964_v46  ;;  %v7959_v17 = vld [vmem:[#allocation34_spill] sm:$0xff]  ;;  %v7960_v3 = vld [vmem:[#allocation25_spill] sm:$0xff] }
 0x174   : > { %v1165_v36 = vmul.f32 %v1159_v21, %v7954_v56  ;;  %v1192_v55 = vmul.f32 %v1186_v51, %v7955_v38  ;;  %v1162_v57 = vmul.f32 %v1159_v21, %v7956_v6  ;;  %v1189_v58 = vmul.f32 %v1186_v51, %v7957_v22  ;;  %v5119_v60 = vpop.eup %5118 }
 0x175   : > { %v1219_v31 = vmul.f32 %v1213_v33, %v6002_v12  ;;  %v959_v56 = vrot.slane %v953_v13, 4  ;;  %v980_v38 = vmul.f32 %v5107_v37, %v5966_v24  ;;  %v704_v6 = vmul.f32 %v6035_v15, %v5946_v59  ;;  %v6066_v12 = vpop.f32.mrf.mxu1 }
 0x176   : > { %v1198_v19 = vadd.f32 %v1192_v55, %v1165_v36  ;;  %v1195_v16 = vadd.f32 %v1189_v58, %v1162_v57  ;;  %v1216_v22 = vmul.f32 %v1213_v33, %v5964_v46  ;;  %v5121_v2 = vpop.eup %5120  ;;  %v1166_v7 = vmul.f32 %v1160_v0, %v7958_v18  ;;  %v6084_v57 = vpop.f32.mrf.mxu2 }
 0x177   : > { %v1193_v24 = vmul.f32 %v1187_v39, %v7959_v17  ;;  %v1214_v59 = vsel %vm342_vm0, %v1202_v27, %v1208_v1  ;;  %v1163_v10 = vmul.f32 %v1160_v0, %v7960_v3  ;;  %v1190_v11 = vmul.f32 %v1187_v39, %v7961_v40 }
 0x178   : > { %v1225_v63 = vadd.f32 %v1219_v31, %v1198_v19  ;;  %v1222_v37 = vadd.f32 %v1216_v22, %v1195_v16  ;;  %v938_v43 = vsel %vm342_vm0, %v926_v5, %v932_v29  ;;  %v965_v26 = vsel %vm342_vm0, %v953_v13, %v959_v56 }
 0x179   : > { %v986_v41 = vrot.slane %v980_v38, 4  ;;  %v710_v46 = vrot.slane %v704_v6, 4  ;;  %v781_v54 = vadd.f32 %v775_v48, %v754_v34  ;;  %v737_v32 = vrot.slane %v731_v52, 4 }
 0x17a   : > { %1290 = vmatpush.msra.mxu3 %v1225_v63  ;;  %v1149_v49 = vmul.f32 %v5121_v2, %v5997_v42  ;;  %v1176_v62 = vmul.f32 %v5121_v2, %v5999_v50  ;;  %v6073_v27 = vmul.f32 %v5119_v60, %v6012_v28  ;;  %v778_v21 = vadd.f32 %v772_v45, %v751_v35 }
 0x17b   : > { %v1199_v51 = vadd.f32 %v1193_v24, %v1166_v7  ;;  %v1220_v5 = vmul.f32 %v1214_v59, %v6066_v12  ;;  %v1196_v13 = vadd.f32 %v1190_v11, %v1163_v10  ;;  %v944_v33 = vmul.f32 %v938_v43, %v7958_v18  ;;  %v7963_v24 = vld [vmem:[#allocation35_spill] sm:$0xff] }
 0x17c   : > { %1291 = vmatpush.msra.mxu3 %v1222_v37  ;;  %v971_v36 = vmul.f32 %v965_v26, %v7959_v17  ;;  %v992_v55 = vsel %vm342_vm0, %v980_v38, %v986_v41  ;;  %v716_v42 = vsel %vm342_vm0, %v704_v6, %v710_v46  ;;  %v758_v50 = vmul.f32 %v6035_v15, %v5955_v30 }
 0x17d   : > { %v927_v28 = vmul.f32 %v5119_v60, %v5984_v25  ;;  %v1155_v4 = vrot.slane %v1149_v49, 4  ;;  %v1182_v58 = vrot.slane %v1176_v62, 4  ;;  %v954_v34 = vmul.f32 %v5119_v60, %v5992_v9  ;;  %v6093_v25 = vld [vmem:[#allocation5 + $0x90] sm:$0xff] }
 0x17e   : > { %1292 = vmatpush.msra.mxu3 %v6020_v44  ;;  %v743_v44 = vsel %vm342_vm0, %v731_v52, %v737_v32  ;;  %v1203_v0 = vmul.f32 %v5121_v2, %v6018_v8  ;;  %v1217_v39 = vmul.f32 %v1214_v59, %v6033_v47  ;;  %v941_v19 = vmul.f32 %v938_v43, %v7960_v3  ;;  %v559_v32 = vpop.f32.mrf.mxu2 }
 0x17f   : > { %v968_v30 = vmul.f32 %v965_v26, %v7961_v40  ;;  %v1226_v15 = vadd.f32 %v1220_v5, %v1199_v51  ;;  %v977_v31 = vadd.f32 %v971_v36, %v944_v33  ;;  %v722_v1 = vmul.f32 %v716_v42, %v7958_v18 }
 0x180   : > { %1293 = vmatpush.msra.mxu3 %v6025_v61  ;;  %v998_v61 = vmul.f32 %v992_v55, %v6066_v12  ;;  %v749_v29 = vmul.f32 %v743_v44, %v7959_v17  ;;  %v764_v9 = vrot.slane %v758_v50, 4  ;;  %v933_v16 = vrot.slane %v927_v28, 4 }
 0x181   : > { %v705_v8 = vmul.f32 %v6040_v14, %v5970_v53  ;;  %v1161_v56 = vsel %vm342_vm0, %v1149_v49, %v1155_v4  ;;  %v1188_v38 = vsel %vm342_vm0, %v1176_v62, %v1182_v58  ;;  %v960_v6 = vrot.slane %v954_v34, 4  ;;  %v6120_v62 = vld [vmem:[#allocation5 + $0x98] sm:$0xff] }
 0x182   : > { %1294 = vmatpush.msra.mxu3 %v781_v54  ;;  %v732_v60 = vmul.f32 %v6040_v14, %v5974_v20  ;;  %v987_v63 = vrot.slane %v6073_v27, 4  ;;  %v1209_v22 = vrot.slane %v1203_v0, 4  ;;  %v1223_v48 = vadd.f32 %v1217_v39, %v1196_v13  ;;  %v7962_v20 = vld [vmem:[#allocation29_spill] sm:$0xff] }
 0x183   : > { %v974_v52 = vadd.f32 %v968_v30, %v941_v19  ;;  %v1004_v2 = vadd.f32 %v998_v61, %v977_v31  ;;  %v995_v53 = vmul.f32 %v992_v55, %v6033_v47  ;;  %v719_v35 = vmul.f32 %v716_v42, %v7960_v3  ;;  %v7964_v3 = vld [vmem:[#allocation26_spill] sm:$0xff] }
 0x184   : > { %1295 = vmatpush.msra.mxu3 %v778_v21  ;;  %v746_v45 = vmul.f32 %v743_v44, %v7961_v40  ;;  %v755_v18 = vadd.f32 %v749_v29, %v722_v1  ;;  %v770_v7 = vsel %vm342_vm0, %v758_v50, %v764_v9  ;;  %v1167_v17 = vmul.f32 %v1161_v56, %v7962_v20  ;;  %v7965_v40 = vld [vmem:[#allocation32_spill] sm:$0xff] }
 0x185   : > { %4597 = vmatmul.msk.f32.vlgmr.msra.gmra.mxu3 %vm1264_vm3, %v6093_v25  ;;  %v1194_v37 = vmul.f32 %v1188_v38, %v7963_v24  ;;  %v939_v59 = vsel %vm342_vm0, %v927_v28, %v933_v16  ;;  %v966_v10 = vsel %vm342_vm0, %v954_v34, %v960_v6  ;;  %v711_v11 = vrot.slane %v705_v8, 4  ;;  %v1261_v16 = vld [vmem:[#allocation5 + $0xa0] sm:$0xff] }
 0x186   : > { %1322 = vmatpush.msrb.mxu3 %v1226_v15  ;;  %v738_v43 = vrot.slane %v732_v60, 4  ;;  %v759_v26 = vmul.f32 %v6040_v14, %v5980_v23  ;;  %v1164_v41 = vmul.f32 %v1161_v56, %v7964_v3  ;;  %v1191_v46 = vmul.f32 %v1188_v38, %v7965_v40 }
 0x187   : > { %v1215_v54 = vsel %vm342_vm0, %v1203_v0, %v1209_v22  ;;  %v1001_v49 = vadd.f32 %v995_v53, %v974_v52  ;;  %v776_v21 = vmul.f32 %v770_v7, %v6066_v12  ;;  %v752_v51 = vadd.f32 %v746_v45, %v719_v35  ;;  %v1747_v52 = vld [vmem:[#allocation7 + $0x20] sm:$0xf]  ;;  %v1263_v53 = vld [vmem:[#allocation5 + $0xb0] sm:$0xf]  ;;  %v1745_v35 = vld [vmem:[#allocation7 + $0x10] sm:$0xff] }
 0x188   : > { %1323 = vmatpush.msrb.mxu3 %v1223_v48  ;;  %v993_v5 = vsel %vm342_vm0, %v6073_v27, %v987_v63  ;;  %v1200_v13 = vadd.f32 %v1194_v37, %v1167_v17  ;;  %v945_v23 = vmul.f32 %v939_v59, %v7962_v20  ;;  %v972_v14 = vmul.f32 %v966_v10, %v7963_v24  ;;  %v1262_v48 = vld [vmem:[#allocation5 + $0xa8] sm:$0xff]  ;;  %v6164_v17 = vld [vmem:[%s5495_s4 + $0x18] sm:$0xff]  ;;  %v6168_v37 = vld [vmem:[%s5495_s4] sm:$0xff] }
 0x189   : > { %v782_v33 = vadd.f32 %v776_v21, %v755_v18  ;;  %v773_v36 = vmul.f32 %v770_v7, %v6033_v47  ;;  %v717_v55 = vsel %vm342_vm0, %v705_v8, %v711_v11  ;;  %v744_v42 = vsel %vm342_vm0, %v732_v60, %v738_v43  ;;  %v1746_v18 = vld [vmem:[#allocation7 + $0x18] sm:$0xff]  ;;  %v1744_v7 = vld [vmem:[#allocation7 + $0x8] sm:$0xff] }
 0x18a   : > { %1324 = vmatpush.msrb.mxu3 %v1004_v2  ;;  %v1221_v50 = vmul.f32 %v1215_v54, %v559_v32  ;;  %v1197_v12 = vadd.f32 %v1191_v46, %v1164_v41  ;;  %v942_v27 = vmul.f32 %v939_v59, %v7964_v3  ;;  %v969_v28 = vmul.f32 %v966_v10, %v7965_v40  ;;  %v7966_v43 = vld [vmem:[#allocation18_spill] sm:$0xff] }
 0x18b   : > { %v765_v44 = vrot.slane %v759_v26, 4  ;;  %v1218_v4 = vmul.f32 %v1215_v54, %v6084_v57  ;;  %v779_v58 = vadd.f32 %v773_v36, %v752_v51  ;;  %v978_v47 = vadd.f32 %v972_v14, %v945_v23 }
 0x18c   : > { %1325 = vmatpush.msrb.mxu3 %v1001_v49  ;;  %v1227_v34 = vadd.f32 %v1221_v50, %v1200_v13  ;;  %v723_v0 = vmul.f32 %v717_v55, %v7962_v20  ;;  %v750_v39 = vmul.f32 %v744_v42, %v7963_v24  ;;  %v999_v19 = vmul.f32 %v993_v5, %v559_v32 }
 0x18d   : > { %4598 = vmatmul.msk.f32.gmra.mxu3 %vm1264_vm3, %v6120_v62  ;;  %v1224_v30 = vadd.f32 %v1218_v4, %v1197_v12  ;;  %v975_v15 = vadd.f32 %v969_v28, %v942_v27  ;;  %v720_v31 = vmul.f32 %v717_v55, %v7964_v3  ;;  %v747_v61 = vmul.f32 %v744_v42, %v7965_v40  ;;  %v7967_v3 = vld [vmem:[#allocation15_spill] sm:$0xff] }
 0x18e   : > { %1326 = vmatpush.msrb.mxu3 %v782_v33  ;;  %v771_v1 = vsel %vm342_vm0, %v759_v26, %v765_v44  ;;  %v996_v29 = vmul.f32 %v993_v5, %v6084_v57  ;;  %v1005_v9 = vadd.f32 %v999_v19, %v978_v47  ;;  %v756_v8 = vadd.f32 %v750_v39, %v723_v0  ;;  %v7968_v33 = vld [vmem:[#allocation21_spill] sm:$0xff] }
 0x18f   : > { %v777_v56 = vmul.f32 %v771_v1, %v559_v32  ;;  %v753_v6 = vadd.f32 %v747_v61, %v720_v31  ;;  %v774_v60 = vmul.f32 %v771_v1, %v6084_v57  ;;  %v5364_v2 = vmov 1   ;;  %v6147_v57 = vld [vmem:[#allocation7] sm:$0xff] }
 0x190   : > { %1327 = vmatpush.msrb.mxu3 %v779_v58  ;;  %v1002_v38 = vadd.f32 %v996_v29, %v975_v15  ;;  %5026 = vset.pattern.permute.xlu1 %v5364_v2  ;;  %v5365_v45 = vmov 0   ;;  %v5366_v20 = vmov 12.0   ;;  %v1235_v24 = vrot.slane %v6164_v17, 7 }
 0x191   : > { %v783_v63 = vadd.f32 %v777_v56, %v756_v8  ;;  %v780_v22 = vadd.f32 %v774_v60, %v753_v6  ;;  %5028 = vset.pattern.permute.xlu2 %v5364_v2  ;;  %1805 = vperm.xlu1 %5026, %v1747_v52   ;;  %5122 = vrcp.f32 %v5366_v20  ;;  %v1232_v59 = vrot.slane %v6168_v37, 7 }
 0x192   : > { %1354 = vmatpush.msra.mxu3 %v1227_v34  ;;  %5025 = vset.pattern.permute.xlu0 %v5365_v45 }
 0x193   : > { %1770 = vperm.xlu0 %5025, %v1747_v52   ;;  %1801 = vperm.xlu2 %5028, %v1746_v18   ;;  %v1236_v10 = vsel %vm1231_vm4, %v1232_v59, %v1235_v24  ;;  %v1250_v41 = vsel %vm342_vm0, %v7967_v3, %v1232_v59  ;;  %v6201_v24 = vld [vmem:[%s5495_s4 + $0x20] sm:$0xff]  ;;  %v6209_v3 = vld [vmem:[%s5495_s4 + $0x8] sm:$0xff] }
 0x194   : > { %1355 = vmatpush.msra.mxu3 %v1224_v30  ;;  %v1253_v26 = vsel %vm342_vm0, %v1236_v10, %v7966_v43 }
 0x195   : > { %4599 = vmatmul.msk.f32.gmra.mxu3 %vm1264_vm3, %v1261_v16 }
 0x196   : > { %1356 = vmatpush.msra.mxu3 %v1005_v9  ;;  %v7969_v9 = vld [vmem:[#allocation12_spill] sm:$0xff] }
 0x197   : > { %v5123_v11 = vpop.eup %5122 }
 0x198   : > { %1357 = vmatpush.msra.mxu3 %v1002_v38  ;;  %v1401_v40 = vmul.f32 12.0, %v5123_v11  ;;  %vm1405_vm5 = vweird.f32 %v5123_v11 }
 0x199   : > { %5027 = vset.pattern.permute.xlu1 %v5365_v45 }
 0x19a   : > { %1358 = vmatpush.msra.mxu3 %v783_v63  ;;  %1760 = vperm.xlu1 %5027, %v1745_v35  }
 0x19b   : > { %1765 = vperm.xlu0 %5025, %v1746_v18   ;;  %5029 = vset.pattern.permute.xlu2 %v5365_v45 }
 0x19c   : > { %1359 = vmatpush.msra.mxu3 %v780_v22  ;;  %1755 = vperm.xlu2 %5029, %v1744_v7  }
 0x19d   : > { %4600 = vmatmul.msk.f32.gmra.mxu3 %vm1264_vm3, %v1262_v48 }
 0x1a2   : > { %1750 = vperm.xlu1 %5027, %v6147_v57  }
 0x1a3   : > { %5030 = vset.pattern.permute.xlu0 %v5364_v2 }
 0x1a4   : > { %1797 = vperm.xlu0 %5030, %v1745_v35   ;;  %5031 = vset.pattern.permute.xlu2 %v5364_v2 }
 0x1a5   : > { %4601 = vmatmul.msk.f32.gmra.mxu3 %vm1264_vm3, %v1263_v53  ;;  %1793 = vperm.xlu2 %5031, %v1744_v7  }
 0x1aa   : > { %5032 = vset.pattern.permute.xlu1 %v5364_v2 }
 0x1ab   : > { %1789 = vperm.xlu1 %5032, %v6147_v57  }
 0x1ad   : > { %4602 = vmatmul.msk.f32.vlgmr.msrb.gmra.mxu3 %vm1264_vm3, %v6093_v25 }
 0x1b5   : > { %4603 = vmatmul.msk.f32.gmra.mxu3 %vm1264_vm3, %v6120_v62 }
 0x1bd   : > { %4604 = vmatmul.msk.f32.gmra.mxu3 %vm1264_vm3, %v1261_v16 }
 0x1c5   : > { %4605 = vmatmul.msk.f32.gmra.mxu3 %vm1264_vm3, %v1262_v48 }
 0x1cd   : > { %4606 = vmatmul.msk.f32.gmra.mxu3 %vm1264_vm3, %v1263_v53 }
 0x1d5   : > { %4607 = vmatmul.msk.f32.vlgmr.msra.gmra.mxu3 %vm1264_vm3, %v6093_v25 }
 0x1dd   : > { %4608 = vmatmul.msk.f32.gmra.mxu3 %vm1264_vm3, %v6120_v62  ;;  %v1402_v62 = vsub.f32 1.0, %v1401_v40 }
 0x1df   : > { %v1403_v5 = vmul.f32 %v5123_v11, %v1402_v62 }
 0x1e1   : > { %v1404_v55 = vadd.f32 %v5123_v11, %v1403_v5 }
 0x1e3   : > { %v6180_v4 = vsel %vm1405_vm5, %v5123_v11, %v1404_v55  ;;  %v7971_v55 = vld [vmem:[#allocation16_spill] sm:$0xff] }
 0x1e5   : > { %4609 = vmatmul.msk.f32.gmra.mxu3 %vm1264_vm3, %v1261_v16  ;;  %v1256_v16 = vsel %vm342_vm0, %v7969_v9, %v1232_v59 }
 0x1ed   : > { %4610 = vmatmul.msk.f32.gmra.mxu3 %vm1264_vm3, %v1262_v48 }
 0x1f5   : > { %4611 = vmatmul.msk.f32.gmra.mxu3 %vm1264_vm3, %v1263_v53 }
 0x208   : > { %v1297_v25 = vpop.f32.mrf.mxu3 }
 0x209   : > { %v1298_v32 = vadd.f32 %v1297_v25, %v1250_v41  ;;  %v1237_v25 = vrot.slane %v6201_v24, 7  ;;  %v6212_v41 = vrot.slane %v6209_v3, 7 }
 0x210   : > { %v1300_v46 = vpop.f32.mrf.mxu3 }
 0x211   : > { %v1301_v54 = vadd.f32 %v1300_v46, %v1253_v26 }
 0x213   : > { %v1376_v49 = vsel %vm342_vm0, %v1301_v54, 0.0  ;;  %v1494_v42 = vrot.slane %v1301_v54, 4 }
 0x214   : > { %v1377_v21 = vadd.f32 %v1376_v49, %v1298_v32  ;;  %v6216_v49 = vsel %vm1231_vm4, %v6212_v41, %v1237_v25 }
 0x216   : > { %v1378_v51 = vrot.slane %v1377_v21, 4 }
 0x218   : > { %v1379_v13 = vadd.f32 %v1378_v51, %v1377_v21  ;;  %v1303_v23 = vpop.f32.mrf.mxu3 }
 0x219   : > { %v1304_v36 = vadd.f32 %v1303_v23, %v7968_v33  ;;  %v7970_v23 = vld [vmem:[#allocation19_spill] sm:$0xff] }
 0x21a   : > { %v1380_v14 = vrot.slane %v1379_v13, 2 }
 0x21b   : > { %v1495_v50 = vrot.slane %v1304_v36, 4 }
 0x21c   : > { %v1381_v12 = vadd.f32 %v1380_v14, %v1379_v13  ;;  %v1254_v14 = vsel %vm342_vm0, %v6216_v49, %v7970_v23 }
 0x21d   : > { %v1496_v27 = vsel %vm342_vm0, %v1494_v42, %v1495_v50  ;;  %v1509_v28 = vsel %vm342_vm0, %v1495_v50, 0.0  ;;  %v1251_v42 = vsel %vm342_vm0, %v7971_v55, %v6212_v41 }
 0x21e   : > { %v1382_v44 = vrot.slane %v1381_v12, 1  ;;  %v1510_v58 = vadd.f32 %v1509_v28, %v1496_v27 }
 0x220   : > { %v1383_v34 = vadd.f32 %v1382_v44, %v1381_v12  ;;  %v1511_v47 = vrot.slane %v1510_v58, 4  ;;  %v1306_v0 = vpop.f32.mrf.mxu3 }
 0x221   : > { %v1307_v22 = vadd.f32 %v1306_v0, %v1256_v16 }
 0x222   : > { %v1407_v39 = vmul.f32 %v6180_v4, %v1383_v34  ;;  %v1512_v19 = vadd.f32 %v1511_v47, %v1510_v58 }
 0x224   : > { %v6183_v30 = vsub.f32 %v1298_v32, %v1407_v39  ;;  %v6185_v15 = vsub.f32 %v1301_v54, %v1407_v39  ;;  %v1513_v31 = vrot.slane %v1512_v19, 2 }
 0x226   : > { %v1416_v61 = vmul.f32 %v6183_v30, %v6183_v30  ;;  %v1419_v1 = vmul.f32 %v6185_v15, %v6185_v15  ;;  %v1514_v29 = vadd.f32 %v1513_v31, %v1512_v19 }
 0x228   : > { %v1422_v8 = vsel %vm342_vm0, %v1419_v1, 0.0  ;;  %v1515_v56 = vrot.slane %v1514_v29, 1  ;;  %v1309_v38 = vpop.f32.mrf.mxu3 }
 0x229   : > { %v1423_v6 = vadd.f32 %v1422_v8, %v1416_v61  ;;  %v1310_v60 = vadd.f32 %v1309_v38, %v1236_v10 }
 0x22a   : > { %v1516_v63 = vadd.f32 %v1515_v56, %v1514_v29 }
 0x22b   : > { %v1424_v48 = vrot.slane %v1423_v6, 4  ;;  %v1635_v52 = vsel %vm342_vm0, %v1310_v60, 0.0 }
 0x22c   : > { %v1533_v2 = vmul.f32 %v1516_v63, %v6180_v4  ;;  %v1636_v53 = vadd.f32 %v1635_v52, %v1307_v22 }
 0x22d   : > { %v1425_v35 = vadd.f32 %v1424_v48, %v1423_v6 }
 0x22e   : > { %v6196_v45 = vsub.f32 %v1301_v54, %v1533_v2  ;;  %v6198_v18 = vsub.f32 %v1304_v36, %v1533_v2  ;;  %v1637_v7 = vrot.slane %v1636_v53, 4 }
 0x22f   : > { %v1426_v20 = vrot.slane %v1425_v35, 2 }
 0x230   : > { %v1542_v59 = vmul.f32 %v6196_v45, %v6196_v45  ;;  %v1545_v10 = vmul.f32 %v6198_v18, %v6198_v18  ;;  %v1638_v11 = vadd.f32 %v1637_v7, %v1636_v53  ;;  %v1329_v43 = vpop.f32.mrf.mxu3 }
 0x231   : > { %v1427_v26 = vadd.f32 %v1426_v20, %v1425_v35  ;;  %v1330_v58 = vadd.f32 %v1329_v43, %v1251_v42 }
 0x232   : > { %v1554_v40 = vrot.slane %v1542_v59, 4  ;;  %v1555_v46 = vrot.slane %v1545_v10, 4  ;;  %v1639_v54 = vrot.slane %v1638_v11, 2 }
 0x233   : > { %v1428_v32 = vrot.slane %v1427_v26, 1 }
 0x234   : > { %v1556_v62 = vsel %vm342_vm0, %v1554_v40, %v1555_v46  ;;  %v1569_v21 = vsel %vm342_vm0, %v1555_v46, 0.0  ;;  %v1640_v51 = vadd.f32 %v1639_v54, %v1638_v11 }
 0x235   : > { %v1570_v5 = vadd.f32 %v1569_v21, %v1556_v62  ;;  %v1429_v33 = vadd.f32 %v1428_v32, %v1427_v26 }
 0x236   : > { %v1641_v13 = vrot.slane %v1640_v51, 1 }
 0x237   : > { %v1571_v36 = vrot.slane %v1570_v5, 4  ;;  %v1446_v34 = vmul.f32 %v1429_v33, %v6180_v4 }
 0x238   : > { %v1642_v50 = vadd.f32 %v1641_v13, %v1640_v51  ;;  %v1332_v12 = vpop.f32.mrf.mxu3 }
 0x239   : > { %v1572_v27 = vadd.f32 %v1571_v36, %v1570_v5  ;;  %v6226_v28 = vadd.f32 %v1332_v12, %v1254_v14  ;;  %v6240_v16 = vadd.f32 1e-06, %v1446_v34 }
 0x23a   : > { %v1659_v44 = vmul.f32 %v1642_v50, %v6180_v4 }
 0x23b   : > { %v1573_v47 = vrot.slane %v1572_v27, 2  ;;  %v1384_v0 = vsel %vm342_vm0, %v6226_v28, 0.0  ;;  %5124 = vrsqrt.f32 %v6240_v16  ;;  %v1497_v53 = vrot.slane %v6226_v28, 4 }
 0x23c   : > { %v6232_v39 = vsub.f32 %v1307_v22, %v1659_v44  ;;  %v6234_v19 = vsub.f32 %v1310_v60, %v1659_v44  ;;  %v1385_v31 = vadd.f32 %v1384_v0, %v1330_v58  ;;  %v7972_v60 = vld [vmem:[#allocation22_spill] sm:$0xff]  ;;  %v6274_v0 = vpop.permute.xlu1 %1805  ;;  %vm1458_vm10 = vweird.f32 %v6240_v16 }
 0x23d   : > { %v1574_v61 = vadd.f32 %v1573_v47, %v1572_v27 }
 0x23e   : > { %v1668_v1 = vmul.f32 %v6232_v39, %v6232_v39  ;;  %v1671_v29 = vmul.f32 %v6234_v19, %v6234_v19  ;;  %v1386_v9 = vrot.slane %v1385_v31, 4 }
 0x23f   : > { %v1575_v8 = vrot.slane %v1574_v61, 1 }
 0x240   : > { %v1674_v56 = vsel %vm342_vm0, %v1671_v29, 0.0  ;;  %v1387_v38 = vadd.f32 %v1386_v9, %v1385_v31  ;;  %v1335_v6 = vpop.f32.mrf.mxu3 }
 0x241   : > { %v1576_v63 = vadd.f32 %v1575_v8, %v1574_v61  ;;  %v1675_v22 = vadd.f32 %v1674_v56, %v1668_v1  ;;  %v1336_v48 = vadd.f32 %v1335_v6, %v7972_v60  ;;  %v6252_v46 = vpop.eup %5124 }
 0x242   : > { %v1388_v52 = vrot.slane %v1387_v38, 2  ;;  %v1453_v36 = vmul.f32 %v6252_v46, %v6240_v16  ;;  %vm1459_vm6 = vweird.f32 %v6252_v46 }
 0x243   : > { %v1676_v2 = vrot.slane %v1675_v22, 4  ;;  %v1593_v35 = vmul.f32 %v1576_v63, %v6180_v4  ;;  %v1498_v7 = vrot.slane %v1336_v48, 4  ;;  %vm1460_vm11 = vmor %vm1458_vm10, %vm1459_vm6 }
 0x244   : > { %v1389_v20 = vadd.f32 %v1388_v52, %v1387_v38  ;;  %v1454_v1 = vmul.f32 %v6252_v46, %v1453_v36 }
 0x245   : > { %v1677_v25 = vadd.f32 %v1676_v2, %v1675_v22  ;;  %v6247_v59 = vadd.f32 1e-06, %v1593_v35  ;;  %v1499_v10 = vsel %vm342_vm0, %v1497_v53, %v1498_v7  ;;  %v1517_v11 = vsel %vm342_vm0, %v1498_v7, 0.0 }
 0x246   : > { %v1518_v43 = vadd.f32 %v1517_v11, %v1499_v10  ;;  %v1390_v26 = vrot.slane %v1389_v20, 1  ;;  %v1455_v2 = vmul.f32 0.5, %v1454_v1  ;;  %v6299_v11 = vld [vmem:[%s5495_s4 + $0x28] sm:$0xff] }
 0x247   : > { %v1678_v40 = vrot.slane %v1677_v25, 2  ;;  %5126 = vrsqrt.f32 %v6247_v59  ;;  %vm1605_vm8 = vweird.f32 %v6247_v59 }
 0x248   : > { %v1519_v54 = vrot.slane %v1518_v43, 4  ;;  %v1391_v32 = vadd.f32 %v1390_v26, %v1389_v20  ;;  %v1338_v62 = vpop.f32.mrf.mxu3  ;;  %v6296_v20 = vpop.permute.xlu0 %1770 }
 0x249   : > { %v1679_v21 = vadd.f32 %v1678_v40, %v1677_v25 }
 0x24a   : > { %v1520_v51 = vadd.f32 %v1519_v54, %v1518_v43  ;;  %v1408_v5 = vmul.f32 %v6180_v4, %v1391_v32  ;;  %v1239_v43 = vrot.slane %v6299_v11, 7  ;;  %v1456_v54 = vsub.f32 1.5, %v1455_v2 }
 0x24b   : > { %v1680_v13 = vrot.slane %v1679_v21, 1 }
 0x24c   : > { %v1521_v23 = vrot.slane %v1520_v51, 2  ;;  %v6255_v14 = vsub.f32 %v1330_v58, %v1408_v5  ;;  %v6258_v33 = vsub.f32 %v6226_v28, %v1408_v5  ;;  %v7973_v58 = vld [vmem:[#allocation13_spill] sm:$0xff] }
 0x24d   : > { %v6262_v55 = vpop.eup %5126  ;;  %v1681_v42 = vadd.f32 %v1680_v13, %v1679_v21  ;;  %v1257_v34 = vsel %vm342_vm0, %v7973_v58, %v6212_v41  ;;  %v6315_v13 = vpop.permute.xlu1 %1760 }
 0x24e   : > { %v1600_v50 = vmul.f32 %v6262_v55, %v6247_v59  ;;  %v1522_v12 = vadd.f32 %v1521_v23, %v1520_v51  ;;  %v1417_v27 = vmul.f32 %v6255_v14, %v6255_v14  ;;  %v1420_v44 = vmul.f32 %v6258_v33, %v6258_v33  ;;  %v6310_v51 = vld [vmem:[%s5495_s4 + $0x10] sm:$0xff]  ;;  %v7975_v59 = vld [vmem:[#allocation17_spill] sm:$0xff] }
 0x24f   : > { %v1698_v47 = vmul.f32 %v1681_v42, %v6180_v4  ;;  %v6284_v6 = vadd.f32 %v1338_v62, %v1257_v34  ;;  %v6313_v5 = vrot.slane %v6310_v51, 7  ;;  %vm1606_vm7 = vweird.f32 %v6262_v55 }
 0x250   : > { %v1601_v31 = vmul.f32 %v6262_v55, %v1600_v50  ;;  %v1523_v61 = vrot.slane %v1522_v12, 1  ;;  %v1341_v29 = vpop.f32.mrf.mxu3  ;;  %v1430_v9 = vsel %vm342_vm0, %v1420_v44, 0.0  ;;  %vm1607_vm9 = vmor %vm1605_vm8, %vm1606_vm7  ;;  %v6339_v16 = vpop.permute.xlu0 %1765 }
 0x251   : > { %v6279_v8 = vadd.f32 1e-06, %v1698_v47  ;;  %v6282_v56 = vadd.f32 %v1341_v29, %v6216_v49  ;;  %v1431_v41 = vadd.f32 %v1430_v9, %v1417_v27  ;;  %v6322_v44 = vsel %vm1231_vm4, %v6313_v5, %v1239_v43 }
 0x252   : > { %v1524_v38 = vadd.f32 %v1523_v61, %v1522_v12  ;;  %v1602_v63 = vmul.f32 0.5, %v1601_v31  ;;  %v1457_v47 = vmul.f32 %v6252_v46, %v1456_v54 }
 0x253   : > { %5128 = vrsqrt.f32 %v6279_v8  ;;  %v1643_v22 = vsel %vm342_vm0, %v6282_v56, 0.0  ;;  %v1432_v52 = vrot.slane %v1431_v41, 4  ;;  %vm1710_vm13 = vweird.f32 %v6279_v8 }
 0x254   : > { %v1534_v60 = vmul.f32 %v1524_v38, %v6180_v4  ;;  %v1644_v53 = vadd.f32 %v1643_v22, %v6284_v6  ;;  %v1603_v25 = vsub.f32 1.5, %v1602_v63  ;;  %v7974_v38 = vld [vmem:[#allocation20_spill] sm:$0xff]  ;;  %v1461_v2 = vsel %vm1460_vm11, %v6252_v46, %v1457_v47 }
 0x255   : > { %v1433_v7 = vadd.f32 %v1432_v52, %v1431_v41  ;;  %v1255_v41 = vsel %vm342_vm0, %v6322_v44, %v7974_v38  ;;  %v1252_v52 = vsel %vm342_vm0, %v7975_v59, %v6313_v5  ;;  %vm2132_vm11 = vcmask 1042432  }
 0x256   : > { %v6292_v49 = vsub.f32 %v6226_v28, %v1534_v60  ;;  %v6294_v35 = vsub.f32 %v1336_v48, %v1534_v60  ;;  %v1645_v10 = vrot.slane %v1644_v53, 4  ;;  %v6306_v48 = vpop.permute.xlu2 %1801  ;;  %v1604_v12 = vmul.f32 %v6262_v55, %v1603_v25  ;;  %4627 = vmatpush.msk.msrb.mxu1 %vm2132_vm11, %v6164_v17  ;;  %4644 = vmatpush.msk.msrb.mxu2 %vm2132_vm11, %v6201_v24 }
 0x257   : > { %v1434_v28 = vrot.slane %v1433_v7, 2 }
 0x258   : > { %v1543_v26 = vmul.f32 %v6292_v49, %v6292_v49  ;;  %v1546_v40 = vmul.f32 %v6294_v35, %v6294_v35  ;;  %v1361_v32 = vpop.f32.mrf.mxu3  ;;  %v1646_v21 = vadd.f32 %v1645_v10, %v1644_v53  ;;  %v1608_v63 = vsel %vm1607_vm9, %v6262_v55, %v1604_v12  ;;  %2154 = vmatpush.msrb.mxu1 %v6168_v37 }
 0x259   : > { %v5129_v62 = vpop.eup %5128  ;;  %v1435_v42 = vadd.f32 %v1434_v28, %v1433_v7  ;;  %v1629_v43 = vmul.f32 %v1608_v63, %v6196_v45  ;;  %v6347_v54 = vadd.f32 %v1361_v32, %v1252_v52  ;;  %2219 = vmatpush.msrb.mxu2 %v6209_v3 }
 0x25a   : > { %v1557_v23 = vrot.slane %v1543_v26, 4  ;;  %v1558_v36 = vrot.slane %v1546_v40, 4  ;;  %v1705_v50 = vmul.f32 %v5129_v62, %v6279_v8  ;;  %v1647_v27 = vrot.slane %v1646_v21, 2 }
 0x25b   : > { %v1436_v29 = vrot.slane %v1435_v42, 1  ;;  %vm1711_vm12 = vweird.f32 %v5129_v62  ;;  %v1632_v8 = vmul.f32 %v1608_v63, %v6198_v18  ;;  %v7976_v63 = vld [vmem:[#allocation23_spill] sm:$0xff] }
 0x25c   : > { %v1559_v58 = vsel %vm342_vm0, %v1557_v23, %v1558_v36  ;;  %v1577_v34 = vsel %vm342_vm0, %v1558_v36, 0.0  ;;  %v1706_v31 = vmul.f32 %v5129_v62, %v1705_v50  ;;  %v1648_v1 = vadd.f32 %v1647_v27, %v1646_v21  ;;  %vm1712_vm14 = vmor %vm1710_vm13, %vm1711_vm12  ;;  %v6353_v36 = vpop.permute.xlu1 %1750 }
 0x25d   : > { %v1578_v61 = vadd.f32 %v1577_v34, %v1559_v58  ;;  %v1437_v26 = vadd.f32 %v1436_v29, %v1435_v42  ;;  %v1485_v50 = vmul.f32 %v1461_v2, %v6185_v15  ;;  %vm2083_vm13 = vcmask 89088  }
 0x25e   : > { %v1707_v9 = vmul.f32 0.5, %v1706_v31  ;;  %v1649_v60 = vrot.slane %v1648_v1, 1  ;;  %v6345_v28 = vpop.permute.xlu2 %1755 }
 0x25f   : > { %v1579_v22 = vrot.slane %v1578_v61, 4  ;;  %v1447_v34 = vmul.f32 %v1437_v26, %v6180_v4  ;;  %v1740_v47 = vsel %vm342_vm0, %v1485_v50, %v1629_v43 }
 0x260   : > { %v1708_v53 = vsub.f32 1.5, %v1707_v9  ;;  %v1364_v7 = vpop.f32.mrf.mxu3  ;;  %v1650_v55 = vadd.f32 %v1649_v60, %v1648_v1  ;;  %v1776_v52 = vmul.f32 %v6345_v28, %v1740_v47 }
 0x261   : > { %v1580_v25 = vadd.f32 %v1579_v22, %v1578_v61  ;;  %v6342_v10 = vadd.f32 %v1364_v7, %v1255_v41  ;;  %v6380_v60 = vadd.f32 1e-06, %v1447_v34 }
 0x262   : > { %v1709_v40 = vmul.f32 %v5129_v62, %v1708_v53  ;;  %v1660_v21 = vmul.f32 %v1650_v55, %v6180_v4  ;;  %v6383_v53 = vpop.permute.xlu0 %1797 }
 0x263   : > { %v1581_v46 = vrot.slane %v1580_v25, 2  ;;  %v1392_v23 = vsel %vm342_vm0, %v6342_v10, 0.0  ;;  %v1500_v7 = vrot.slane %v6342_v10, 4  ;;  %5130 = vrsqrt.f32 %v6380_v60 }
 0x264   : > { %v1713_v45 = vsel %vm1712_vm14, %v5129_v62, %v1709_v40  ;;  %v1393_v42 = vadd.f32 %v1392_v23, %v6347_v54  ;;  %v6359_v27 = vsub.f32 %v6284_v6, %v1660_v21  ;;  %v6362_v58 = vsub.f32 %v6282_v56, %v1660_v21 }
 0x265   : > { %v1582_v12 = vadd.f32 %v1581_v46, %v1580_v25  ;;  %v1737_v32 = vmul.f32 %v1713_v45, %v6234_v19  ;;  %v1734_v18 = vmul.f32 %v1713_v45, %v6232_v39  ;;  %v1779_v6 = vmul.f32 %v6315_v13, %v1632_v8  ;;  %v6399_v45 = vpop.permute.xlu1 %1789 }
 0x266   : > { %v1394_v31 = vrot.slane %v1393_v42, 4  ;;  %v1669_v61 = vmul.f32 %v6359_v27, %v6359_v27  ;;  %v1672_v19 = vmul.f32 %v6362_v58, %v6362_v58  ;;  %v1482_v56 = vmul.f32 %v1461_v2, %v6183_v30  ;;  %v6391_v40 = vpop.permute.xlu2 %1793 }
 0x267   : > { %v1583_v15 = vrot.slane %v1582_v12, 1  ;;  %v1785_v62 = vmul.f32 %v6296_v20, %v1737_v32  ;;  %v1782_v1 = vmul.f32 %v6339_v16, %v1734_v18  ;;  %v1814_v23 = vadd.f32 %v6383_v53, %v1779_v6 }
 0x268   : > { %v1395_v29 = vadd.f32 %v1394_v31, %v1393_v42  ;;  %v1367_v39 = vpop.f32.mrf.mxu3  ;;  %v1682_v41 = vsel %vm342_vm0, %v1672_v19, 0.0  ;;  %v1773_v43 = vmul.f32 %v6353_v36, %v1482_v56  ;;  %v1811_v34 = vadd.f32 %v6391_v40, %v1776_v52 }
 0x269   : > { %v1584_v9 = vadd.f32 %v1583_v15, %v1582_v12  ;;  %v1820_v38 = vadd.f32 %v6274_v0, %v1785_v62  ;;  %v6378_v22 = vadd.f32 %v1367_v39, %v7976_v63  ;;  %v1683_v59 = vadd.f32 %v1682_v41, %v1669_v61  ;;  %v6404_v61 = vld [vmem:[#allocation5 + $0xb8] sm:$0xff]  ;;  %v1826_v63 = vld [vmem:[#allocation7 + $0x8] sm:$0x1] }
 0x26a   : > { %v1396_v30 = vrot.slane %v1395_v29, 2  ;;  %v1817_v55 = vadd.f32 %v6306_v48, %v1782_v1  ;;  %v1808_v62 = vadd.f32 %v6399_v45, %v1773_v43  ;;  %v6407_v1 = vpop.eup %5130  ;;  %v5367_v41 = vmov 2  }
 0x26b   : > { %v1594_v2 = vmul.f32 %v1584_v9, %v6180_v4  ;;  %v1501_v25 = vrot.slane %v6378_v22, 4  ;;  %4612 = vmatpush.msk.msrb.mxu3 %vm342_vm0, %v1820_v38  ;;  %v1684_v26 = vrot.slane %v1683_v59, 4  ;;  %5034 = vset.pattern.permute.xlu0 %v5367_v41  ;;  %vm1469_vm5 = vweird.f32 %v6407_v1 }
 0x26c   : > { %v1397_v46 = vadd.f32 %v1396_v30, %v1395_v29  ;;  %1834 = vperm.xlu0 %5034, %v1826_v63   ;;  %5033 = vset.pattern.permute.xlu2 %v5367_v41  ;;  %v7977_v30 = vld [vmem:[#allocation14_spill] sm:$0xff]  ;;  %vm1468_vm7 = vweird.f32 %v6380_v60 }
 0x26d   : > { %v6393_v21 = vadd.f32 1e-06, %v1594_v2  ;;  %v1502_v8 = vsel %vm342_vm0, %v1500_v7, %v1501_v25  ;;  %v1525_v50 = vsel %vm342_vm0, %v1501_v25, 0.0  ;;  %1865 = vmatpush.msrb.mxu3 %v1817_v55  ;;  %v1685_v42 = vadd.f32 %v1684_v26, %v1683_v59  ;;  %1829 = vperm.xlu2 %5033, %v6147_v57   ;;  %vm1470_vm8 = vmor %vm1468_vm7, %vm1469_vm5 }
 0x26e   : > { %v1398_v12 = vrot.slane %v1397_v46, 1  ;;  %v1526_v32 = vadd.f32 %v1525_v50, %v1502_v8  ;;  %v1463_v26 = vmul.f32 %v6407_v1, %v6380_v60  ;;  %v6431_v50 = vld [vmem:[#allocation5 + $0xc0] sm:$0x1] }
 0x26f   : > { %5132 = vrsqrt.f32 %v6393_v21  ;;  %1866 = vmatpush.msrb.mxu3 %v1814_v23  ;;  %v1686_v18 = vrot.slane %v1685_v42, 2  ;;  %vm1615_vm2 = vweird.f32 %v6393_v21 }
 0x270   : > { %v1399_v47 = vadd.f32 %v1398_v12, %v1397_v46  ;;  %v1527_v31 = vrot.slane %v1526_v32, 4  ;;  %v1370_v15 = vpop.f32.mrf.mxu3 }
 0x271   : > { %1867 = vmatpush.msrb.mxu3 %v1811_v34  ;;  %v1687_v19 = vadd.f32 %v1686_v18, %v1685_v42 }
 0x272   : > { %v1409_v6 = vmul.f32 %v6180_v4, %v1399_v47  ;;  %v1528_v56 = vadd.f32 %v1527_v31, %v1526_v32  ;;  %v1464_v47 = vmul.f32 %v6407_v1, %v1463_v26 }
 0x273   : > { %1868 = vmatpush.msrb.mxu3 %v1808_v62  ;;  %v1688_v29 = vrot.slane %v1687_v19, 1 }
 0x274   : > { %v6410_v39 = vsub.f32 %v6347_v54, %v1409_v6  ;;  %v6413_v9 = vsub.f32 %v6342_v10, %v1409_v6  ;;  %v1529_v38 = vrot.slane %v1528_v56, 2  ;;  %4613 = vmatmul.msk.f32.vlgmr.msrb.gmra.mxu3 %vm1837_vm15, %v6404_v61  ;;  %v1258_v54 = vsel %vm342_vm0, %v7977_v30, %v6313_v5 }
 0x275   : > { %v5133_v59 = vpop.eup %5132  ;;  %v1689_v2 = vadd.f32 %v1688_v29, %v1687_v19  ;;  %v1371_v12 = vadd.f32 %v1370_v15, %v1258_v54 }
 0x276   : > { %v1610_v52 = vmul.f32 %v5133_v59, %v6393_v21  ;;  %v1418_v7 = vmul.f32 %v6410_v39, %v6410_v39  ;;  %v1421_v25 = vmul.f32 %v6413_v9, %v6413_v9  ;;  %v1530_v55 = vadd.f32 %v1529_v38, %v1528_v56 }
 0x277   : > { %v1699_v23 = vmul.f32 %v1689_v2, %v6180_v4  ;;  %v1465_v38 = vmul.f32 0.5, %v1464_v47  ;;  %vm1616_vm1 = vweird.f32 %v5133_v59 }
 0x278   : > { %v1611_v43 = vmul.f32 %v5133_v59, %v1610_v52  ;;  %v1373_v46 = vpop.f32.mrf.mxu3  ;;  %v1438_v8 = vsel %vm342_vm0, %v1421_v25, 0.0  ;;  %v1531_v5 = vrot.slane %v1530_v55, 1  ;;  %vm1617_vm3 = vmor %vm1615_vm2, %vm1616_vm1 }
 0x279   : > { %v1374_v57 = vadd.f32 %v1373_v46, %v6322_v44  ;;  %v1439_v42 = vadd.f32 %v1438_v8, %v1418_v7  ;;  %v1702_v32 = vadd.f32 1e-06, %v1699_v23 }
 0x27a   : > { %v1532_v34 = vadd.f32 %v1531_v5, %v1530_v55  ;;  %v1612_v19 = vmul.f32 0.5, %v1611_v43 }
 0x27b   : > { %v1651_v18 = vsel %vm342_vm0, %v1374_v57, 0.0  ;;  %v1440_v31 = vrot.slane %v1439_v42, 4  ;;  %5134 = vrsqrt.f32 %v1702_v32  ;;  %vm1720_vm9 = vweird.f32 %v1702_v32 }
 0x27c   : > { %v1652_v62 = vadd.f32 %v1651_v18, %v1371_v12  ;;  %4614 = vmatmul.msk.f32.gmra.mxu3 %vm1837_vm15, %v6431_v50  ;;  %v1535_v6 = vmul.f32 %v1532_v34, %v6180_v4  ;;  %v1613_v52 = vsub.f32 1.5, %v1612_v19 }
 0x27d   : > { %v1441_v44 = vadd.f32 %v1440_v31, %v1439_v42 }
 0x27e   : > { %v1653_v56 = vrot.slane %v1652_v62, 4  ;;  %v6439_v29 = vsub.f32 %v6342_v10, %v1535_v6  ;;  %v6442_v15 = vsub.f32 %v6378_v22, %v1535_v6  ;;  %v1466_v10 = vsub.f32 1.5, %v1465_v38 }
 0x27f   : > { %v1442_v41 = vrot.slane %v1441_v44, 2  ;;  %v1614_v22 = vmul.f32 %v5133_v59, %v1613_v52 }
 0x280   : > { %v1654_v63 = vadd.f32 %v1653_v56, %v1652_v62  ;;  %v1544_v30 = vmul.f32 %v6439_v29, %v6439_v29  ;;  %v1547_v54 = vmul.f32 %v6442_v15, %v6442_v15  ;;  %v1467_v19 = vmul.f32 %v6407_v1, %v1466_v10 }
 0x281   : > { %v1443_v2 = vadd.f32 %v1442_v41, %v1441_v44  ;;  %v5135_v25 = vpop.eup %5134  ;;  %v1618_v62 = vsel %vm1617_vm3, %v5133_v59, %v1614_v22 }
 0x282   : > { %v1655_v7 = vrot.slane %v1654_v63, 2  ;;  %v1560_v55 = vrot.slane %v1544_v30, 4  ;;  %v1561_v43 = vrot.slane %v1547_v54, 4  ;;  %v1715_v26 = vmul.f32 %v5135_v25, %v1702_v32 }
 0x283   : > { %v1444_v42 = vrot.slane %v1443_v2, 1  ;;  %vm1721_vm6 = vweird.f32 %v5135_v25  ;;  %v1630_v52 = vmul.f32 %v1618_v62, %v6292_v49  ;;  %v1471_v59 = vsel %vm1470_vm8, %v6407_v1, %v1467_v19 }
 0x284   : > { %v1562_v46 = vsel %vm342_vm0, %v1560_v55, %v1561_v43  ;;  %v1585_v23 = vsel %vm342_vm0, %v1561_v43, 0.0  ;;  %v1656_v8 = vadd.f32 %v1655_v7, %v1654_v63  ;;  %v1716_v5 = vmul.f32 %v5135_v25, %v1715_v26  ;;  %vm1722_vm10 = vmor %vm1720_vm9, %vm1721_vm6 }
 0x285   : > { %v1586_v34 = vadd.f32 %v1585_v23, %v1562_v46  ;;  %v1445_v38 = vadd.f32 %v1444_v42, %v1443_v2  ;;  %v1633_v7 = vmul.f32 %v1618_v62, %v6294_v35 }
 0x286   : > { %v1657_v18 = vrot.slane %v1656_v8, 1  ;;  %v1717_v47 = vmul.f32 0.5, %v1716_v5 }
 0x287   : > { %v1587_v31 = vrot.slane %v1586_v34, 4  ;;  %v1448_v60 = vmul.f32 %v1445_v38, %v6180_v4  ;;  %v1780_v23 = vmul.f32 %v6315_v13, %v1633_v7 }
 0x288   : > { %v1658_v6 = vadd.f32 %v1657_v18, %v1656_v8  ;;  %v1718_v44 = vsub.f32 1.5, %v1717_v47 }
 0x289   : > { %v1588_v56 = vadd.f32 %v1587_v31, %v1586_v34  ;;  %v6477_v8 = vadd.f32 1e-06, %v1448_v60 }
 0x28a   : > { %v1661_v41 = vmul.f32 %v1658_v6, %v6180_v4  ;;  %v1719_v21 = vmul.f32 %v5135_v25, %v1718_v44 }
 0x28b   : > { %v1589_v63 = vrot.slane %v1588_v56, 2  ;;  %5136 = vrsqrt.f32 %v6477_v8  ;;  %vm1478_vm5 = vweird.f32 %v6477_v8 }
 0x28c   : > { %v6457_v30 = vsub.f32 %v1371_v12, %v1661_v41  ;;  %v6459_v54 = vsub.f32 %v1374_v57, %v1661_v41  ;;  %v1723_v2 = vsel %vm1722_vm10, %v5135_v25, %v1719_v21  ;;  %v1486_v12 = vmul.f32 %v1471_v59, %v6258_v33 }
 0x28d   : > { %v1590_v55 = vadd.f32 %v1589_v63, %v1588_v56  ;;  %v1738_v43 = vmul.f32 %v1723_v2, %v6362_v58  ;;  %v1735_v32 = vmul.f32 %v1723_v2, %v6359_v27  ;;  %v1483_v27 = vmul.f32 %v1471_v59, %v6255_v14 }
 0x28e   : > { %v1670_v49 = vmul.f32 %v6457_v30, %v6457_v30  ;;  %v1673_v1 = vmul.f32 %v6459_v54, %v6459_v54  ;;  %v1741_v26 = vsel %vm342_vm0, %v1486_v12, %v1630_v52  ;;  %v1815_v14 = vadd.f32 %v6383_v53, %v1780_v23 }
 0x28f   : > { %v1591_v57 = vrot.slane %v1590_v55, 1  ;;  %v1786_v10 = vmul.f32 %v6296_v20, %v1738_v43  ;;  %v1783_v35 = vmul.f32 %v6339_v16, %v1735_v32  ;;  %v1777_v42 = vmul.f32 %v6345_v28, %v1741_v26 }
 0x290   : > { %v1690_v25 = vsel %vm342_vm0, %v1673_v1, 0.0  ;;  %v1774_v31 = vmul.f32 %v6353_v36, %v1483_v27 }
 0x291   : > { %v1592_v58 = vadd.f32 %v1591_v57, %v1590_v55  ;;  %v1691_v22 = vadd.f32 %v1690_v25, %v1670_v49  ;;  %v1821_v46 = vadd.f32 %v6274_v0, %v1786_v10  ;;  %v1818_v34 = vadd.f32 %v6306_v48, %v1783_v35  ;;  %v5137_v38 = vpop.eup %5136 }
 0x292   : > { %v1812_v19 = vadd.f32 %v6391_v40, %v1777_v42  ;;  %v1809_v44 = vadd.f32 %v6399_v45, %v1774_v31  ;;  %v1473_v59 = vmul.f32 %v5137_v38, %v6477_v8  ;;  %vm1479_vm1 = vweird.f32 %v5137_v38 }
 0x293   : > { %v1692_v33 = vrot.slane %v1691_v22, 4  ;;  %v1595_v5 = vmul.f32 %v1592_v58, %v6180_v4  ;;  %4615 = vmatpush.msk.msra.mxu3 %vm342_vm0, %v1821_v46  ;;  %vm1480_vm7 = vmor %vm1478_vm5, %vm1479_vm1  ;;  %v2068_v46 = vld [vmem:[#allocation5 + $0xd0] sm:$0xff]  ;;  %vm2051_vm5 = vcmask 1041408  }
 0x294   : > { %v1474_v55 = vmul.f32 %v5137_v38, %v1473_v59 }
 0x295   : > { %v1693_v18 = vadd.f32 %v1692_v33, %v1691_v22  ;;  %v1598_v47 = vadd.f32 1e-06, %v1595_v5  ;;  %1888 = vmatpush.msra.mxu3 %v1818_v34  ;;  %v2069_v5 = vld [vmem:[#allocation5 + $0xd8] sm:$0xff] }
 0x296   : > { %v1475_v43 = vmul.f32 0.5, %v1474_v55  ;;  %v2073_v34 = vld [vmem:[#allocation5 + $0xf8] sm:$0xff] }
 0x297   : > { %v1694_v62 = vrot.slane %v1693_v18, 2  ;;  %5138 = vrsqrt.f32 %v1598_v47  ;;  %1889 = vmatpush.msra.mxu3 %v1815_v14  ;;  %vm1625_vm14 = vweird.f32 %v1598_v47  ;;  %v2074_v14 = vld [vmem:[#allocation5 + $0x100] sm:$0xff] }
 0x298   : > { %v1476_v12 = vsub.f32 1.5, %v1475_v43 }
 0x299   : > { %v1695_v6 = vadd.f32 %v1694_v62, %v1693_v18  ;;  %1890 = vmatpush.msra.mxu3 %v1812_v19  ;;  %v6556_v62 = vld [vmem:[#allocation7 + $0x10] sm:$0xff] }
 0x29a   : > { %v1477_v25 = vmul.f32 %v5137_v38, %v1476_v12 }
 0x29b   : > { %v1696_v56 = vrot.slane %v1695_v6, 1  ;;  %1891 = vmatpush.msra.mxu3 %v1809_v44 }
 0x29c   : > { %4616 = vmatmul.msk.f32.vlgmr.msra.gmra.mxu3 %vm1837_vm15, %v6404_v61  ;;  %v1481_v37 = vsel %vm1480_vm7, %v5137_v38, %v1477_v25 }
 0x29d   : > { %v5139_v41 = vpop.eup %5138  ;;  %v1697_v21 = vadd.f32 %v1696_v56, %v1695_v6  ;;  %4661 = vmatpush.msk.msrb.mxu3 %vm2132_vm11, %v6299_v11  ;;  %v1487_v23 = vmul.f32 %v1481_v37, %v6413_v9  ;;  %v6562_v56 = vld [vmem:[#allocation7] sm:$0xff] }
 0x29e   : > { %v1620_v63 = vmul.f32 %v5139_v41, %v1598_v47  ;;  %vm1626_vm12 = vweird.f32 %v5139_v41 }
 0x29f   : > { %v1700_v52 = vmul.f32 %v1697_v21, %v6180_v4  ;;  %v2067_v4 = vld [vmem:[#allocation5 + $0xc8] sm:$0xff]  ;;  %vm1627_vm3 = vmor %vm1625_vm14, %vm1626_vm12  ;;  %2284 = vmatpush.msrb.mxu3 %v6310_v51 }
 0x2a0   : > { %v1621_v2 = vmul.f32 %v5139_v41, %v1620_v63  ;;  %4628 = vmatmul.msk.f32.vlgmr.msrb.gmra.mxu1 %vm2083_vm13, %v2067_v4  ;;  %4645 = vmatmul.msk.f32.vlgmr.msrb.gmra.mxu2 %vm2083_vm13, %v2067_v4  ;;  %v2075_v63 = vld [vmem:[#allocation5 + $0x108] sm:$0xff] }
 0x2a1   : > { %v1703_v7 = vadd.f32 1e-06, %v1700_v52 }
 0x2a2   : > { %v1622_v60 = vmul.f32 0.5, %v1621_v2 }
 0x2a3   : > { %5140 = vrsqrt.f32 %v1703_v7  ;;  %vm1730_vm6 = vweird.f32 %v1703_v7 }
 0x2a4   : > { %4617 = vmatmul.msk.f32.gmra.mxu3 %vm1837_vm15, %v6431_v50  ;;  %v1623_v49 = vsub.f32 1.5, %v1622_v60  ;;  %v5369_v60 = vmov 4  }
 0x2a6   : > { %v1624_v10 = vmul.f32 %v5139_v41, %v1623_v49  ;;  %v2076_v49 = vld [vmem:[#allocation5 + $0x110] sm:$0xff] }
 0x2a8   : > { %v1628_v17 = vsel %vm1627_vm3, %v5139_v41, %v1624_v10  ;;  %4629 = vmatmul.msk.f32.gmra.mxu1 %vm2083_vm13, %v2068_v46  ;;  %4646 = vmatmul.msk.f32.gmra.mxu2 %vm2083_vm13, %v2068_v46 }
 0x2a9   : > { %v5141_v32 = vpop.eup %5140  ;;  %v1631_v11 = vmul.f32 %v1628_v17, %v6439_v29  ;;  %v1634_v27 = vmul.f32 %v1628_v17, %v6442_v15  ;;  %v2550_v17 = vld [vmem:[#allocation7 + $0x18] sm:$0xff] }
 0x2aa   : > { %v1725_v1 = vmul.f32 %v5141_v32, %v1703_v7  ;;  %vm1731_vm2 = vweird.f32 %v5141_v32 }
 0x2ab   : > { %vm1732_vm8 = vmor %vm1730_vm6, %vm1731_vm2  ;;  %v1742_v33 = vsel %vm342_vm0, %v1487_v23, %v1631_v11  ;;  %v2077_v11 = vld [vmem:[#allocation5 + $0x118] sm:$0xff]  ;;  %vm2342_vm6 = vcmask 23552  }
 0x2ac   : > { %v1726_v57 = vmul.f32 %v5141_v32, %v1725_v1  ;;  %4662 = vmatmul.msk.f32.vlgmr.msrb.gmra.mxu3 %vm2083_vm13, %v2067_v4 }
 0x2ae   : > { %v1727_v35 = vmul.f32 0.5, %v1726_v57 }
 0x2b0   : > { %v1728_v26 = vsub.f32 1.5, %v1727_v35  ;;  %4630 = vmatmul.msk.f32.gmra.mxu1 %vm2083_vm13, %v2069_v5  ;;  %4647 = vmatmul.msk.f32.gmra.mxu2 %vm2083_vm13, %v2069_v5 }
 0x2b2   : > { %v1729_v24 = vmul.f32 %v5141_v32, %v1728_v26 }
 0x2b4   : > { %v1733_v3 = vsel %vm1732_vm8, %v5141_v32, %v1729_v24  ;;  %4663 = vmatmul.msk.f32.gmra.mxu3 %vm2083_vm13, %v2068_v46 }
 0x2b5   : > { %v1739_v58 = vmul.f32 %v1733_v3, %v6459_v54  ;;  %v1736_v22 = vmul.f32 %v1733_v3, %v6457_v30  ;;  %v1781_v54 = vmul.f32 %v6315_v13, %v1634_v27  ;;  %v1484_v30 = vmul.f32 %v1481_v37, %v6410_v39 }
 0x2b7   : > { %v1787_v51 = vmul.f32 %v6296_v20, %v1739_v58  ;;  %v1784_v8 = vmul.f32 %v6339_v16, %v1736_v22  ;;  %v1778_v16 = vmul.f32 %v6345_v28, %v1742_v33  ;;  %v1816_v9 = vadd.f32 %v6383_v53, %v1781_v54  ;;  %v2071_v28 = vld [vmem:[#allocation5 + $0xe8] sm:$0xff]  ;;  %v6541_v53 = vld [vmem:[#allocation7 + $0x38] sm:$0xff] }
 0x2b8   : > { %v1775_v15 = vmul.f32 %v6353_v36, %v1484_v30  ;;  %v5368_v36 = vmov 3   ;;  %v2553_v54 = vld [vmem:[#allocation7 + $0x30] sm:$0xff] }
 0x2b9   : > { %v1822_v29 = vadd.f32 %v6274_v0, %v1787_v51  ;;  %v1819_v20 = vadd.f32 %v6306_v48, %v1784_v8  ;;  %v1813_v0 = vadd.f32 %v6391_v40, %v1778_v16  ;;  %v2070_v48 = vld [vmem:[#allocation5 + $0xe0] sm:$0xff]  ;;  %5035 = vset.pattern.permute.xlu1 %v5368_v36  ;;  %5037 = vset.pattern.permute.xlu0 %v5368_v36  ;;  %v2072_v40 = vld [vmem:[#allocation5 + $0xf0] sm:$0xff] }
 0x2ba   : > { %v1810_v13 = vadd.f32 %v6399_v45, %v1775_v15  ;;  %4631 = vmatmul.msk.f32.gmra.mxu1 %vm2083_vm13, %v2070_v48  ;;  %4648 = vmatmul.msk.f32.gmra.mxu2 %vm2083_vm13, %v2070_v48  ;;  %v2078_v16 = vld [vmem:[#allocation5 + $0x120] sm:$0xff] }
 0x2bb   : > { %4618 = vmatpush.msk.msrb.mxu0 %vm342_vm0, %v1822_v29  ;;  %2592 = vperm.xlu1 %5035, %v6541_v53   ;;  %v6579_v29 = vld [vmem:[#allocation5 + $0x148] sm:$0xff] }
 0x2bc   : > { %4664 = vmatmul.msk.f32.gmra.mxu3 %vm2083_vm13, %v2069_v5  ;;  %5036 = vset.pattern.permute.xlu2 %v5368_v36  ;;  %v6597_v5 = vld [vmem:[#allocation5 + $0x150] sm:$0xff] }
 0x2bd   : > { %1911 = vmatpush.msrb.mxu0 %v1819_v20  ;;  %2572 = vperm.xlu0 %5037, %v2550_v17  }
 0x2be   : > { %2587 = vperm.xlu2 %5036, %v2553_v54  }
 0x2bf   : > { %1912 = vmatpush.msrb.mxu0 %v1816_v9 }
 0x2c1   : > { %1913 = vmatpush.msrb.mxu0 %v1813_v0  ;;  %v2551_v0 = vld [vmem:[#allocation7 + $0x20] sm:$0xff] }
 0x2c2   : > { %4632 = vmatmul.msk.f32.gmra.mxu1 %vm2083_vm13, %v2071_v28  ;;  %4649 = vmatmul.msk.f32.gmra.mxu2 %vm2083_vm13, %v2071_v28 }
 0x2c3   : > { %1914 = vmatpush.msrb.mxu0 %v1810_v13 }
 0x2c4   : > { %4619 = vmatmul.msk.f32.vlgmr.msrb.gmra.mxu0 %vm1837_vm15, %v6404_v61  ;;  %4665 = vmatmul.msk.f32.gmra.mxu3 %vm2083_vm13, %v2070_v48  ;;  %v2548_v48 = vld [vmem:[#allocation7 + $0x8] sm:$0xff] }
 0x2c5   : > { %5039 = vset.pattern.permute.xlu0 %v5369_v60 }
 0x2c6   : > { %2668 = vperm.xlu0 %5039, %v2553_v54   ;;  %2577 = vperm.xlu2 %5036, %v2551_v0  }
 0x2c7   : > { %v6546_v45 = vpop.permute.xlu2 %1829 }
 0x2ca   : > { %4633 = vmatmul.msk.f32.gmra.mxu1 %vm2083_vm13, %v2072_v40  ;;  %4650 = vmatmul.msk.f32.gmra.mxu2 %vm2083_vm13, %v2072_v40 }
 0x2cc   : > { %4620 = vmatmul.msk.f32.gmra.mxu0 %vm1837_vm15, %v6431_v50  ;;  %4666 = vmatmul.msk.f32.gmra.mxu3 %vm2083_vm13, %v2071_v28  ;;  %v2552_v50 = vld [vmem:[#allocation7 + $0x28] sm:$0xff]  ;;  %v2079_v28 = vld [vmem:[#allocation5 + $0x128] sm:$0xff] }
 0x2cd   : > { %2582 = vperm.xlu1 %5035, %v2552_v50  }
 0x2ce   : > { %2648 = vperm.xlu0 %5039, %v2548_v48   ;;  %2562 = vperm.xlu2 %5036, %v2548_v48  }
 0x2d2   : > { %4634 = vmatmul.msk.f32.gmra.mxu1 %vm2083_vm13, %v2073_v34  ;;  %4651 = vmatmul.msk.f32.gmra.mxu2 %vm2083_vm13, %v2073_v34 }
 0x2d4   : > { %4667 = vmatmul.msk.f32.gmra.mxu3 %vm2083_vm13, %v2072_v40 }
 0x2d5   : > { %2567 = vperm.xlu1 %5035, %v6556_v62  }
 0x2d6   : > { %5038 = vset.pattern.permute.xlu2 %v5369_v60 }
 0x2d7   : > { %2672 = vperm.xlu2 %5038, %v6541_v53  }
 0x2da   : > { %4635 = vmatmul.msk.f32.gmra.mxu1 %vm2083_vm13, %v2074_v14  ;;  %4652 = vmatmul.msk.f32.gmra.mxu2 %vm2083_vm13, %v2074_v14 }
 0x2dc   : > { %4668 = vmatmul.msk.f32.gmra.mxu3 %vm2083_vm13, %v2073_v34 }
 0x2dd   : > { %2557 = vperm.xlu1 %5035, %v6562_v56  }
 0x2de   : > { %v6552_v18 = vpop.permute.xlu0 %1834 }
 0x2df   : > { %2660 = vperm.xlu2 %5038, %v2551_v0   ;;  %v6654_v0 = vld [vmem:[#allocation5 + $0x180] sm:$0xff] }
 0x2e2   : > { %4636 = vmatmul.msk.f32.gmra.mxu1 %vm2083_vm13, %v2075_v63  ;;  %4653 = vmatmul.msk.f32.gmra.mxu2 %vm2083_vm13, %v2075_v63 }
 0x2e4   : > { %4669 = vmatmul.msk.f32.gmra.mxu3 %vm2083_vm13, %v2074_v14 }
 0x2e5   : > { %5040 = vset.pattern.permute.xlu1 %v5369_v60 }
 0x2e6   : > { %2664 = vperm.xlu1 %5040, %v2552_v50   ;;  %v2080_v50 = vld [vmem:[#allocation5 + $0x130] sm:$0xff] }
 0x2e7   : > { %2652 = vperm.xlu2 %5038, %v6556_v62  }
 0x2ea   : > { %4637 = vmatmul.msk.f32.gmra.mxu1 %vm2083_vm13, %v2076_v49  ;;  %4654 = vmatmul.msk.f32.gmra.mxu2 %vm2083_vm13, %v2076_v49 }
 0x2ec   : > { %4670 = vmatmul.msk.f32.gmra.mxu3 %vm2083_vm13, %v2075_v63 }
 0x2ee   : > { %2656 = vperm.xlu1 %5040, %v2550_v17  }
 0x2f2   : > { %4638 = vmatmul.msk.f32.gmra.mxu1 %vm2083_vm13, %v2077_v11  ;;  %4655 = vmatmul.msk.f32.gmra.mxu2 %vm2083_vm13, %v2077_v11 }
 0x2f4   : > { %4671 = vmatmul.msk.f32.gmra.mxu3 %vm2083_vm13, %v2076_v49 }
 0x2f6   : > { %2644 = vperm.xlu1 %5040, %v6562_v56  }
 0x2f7   : > { %v1870_v61 = vpop.f32.mrf.mxu3 }
 0x2f8   : > { %v1871_v39 = vadd.f32 %v1870_v61, %v6546_v45 }
 0x2fa   : > { %v4621_v42 = vmul.f32 -1.442695, %v1871_v39  ;;  %4639 = vmatmul.msk.f32.gmra.mxu1 %vm2083_vm13, %v2078_v16  ;;  %4656 = vmatmul.msk.f32.gmra.mxu2 %vm2083_vm13, %v2078_v16  ;;  %v6605_v39 = vld [vmem:[#allocation5 + $0x158] sm:$0xff] }
 0x2fc   : > { %5142 = vpow2.f32 %v4621_v42  ;;  %4672 = vmatmul.msk.f32.gmra.mxu3 %vm2083_vm13, %v2077_v11 }
 0x2ff   : > { %v1873_v47 = vpop.f32.mrf.mxu3 }
 0x300   : > { %v1874_v31 = vadd.f32 %v1873_v47, %v6552_v18 }
 0x302   : > { %v5143_v19 = vpop.eup %5142  ;;  %v4624_v6 = vmul.f32 -1.442695, %v1874_v31  ;;  %4640 = vmatmul.msk.f32.gmra.mxu1 %vm2083_vm13, %v2079_v28  ;;  %4657 = vmatmul.msk.f32.gmra.mxu2 %vm2083_vm13, %v2079_v28 }
 0x303   : > { %v1940_v44 = vadd.f32 1.0, %v5143_v19  ;;  %v6612_v19 = vld [vmem:[#allocation5 + $0x160] sm:$0xff] }
 0x304   : > { %5144 = vpow2.f32 %v4624_v6  ;;  %4673 = vmatmul.msk.f32.gmra.mxu3 %vm2083_vm13, %v2078_v16 }
 0x305   : > { %5146 = vrcp.f32 %v1940_v44  ;;  %vm1951_vm15 = vweird.f32 %v1940_v44  ;;  %v1957_v2 = vand.u32 2147483648, %v1940_v44  ;;  %v1955_v32 = vand.u32 2147483647, %v1940_v44 }
 0x307   : > { %v1958_v57 = vor.u32 1.1754944e-38, %v1957_v2  ;;  %vm1956_vm14 = vcmp.eq.f32.partialorder %v1955_v32, 8.507059e+37  ;;  %v6621_v2 = vld [vmem:[#allocation5 + $0x168] sm:$0xff] }
 0x30a   : > { %v5145_v38 = vpop.eup %5144  ;;  %4641 = vmatmul.msk.f32.gmra.mxu1 %vm2083_vm13, %v2080_v50  ;;  %4658 = vmatmul.msk.f32.gmra.mxu2 %vm2083_vm13, %v2080_v50 }
 0x30b   : > { %v5147_v41 = vpop.eup %5146  ;;  %v1943_v21 = vadd.f32 1.0, %v5145_v38 }
 0x30c   : > { %v1947_v52 = vmul.f32 %v5147_v41, %v1940_v44  ;;  %vm1952_vm9 = vweird.f32 %v5147_v41  ;;  %4674 = vmatmul.msk.f32.gmra.mxu3 %vm2083_vm13, %v2079_v28  ;;  %v2081_v44 = vld [vmem:[#allocation5 + $0x138] sm:$0xff] }
 0x30d   : > { %5148 = vrcp.f32 %v1943_v21  ;;  %vm1953_vm10 = vmor %vm1951_vm15, %vm1952_vm9  ;;  %vm1996_vm12 = vweird.f32 %v1943_v21  ;;  %v2002_v4 = vand.u32 2147483648, %v1943_v21  ;;  %v2000_v25 = vand.u32 2147483647, %v1943_v21 }
 0x30e   : > { %v1948_v59 = vsub.f32 1.0, %v1947_v52 }
 0x30f   : > { %v2003_v37 = vor.u32 1.1754944e-38, %v2002_v4  ;;  %vm2001_vm3 = vcmp.eq.f32.partialorder %v2000_v25, 8.507059e+37 }
 0x310   : > { %v1949_v7 = vmul.f32 %v5147_v41, %v1948_v59 }
 0x312   : > { %v1950_v55 = vadd.f32 %v5147_v41, %v1949_v7  ;;  %4642 = vmatmul.msk.f32.gmra.mxu1 %vm2083_vm13, %v2081_v44  ;;  %4659 = vmatmul.msk.f32.gmra.mxu2 %vm2083_vm13, %v2081_v44 }
 0x313   : > { %v5149_v43 = vpop.eup %5148 }
 0x314   : > { %v1992_v1 = vmul.f32 %v5149_v43, %v1943_v21  ;;  %v1954_v12 = vsel %vm1953_vm10, %v5147_v41, %v1950_v55  ;;  %vm1997_vm1 = vweird.f32 %v5149_v43  ;;  %4675 = vmatmul.msk.f32.gmra.mxu3 %vm2083_vm13, %v2080_v50 }
 0x315   : > { %v1959_v26 = vsel %vm1956_vm14, %v1958_v57, %v1954_v12  ;;  %vm1998_vm2 = vmor %vm1996_vm12, %vm1997_vm1 }
 0x316   : > { %v1993_v10 = vsub.f32 1.0, %v1992_v1  ;;  %v2039_v3 = vrot.slane %v1959_v26, 3  ;;  %v2052_v27 = vrot.slane %v1959_v26, 6  ;;  %v2082_v1 = vld [vmem:[#allocation5 + $0x140] sm:$0xff] }
 0x318   : > { %v1994_v35 = vmul.f32 %v5149_v43, %v1993_v10  ;;  %v2045_v23 = vadd.f32 %v2039_v3, %v1959_v26 }
 0x31a   : > { %v1995_v24 = vadd.f32 %v5149_v43, %v1994_v35  ;;  %4643 = vmatmul.msk.f32.gmra.mxu1 %vm2083_vm13, %v2082_v1  ;;  %4660 = vmatmul.msk.f32.gmra.mxu2 %vm2083_vm13, %v2082_v1 }
 0x31c   : > { %v1999_v58 = vsel %vm1998_vm2, %v5149_v43, %v1995_v24  ;;  %4676 = vmatmul.msk.f32.gmra.mxu3 %vm2083_vm13, %v2081_v44 }
 0x31d   : > { %v2004_v22 = vsel %vm2001_vm3, %v2003_v37, %v1999_v58  ;;  %v6627_v35 = vpop.f32.mrf.mxu1  ;;  %v6631_v37 = vld [vmem:[#allocation5 + $0x170] sm:$0xff] }
 0x31e   : > { %v2053_v46 = vrot.slane %v2004_v22, 6 }
 0x31f   : > { %v1893_v8 = vpop.f32.mrf.mxu3 }
 0x320   : > { %v2054_v51 = vsel %vm2051_vm5, %v2052_v27, %v2053_v46  ;;  %v1894_v30 = vadd.f32 %v1893_v8, %v6546_v45 }
 0x321   : > { %v6577_v33 = vadd.f32 %v2054_v51, %v2045_v23 }
 0x322   : > { %v4622_v9 = vmul.f32 -1.442695, %v1894_v30 }
 0x323   : > { %7978 = vst [vmem:[#allocation38_spill] sm:$0xff] %v6577_v33  ;;  %4678 = vmatpush.msk.msra.mxu0 %vm2132_vm11, %v6577_v33  ;;  %v7900_v20 = vrot.slane %v6577_v33, 1 }
 0x324   : > { %4679 = vmatmul.msk.f32.vlgmr.msra.gmra.mxu0 %vm2342_vm6, %v6579_v29  ;;  %5150 = vpow2.f32 %v4622_v9  ;;  %4677 = vmatmul.msk.f32.gmra.mxu3 %vm2083_vm13, %v2082_v1  ;;  %v6685_v1 = vpop.f32.mrf.mxu2 }
 0x325   : > { %4420 = vst [vmem:[%s6589_s23 + $0x18] sm:$0x3] %v7900_v20  ;;  %v6643_v51 = vpop.f32.mrf.mxu1 }
 0x327   : > { %v1896_v15 = vpop.f32.mrf.mxu3 }
 0x328   : > { %v1897_v13 = vadd.f32 %v1896_v15, %v6552_v18 }
 0x32a   : > { %v5151_v36 = vpop.eup %5150  ;;  %v4625_v40 = vmul.f32 -1.442695, %v1897_v13 }
 0x32b   : > { %v1941_v61 = vadd.f32 1.0, %v5151_v36 }
 0x32c   : > { %4680 = vmatmul.msk.f32.gmra.mxu0 %vm2342_vm6, %v6597_v5  ;;  %5152 = vpow2.f32 %v4625_v40 }
 0x32d   : > { %5154 = vrcp.f32 %v1941_v61  ;;  %v1972_v38 = vand.u32 2147483648, %v1941_v61  ;;  %vm1966_vm8 = vweird.f32 %v1941_v61  ;;  %v1970_v21 = vand.u32 2147483647, %v1941_v61  ;;  %v6652_v54 = vpop.f32.mrf.mxu1 }
 0x32f   : > { %v1973_v59 = vor.u32 1.1754944e-38, %v1972_v38  ;;  %vm1971_vm9 = vcmp.eq.f32.partialorder %v1970_v21, 8.507059e+37 }
 0x332   : > { %v5153_v42 = vpop.eup %5152 }
 0x333   : > { %v5155_v34 = vpop.eup %5154  ;;  %v1944_v47 = vadd.f32 1.0, %v5153_v42 }
 0x334   : > { %4681 = vmatmul.msk.f32.gmra.mxu0 %vm2342_vm6, %v6605_v39  ;;  %v1962_v31 = vmul.f32 %v5155_v34, %v1941_v61  ;;  %vm1967_vm7 = vweird.f32 %v5155_v34 }
 0x335   : > { %5156 = vrcp.f32 %v1944_v47  ;;  %vm1968_vm15 = vmor %vm1966_vm8, %vm1967_vm7  ;;  %v2017_v53 = vand.u32 2147483648, %v1944_v47  ;;  %v2015_v60 = vand.u32 2147483647, %v1944_v47  ;;  %vm2011_vm12 = vweird.f32 %v1944_v47 }
 0x336   : > { %v1963_v14 = vsub.f32 1.0, %v1962_v31 }
 0x337   : > { %v2018_v57 = vor.u32 1.1754944e-38, %v2017_v53  ;;  %vm2016_vm1 = vcmp.eq.f32.partialorder %v2015_v60, 8.507059e+37  ;;  %v6658_v50 = vpop.f32.mrf.mxu1 }
 0x338   : > { %v1964_v6 = vmul.f32 %v5155_v34, %v1963_v14 }
 0x33a   : > { %v1965_v56 = vadd.f32 %v5155_v34, %v1964_v6 }
 0x33b   : > { %v5157_v41 = vpop.eup %5156 }
 0x33c   : > { %4682 = vmatmul.msk.f32.gmra.mxu0 %vm2342_vm6, %v6612_v19  ;;  %v2007_v63 = vmul.f32 %v5157_v41, %v1944_v47  ;;  %v1969_v52 = vsel %vm1968_vm15, %v5155_v34, %v1965_v56  ;;  %vm2012_vm10 = vweird.f32 %v5157_v41 }
 0x33d   : > { %v1974_v32 = vsel %vm1971_vm9, %v1973_v59, %v1969_v52  ;;  %vm2013_vm14 = vmor %vm2011_vm12, %vm2012_vm10 }
 0x33e   : > { %v2008_v7 = vsub.f32 1.0, %v2007_v63  ;;  %v2040_v4 = vrot.slane %v1974_v32, 3  ;;  %v2055_v26 = vrot.slane %v1974_v32, 6 }
 0x340   : > { %v2009_v55 = vmul.f32 %v5157_v41, %v2008_v7  ;;  %v2046_v24 = vadd.f32 %v2040_v4, %v1974_v32  ;;  %v6662_v7 = vpop.f32.mrf.mxu1 }
 0x341   : > { %v1916_v43 = vpop.f32.mrf.mxu0 }
 0x342   : > { %v1917_v49 = vadd.f32 %v1916_v43, %v6546_v45  ;;  %v2010_v12 = vadd.f32 %v5157_v41, %v2009_v55 }
 0x344   : > { %4683 = vmatmul.msk.f32.gmra.mxu0 %vm2342_vm6, %v6621_v2  ;;  %v4623_v10 = vmul.f32 -1.442695, %v1917_v49  ;;  %v2014_v25 = vsel %vm2013_vm14, %v5157_v41, %v2010_v12  ;;  %v6691_v12 = vpop.f32.mrf.mxu2 }
 0x345   : > { %v2019_v45 = vsel %vm2016_vm1, %v2018_v57, %v2014_v25 }
 0x346   : > { %5158 = vpow2.f32 %v4623_v10  ;;  %v2056_v17 = vrot.slane %v2019_v45, 6 }
 0x348   : > { %v2057_v11 = vsel %vm2051_vm5, %v2055_v26, %v2056_v17  ;;  %v2171_v32 = vpop.f32.mrf.mxu1 }
 0x349   : > { %v1919_v3 = vpop.f32.mrf.mxu0  ;;  %v6635_v22 = vadd.f32 %v2057_v11, %v2046_v24 }
 0x34a   : > { %v1920_v58 = vadd.f32 %v1919_v3, %v6552_v18  ;;  %v6648_v18 = vld [vmem:[#allocation5 + $0x178] sm:$0xff] }
 0x34b   : > { %7979 = vst [vmem:[#allocation36_spill] sm:$0xff] %v6635_v22  ;;  %4687 = vmatpush.msk.msrb.mxu0 %vm2132_vm11, %v6635_v22  ;;  %v7899_v23 = vrot.slane %v6635_v22, 1 }
 0x34c   : > { %4684 = vmatmul.msk.f32.gmra.mxu0 %vm2342_vm6, %v6631_v37  ;;  %v5159_v27 = vpop.eup %5158  ;;  %v4626_v46 = vmul.f32 -1.442695, %v1920_v58  ;;  %v6701_v57 = vpop.f32.mrf.mxu2 }
 0x34d   : > { %v1942_v8 = vadd.f32 1.0, %v5159_v27  ;;  %4421 = vst [vmem:[%s6589_s23 + $0x20] sm:$0x3] %v7899_v23  ;;  %v6826_v23 = vld [vmem:[#allocation5 + $0x1a8] sm:$0xff] }
 0x34e   : > { %5160 = vpow2.f32 %v4626_v46  ;;  %7989 = vst [vmem:[#allocation29_spill] sm:$0xff] %v6826_v23 }
 0x34f   : > { %5162 = vrcp.f32 %v1942_v8  ;;  %v1987_v28 = vand.u32 2147483648, %v1942_v8  ;;  %vm1981_vm2 = vweird.f32 %v1942_v8  ;;  %v1985_v40 = vand.u32 2147483647, %v1942_v8 }
 0x350   : > { %v2174_v49 = vpop.f32.mrf.mxu1 }
 0x351   : > { %v1988_v34 = vor.u32 1.1754944e-38, %v1987_v28  ;;  %vm1986_vm7 = vcmp.eq.f32.partialorder %v1985_v40, 8.507059e+37  ;;  %v6739_v40 = vpop.permute.xlu2 %2587 }
 0x354   : > { %4685 = vmatmul.msk.f32.gmra.mxu0 %vm2342_vm6, %v6648_v18  ;;  %v5161_v62 = vpop.eup %5160  ;;  %v6711_v4 = vpop.f32.mrf.mxu2 }
 0x355   : > { %v5163_v30 = vpop.eup %5162  ;;  %v1945_v16 = vadd.f32 1.0, %v5161_v62 }
 0x356   : > { %v1977_v9 = vmul.f32 %v5163_v30, %v1942_v8  ;;  %vm1982_vm13 = vweird.f32 %v5163_v30 }
 0x357   : > { %5164 = vrcp.f32 %v1945_v16  ;;  %vm1983_vm3 = vmor %vm1981_vm2, %vm1982_vm13  ;;  %v2032_v31 = vand.u32 2147483648, %v1945_v16  ;;  %v2030_v6 = vand.u32 2147483647, %v1945_v16  ;;  %vm2026_vm15 = vweird.f32 %v1945_v16 }
 0x358   : > { %v1978_v15 = vsub.f32 1.0, %v1977_v9  ;;  %vm4413_vm13 = vcmask 1046528  }
 0x359   : > { %v2033_v38 = vor.u32 1.1754944e-38, %v2032_v31  ;;  %vm2031_vm10 = vcmp.eq.f32.partialorder %v2030_v6, 8.507059e+37 }
 0x35a   : > { %v1979_v13 = vmul.f32 %v5163_v30, %v1978_v15 }
 0x35c   : > { %4686 = vmatmul.msk.f32.gmra.mxu0 %vm2342_vm6, %v6654_v0  ;;  %v1980_v48 = vadd.f32 %v5163_v30, %v1979_v13  ;;  %v6717_v17 = vpop.f32.mrf.mxu2 }
 0x35d   : > { %v5165_v36 = vpop.eup %5164 }
 0x35e   : > { %v2022_v61 = vmul.f32 %v5165_v36, %v1945_v16  ;;  %v1984_v42 = vsel %vm1983_vm3, %v5163_v30, %v1980_v48  ;;  %vm2027_vm8 = vweird.f32 %v5165_v36 }
 0x35f   : > { %v1989_v44 = vsel %vm1986_vm7, %v1988_v34, %v1984_v42  ;;  %vm2028_vm9 = vmor %vm2026_vm15, %vm2027_vm8 }
 0x360   : > { %v2023_v47 = vsub.f32 1.0, %v2022_v61  ;;  %v2041_v41 = vrot.slane %v1989_v44, 3  ;;  %v2058_v52 = vrot.slane %v1989_v44, 6 }
 0x362   : > { %v2024_v14 = vmul.f32 %v5165_v36, %v2023_v47  ;;  %v2047_v53 = vadd.f32 %v2041_v41, %v1989_v44 }
 0x364   : > { %4688 = vmatmul.msk.f32.vlgmr.msrb.gmra.mxu0 %vm2342_vm6, %v6579_v29  ;;  %v2025_v56 = vadd.f32 %v5165_v36, %v2024_v14  ;;  %v6721_v11 = vpop.f32.mrf.mxu2 }
 0x366   : > { %v2029_v21 = vsel %vm2028_vm9, %v5165_v36, %v2025_v56 }
 0x367   : > { %v2034_v63 = vsel %vm2031_vm10, %v2033_v38, %v2029_v21 }
 0x368   : > { %v2059_v59 = vrot.slane %v2034_v63, 6 }
 0x36a   : > { %v2060_v55 = vsel %vm2051_vm5, %v2058_v52, %v2059_v59  ;;  %v6760_v52 = vpop.permute.xlu2 %2577  ;;  %vm2707_vm5 = vcmask 523264  }
 0x36b   : > { %v6667_v60 = vadd.f32 %v2060_v55, %v2047_v53 }
 0x36c   : > { %4689 = vmatmul.msk.f32.gmra.mxu0 %vm2342_vm6, %v6597_v5  ;;  %v6725_v8 = vpop.f32.mrf.mxu2 }
 0x36d   : > { %7980 = vst [vmem:[#allocation37_spill] sm:$0xff] %v6667_v60  ;;  %4696 = vmatpush.msk.msra.mxu1 %vm2132_vm11, %v6667_v60  ;;  %v7898_v43 = vrot.slane %v6667_v60, 1 }
 0x36e   : > { %4697 = vmatmul.msk.f32.vlgmr.msra.gmra.mxu1 %vm2342_vm6, %v6579_v29  ;;  %v2177_v29 = vpop.f32.mrf.mxu1 }
 0x36f   : > { %4422 = vst [vmem:[%s6589_s23 + $0x28] sm:$0x3] %v7898_v43 }
 0x374   : > { %4690 = vmatmul.msk.f32.gmra.mxu0 %vm2342_vm6, %v6605_v39  ;;  %v6729_v16 = vpop.f32.mrf.mxu2 }
 0x376   : > { %4698 = vmatmul.msk.f32.gmra.mxu1 %vm2342_vm6, %v6597_v5  ;;  %v6695_v5 = vpop.f32.mrf.mxu3 }
 0x37c   : > { %4691 = vmatmul.msk.f32.gmra.mxu0 %vm2342_vm6, %v6612_v19  ;;  %v6735_v28 = vpop.f32.mrf.mxu2 }
 0x37e   : > { %4699 = vmatmul.msk.f32.gmra.mxu1 %vm2342_vm6, %v6605_v39  ;;  %v2180_v39 = vpop.f32.mrf.mxu1  ;;  %v6703_v10 = vpop.f32.mrf.mxu3 }
 0x384   : > { %4692 = vmatmul.msk.f32.gmra.mxu0 %vm2342_vm6, %v6621_v2  ;;  %v6752_v56 = vpop.f32.mrf.mxu2 }
 0x386   : > { %4700 = vmatmul.msk.f32.gmra.mxu1 %vm2342_vm6, %v6612_v19  ;;  %v2183_v19 = vpop.f32.mrf.mxu1 }
 0x38c   : > { %4693 = vmatmul.msk.f32.gmra.mxu0 %vm2342_vm6, %v6631_v37 }
 0x38e   : > { %4701 = vmatmul.msk.f32.gmra.mxu1 %vm2342_vm6, %v6621_v2  ;;  %v6713_v2 = vpop.f32.mrf.mxu3  ;;  %v2186_v45 = vpop.f32.mrf.mxu1 }
 0x394   : > { %4694 = vmatmul.msk.f32.gmra.mxu0 %vm2342_vm6, %v6648_v18 }
 0x396   : > { %4702 = vmatmul.msk.f32.gmra.mxu1 %vm2342_vm6, %v6631_v37  ;;  %v6719_v24 = vpop.f32.mrf.mxu3  ;;  %v2189_v37 = vpop.f32.mrf.mxu1 }
 0x39c   : > { %4695 = vmatmul.msk.f32.gmra.mxu0 %vm2342_vm6, %v6654_v0 }
 0x39e   : > { %4703 = vmatmul.msk.f32.gmra.mxu1 %vm2342_vm6, %v6648_v18  ;;  %v6723_v58 = vpop.f32.mrf.mxu3  ;;  %v2192_v46 = vpop.f32.mrf.mxu1 }
 0x3a1   : > { %v2393_v25 = vpop.f32.mrf.mxu0 }
 0x3a6   : > { %4704 = vmatmul.msk.f32.gmra.mxu1 %vm2342_vm6, %v6654_v0  ;;  %v6727_v18 = vpop.f32.mrf.mxu3  ;;  %v2195_v30 = vpop.f32.mrf.mxu1 }
 0x3a7   : > { %v6733_v0 = vpop.permute.xlu1 %2592 }
 0x3a9   : > { %v2396_v26 = vpop.f32.mrf.mxu0 }
 0x3ae   : > { %v6731_v9 = vpop.f32.mrf.mxu3  ;;  %v2198_v13 = vpop.f32.mrf.mxu1 }
 0x3af   : > { %v6741_v61 = vpop.permute.xlu1 %2582 }
 0x3b1   : > { %v2399_v3 = vpop.f32.mrf.mxu0 }
 0x3b2   : > { %v6762_v59 = vadd.f32 %v2399_v3, %v2186_v45  ;;  %v6777_v45 = vadd.f32 %v2393_v25, %v2180_v39 }
 0x3b4   : > { %7986 = vst [vmem:[#allocation34_spill] sm:$0xff] %v6762_v59  ;;  %v2523_v39 = vadd.f32 %v6777_v45, %v6627_v35 }
 0x3b5   : > { %7988 = vst [vmem:[#allocation31_spill] sm:$0xff] %v6777_v45  ;;  %v6832_v45 = vld [vmem:[#allocation5 + $0x1b0] sm:$0xff] }
 0x3b6   : > { %v6737_v36 = vpop.f32.mrf.mxu3  ;;  %v2201_v34 = vpop.f32.mrf.mxu1 }
 0x3b9   : > { %v2402_v27 = vpop.f32.mrf.mxu0 }
 0x3ba   : > { %v6754_v38 = vadd.f32 %v2402_v27, %v2189_v37  ;;  %v6770_v37 = vadd.f32 %v2396_v26, %v2183_v19 }
 0x3bc   : > { %7985 = vst [vmem:[#allocation28_spill] sm:$0xff] %v6754_v38  ;;  %v2526_v19 = vadd.f32 %v6770_v37, %v6643_v51 }
 0x3bd   : > { %7987 = vst [vmem:[#allocation25_spill] sm:$0xff] %v6770_v37 }
 0x3be   : > { %v6758_v63 = vpop.f32.mrf.mxu3 }
 0x3c1   : > { %v2405_v62 = vpop.f32.mrf.mxu0 }
 0x3c2   : > { %v6747_v14 = vadd.f32 %v2405_v62, %v2192_v46  ;;  %v6768_v46 = vpop.permute.xlu1 %2567 }
 0x3c4   : > { %7983 = vst [vmem:[#allocation24_spill] sm:$0xff] %v6747_v14  ;;  %v2535_v53 = vadd.f32 %v6747_v14, %v6662_v7  ;;  %v2529_v7 = vadd.f32 %v6762_v59, %v6652_v54 }
 0x3c6   : > { %v2601_v25 = vadd.f32 %v6768_v46, %v2529_v7 }
 0x3c9   : > { %v2408_v15 = vpop.f32.mrf.mxu0 }
 0x3ca   : > { %v6745_v47 = vadd.f32 %v2408_v15, %v2195_v30  ;;  %v2607_v30 = vadd.f32 %v6760_v52, %v2535_v53  ;;  %v6782_v15 = vpop.permute.xlu0 %2572  ;;  %v2625_v53 = vmax.f32 %v2601_v25, 0.0 }
 0x3cc   : > { %7982 = vst [vmem:[#allocation33_spill] sm:$0xff] %v6745_v47  ;;  %v2538_v41 = vadd.f32 %v6745_v47, %v2171_v32  ;;  %v2532_v32 = vadd.f32 %v6754_v38, %v6658_v50  ;;  %v2631_v54 = vmax.f32 %v2607_v30, 0.0  ;;  %v6810_v30 = vld [vmem:[#allocation5 + $0x190] sm:$0xff] }
 0x3ce   : > { %v2610_v27 = vadd.f32 %v6741_v61, %v2538_v41  ;;  %v2604_v50 = vadd.f32 %v6782_v15, %v2532_v32  ;;  %v6802_v32 = vld [vmem:[#allocation5 + $0x188] sm:$0xff] }
 0x3d0   : > { %v2634_v26 = vmax.f32 %v2610_v27, 0.0  ;;  %v2628_v51 = vmax.f32 %v2604_v50, 0.0 }
 0x3d1   : > { %v2411_v48 = vpop.f32.mrf.mxu0 }
 0x3d2   : > { %v6743_v42 = vadd.f32 %v2411_v48, %v2198_v13  ;;  %v6787_v13 = vpop.f32.mrf.mxu2  ;;  %v6792_v48 = vpop.f32.mrf.mxu3 }
 0x3d4   : > { %7981 = vst [vmem:[#allocation27_spill] sm:$0xff] %v6743_v42  ;;  %v2541_v6 = vadd.f32 %v6743_v42, %v2174_v49 }
 0x3d6   : > { %v2613_v49 = vadd.f32 %v6739_v40, %v2541_v6  ;;  %v6797_v6 = vpop.permute.xlu1 %2557 }
 0x3d8   : > { %v2637_v3 = vmax.f32 %v2613_v49, 0.0 }
 0x3d9   : > { %v2414_v31 = vpop.f32.mrf.mxu0 }
 0x3da   : > { %v6750_v44 = vadd.f32 %v2414_v31, %v2201_v34  ;;  %v6794_v34 = vpop.permute.xlu2 %2562  ;;  %v6804_v27 = vpop.f32.mrf.mxu3 }
 0x3db   : > { %v2598_v31 = vadd.f32 %v6794_v34, %v2526_v19 }
 0x3dc   : > { %7984 = vst [vmem:[#allocation30_spill] sm:$0xff] %v6750_v44  ;;  %v2544_v21 = vadd.f32 %v6750_v44, %v2177_v29 }
 0x3de   : > { %v2616_v55 = vadd.f32 %v6733_v0, %v2544_v21  ;;  %v2595_v21 = vadd.f32 %v6797_v6, %v2523_v39 }
 0x3e0   : > { %v2640_v29 = vmax.f32 %v2616_v55, 0.0  ;;  %v2622_v55 = vmax.f32 %v2598_v31, 0.0  ;;  %v2619_v49 = vmax.f32 %v2595_v21, 0.0 }
 0x3e1   : > { %v6775_v62 = vpop.f32.mrf.mxu0 }
 0x3e2   : > { %2740 = vmatpush.msra.mxu2 %v2640_v29  ;;  %v2254_v29 = vpop.f32.mrf.mxu2 }
 0x3e4   : > { %2741 = vmatpush.msra.mxu2 %v2637_v3 }
 0x3e6   : > { %2742 = vmatpush.msra.mxu2 %v2634_v26  ;;  %v6814_v26 = vpop.f32.mrf.mxu3 }
 0x3e8   : > { %2743 = vmatpush.msra.mxu2 %v2631_v54  ;;  %v6818_v54 = vld [vmem:[#allocation5 + $0x198] sm:$0xff] }
 0x3e9   : > { %v2437_v41 = vpop.f32.mrf.mxu0 }
 0x3ea   : > { %2744 = vmatpush.msra.mxu2 %v2628_v51  ;;  %v2257_v50 = vpop.f32.mrf.mxu2 }
 0x3eb   : > { %v6800_v35 = vpop.f32.mrf.mxu1 }
 0x3ec   : > { %2745 = vmatpush.msra.mxu2 %v2625_v53  ;;  %v6822_v53 = vld [vmem:[#allocation5 + $0x1a0] sm:$0xff] }
 0x3ee   : > { %2746 = vmatpush.msra.mxu2 %v2622_v55  ;;  %v2322_v21 = vpop.f32.mrf.mxu3 }
 0x3f0   : > { %2747 = vmatpush.msra.mxu2 %v2619_v49 }
 0x3f1   : > { %v2440_v7 = vpop.f32.mrf.mxu0  ;;  %4705 = vmatmul.msk.f32.vlgmr.msra.gmra.mxu2 %vm2707_vm5, %v6802_v32 }
 0x3f2   : > { %v2260_v31 = vpop.f32.mrf.mxu2 }
 0x3f3   : > { %v6808_v3 = vpop.f32.mrf.mxu1 }
 0x3f6   : > { %v2325_v20 = vpop.f32.mrf.mxu3 }
 0x3f9   : > { %v2443_v19 = vpop.f32.mrf.mxu0  ;;  %4706 = vmatmul.msk.f32.gmra.mxu2 %vm2707_vm5, %v6810_v30 }
 0x3fa   : > { %v2263_v43 = vpop.f32.mrf.mxu2 }
 0x3fb   : > { %v6816_v39 = vpop.f32.mrf.mxu1 }
 0x3fe   : > { %v2328_v38 = vpop.f32.mrf.mxu3 }
 0x401   : > { %v2446_v25 = vpop.f32.mrf.mxu0  ;;  %4707 = vmatmul.msk.f32.gmra.mxu2 %vm2707_vm5, %v6818_v54 }
 0x402   : > { %v2266_v37 = vpop.f32.mrf.mxu2  ;;  %v6838_v47 = vadd.f32 %v2446_v25, %v2257_v50 }
 0x403   : > { %v2484_v51 = vpop.f32.mrf.mxu1 }
 0x404   : > { %v2536_v50 = vadd.f32 %v6838_v47, %v6717_v17  ;;  %v6871_v17 = vadd.f32 %v6775_v62, %v6735_v28 }
 0x409   : > { %v2449_v55 = vpop.f32.mrf.mxu0  ;;  %4708 = vmatmul.msk.f32.gmra.mxu2 %vm2707_vm5, %v6822_v53 }
 0x40a   : > { %v6834_v59 = vadd.f32 %v2449_v55, %v2260_v31  ;;  %v6851_v55 = vadd.f32 %v2440_v7, %v6787_v13 }
 0x40b   : > { %v2487_v49 = vpop.f32.mrf.mxu1 }
 0x40c   : > { %v6881_v28 = vadd.f32 %v2487_v49, %v2322_v21 }
 0x411   : > { %v2452_v60 = vpop.f32.mrf.mxu0  ;;  %4709 = vmatmul.msk.f32.gmra.mxu2 %vm2707_vm5, %v6826_v23  ;;  %v6844_v23 = vadd.f32 %v2443_v19, %v2254_v29 }
 0x412   : > { %v6830_v33 = vadd.f32 %v2452_v60, %v2263_v43  ;;  %v2539_v60 = vadd.f32 %v6834_v59, %v6721_v11 }
 0x413   : > { %v2490_v22 = vpop.f32.mrf.mxu1  ;;  %v2533_v11 = vadd.f32 %v6844_v23, %v6711_v4  ;;  %v2608_v4 = vadd.f32 %v6760_v52, %v2536_v50  ;;  %v6893_v50 = vadd.f32 %v2484_v51, %v6814_v26 }
 0x414   : > { %v2542_v44 = vadd.f32 %v6830_v33, %v6725_v8  ;;  %v6856_v8 = vld [vmem:[#allocation5 + $0x1b8] sm:$0xff]  ;;  %v2611_v29 = vadd.f32 %v6741_v61, %v2539_v60  ;;  %v6876_v7 = vadd.f32 %v2490_v22, %v2325_v20  ;;  %v6889_v22 = vld [vmem:[#allocation5 + $0x1c0] sm:$0xff] }
 0x415   : > { %v2632_v20 = vmax.f32 %v2608_v4, 0.0 }
 0x416   : > { %v2635_v60 = vmax.f32 %v2611_v29, 0.0  ;;  %v2540_v21 = vadd.f32 %v6876_v7, %v6727_v18 }
 0x419   : > { %v2455_v14 = vpop.f32.mrf.mxu0  ;;  %4710 = vmatmul.msk.f32.gmra.mxu2 %vm2707_vm5, %v6832_v45 }
 0x41a   : > { %v6842_v42 = vadd.f32 %v2455_v14, %v2266_v37  ;;  %v2614_v14 = vadd.f32 %v6739_v40, %v2542_v44  ;;  %v6860_v37 = vadd.f32 %v2437_v41, %v6752_v56  ;;  %v2530_v44 = vadd.f32 %v6851_v55, %v6701_v57  ;;  %v2331_v56 = vpop.f32.mrf.mxu3 }
 0x41b   : > { %v2493_v31 = vpop.f32.mrf.mxu1 }
 0x41c   : > { %v2545_v43 = vadd.f32 %v6842_v42, %v6729_v16  ;;  %v6865_v13 = vadd.f32 %v2493_v31, %v2328_v38  ;;  %v2638_v41 = vmax.f32 %v2614_v14, 0.0  ;;  %v2527_v38 = vadd.f32 %v6860_v37, %v6691_v12 }
 0x41d   : > { %v2524_v31 = vadd.f32 %v6871_v17, %v6685_v1  ;;  %v2602_v12 = vadd.f32 %v6768_v46, %v2530_v44  ;;  %v6902_v1 = vadd.f32 %v6816_v39, %v6804_v27  ;;  %v2537_v14 = vadd.f32 %v6881_v28, %v6723_v58 }
 0x41e   : > { %v2617_v25 = vadd.f32 %v6733_v0, %v2545_v43  ;;  %v2605_v43 = vadd.f32 %v6782_v15, %v2533_v11  ;;  %v2543_v57 = vadd.f32 %v6865_v13, %v6731_v9  ;;  %v6913_v11 = vadd.f32 %v6808_v3, %v6792_v48 }
 0x41f   : > { %v2596_v51 = vadd.f32 %v6797_v6, %v2524_v31  ;;  %v2534_v27 = vadd.f32 %v6893_v50, %v6719_v24  ;;  %v2612_v58 = vadd.f32 %v6741_v61, %v2540_v21  ;;  %v2609_v48 = vadd.f32 %v6760_v52, %v2537_v14 }
 0x420   : > { %v2641_v16 = vmax.f32 %v2617_v25, 0.0  ;;  %v2629_v49 = vmax.f32 %v2605_v43, 0.0  ;;  %v2599_v25 = vadd.f32 %v6794_v34, %v2527_v38  ;;  %v2615_v18 = vadd.f32 %v6739_v40, %v2543_v57  ;;  %v6967_v57 = vpop.permute.xlu1 %2664 }
 0x421   : > { %4711 = vmatmul.msk.f32.gmra.mxu2 %vm2707_vm5, %v6856_v8  ;;  %v2531_v40 = vadd.f32 %v6902_v1, %v6713_v2  ;;  %v2620_v3 = vmax.f32 %v2596_v51, 0.0  ;;  %v2528_v24 = vadd.f32 %v6913_v11, %v6703_v10  ;;  %v2636_v61 = vmax.f32 %v2612_v58, 0.0 }
 0x422   : > { %2781 = vmatpush.msra.mxu3 %v2641_v16  ;;  %v6920_v16 = vadd.f32 %v6800_v35, %v6758_v63  ;;  %v2639_v29 = vmax.f32 %v2615_v18, 0.0  ;;  %v2606_v44 = vadd.f32 %v6782_v15, %v2534_v27  ;;  %v2633_v2 = vmax.f32 %v2609_v48, 0.0  ;;  %v7993_v18 = vld [vmem:[#allocation33_spill] sm:$0xff]  ;;  %v7995_v48 = vld [vmem:[#allocation28_spill] sm:$0xff] }
 0x423   : > { %v2496_v19 = vpop.f32.mrf.mxu1  ;;  %v2603_v52 = vadd.f32 %v6768_v46, %v2531_v40  ;;  %v7990_v46 = vld [vmem:[#allocation29_spill] sm:$0xff] }
 0x424   : > { %2782 = vmatpush.msra.mxu3 %v2638_v41  ;;  %v6885_v62 = vadd.f32 %v2496_v19, %v2331_v56  ;;  %v2525_v63 = vadd.f32 %v6920_v16, %v6695_v5  ;;  %v2630_v35 = vmax.f32 %v2606_v44, 0.0  ;;  %v2600_v56 = vadd.f32 %v6794_v34, %v2528_v24 }
 0x425   : > { %v2627_v10 = vmax.f32 %v2603_v52, 0.0 }
 0x426   : > { %2783 = vmatpush.msra.mxu3 %v2635_v60  ;;  %v2546_v9 = vadd.f32 %v6885_v62, %v6737_v36  ;;  %v2626_v36 = vmax.f32 %v2602_v12, 0.0  ;;  %v2597_v41 = vadd.f32 %v6797_v6, %v2525_v63  ;;  %v2624_v15 = vmax.f32 %v2600_v56, 0.0  ;;  %v6965_v60 = vpop.permute.xlu2 %2672  ;;  %v6971_v12 = vpop.permute.xlu0 %2668  ;;  %v7996_v63 = vld [vmem:[#allocation34_spill] sm:$0xff] }
 0x428   : > { %2784 = vmatpush.msra.mxu3 %v2632_v20  ;;  %v2618_v26 = vadd.f32 %v6733_v0, %v2546_v9  ;;  %v2623_v0 = vmax.f32 %v2599_v25, 0.0  ;;  %v2621_v5 = vmax.f32 %v2597_v41, 0.0  ;;  %v6973_v21 = vpop.permute.xlu1 %2656  ;;  %v7991_v9 = vld [vmem:[#allocation27_spill] sm:$0xff]  ;;  %v7992_v25 = vld [vmem:[#allocation30_spill] sm:$0xff]  ;;  %v7997_v41 = vld [vmem:[#allocation25_spill] sm:$0xff] }
 0x429   : > { %4712 = vmatmul.msk.f32.gmra.mxu2 %vm2707_vm5, %v6889_v22  ;;  %v6981_v14 = vadd.f32 %v6965_v60, %v7992_v25 }
 0x42a   : > { %2785 = vmatpush.msra.mxu3 %v2629_v49  ;;  %v2642_v39 = vmax.f32 %v2618_v26, 0.0  ;;  %v6977_v49 = vadd.f32 %v6971_v12, %v7991_v9 }
 0x42c   : > { %2786 = vmatpush.msra.mxu3 %v2626_v36  ;;  %2822 = vmatpush.msra.mxu0 %v2642_v39  ;;  %v6985_v36 = vadd.f32 %v6967_v57, %v7993_v18  ;;  %v7994_v39 = vld [vmem:[#allocation24_spill] sm:$0xff] }
 0x42e   : > { %2787 = vmatpush.msra.mxu3 %v2623_v0  ;;  %2823 = vmatpush.msra.mxu0 %v2639_v29  ;;  %v6969_v20 = vpop.permute.xlu2 %2660  ;;  %v7001_v44 = vpop.permute.xlu0 %2648 }
 0x42f   : > { %v6991_v58 = vadd.f32 %v6969_v20, %v7994_v39 }
 0x430   : > { %2788 = vmatpush.msra.mxu3 %v2620_v3  ;;  %2824 = vmatpush.msra.mxu0 %v2636_v61  ;;  %v6998_v3 = vadd.f32 %v6973_v21, %v7995_v48  ;;  %v7008_v56 = vpop.permute.xlu1 %2644 }
 0x431   : > { %4713 = vmatmul.msk.f32.vlgmr.msra.gmra.mxu3 %vm2707_vm5, %v6802_v32 }
 0x432   : > { %2825 = vmatpush.msra.mxu0 %v2633_v2 }
 0x434   : > { %2826 = vmatpush.msra.mxu0 %v2630_v35 }
 0x436   : > { %2827 = vmatpush.msra.mxu0 %v2627_v10  ;;  %v6994_v29 = vpop.permute.xlu2 %2652 }
 0x437   : > { %v7005_v2 = vadd.f32 %v6994_v29, %v7996_v63 }
 0x438   : > { %2828 = vmatpush.msra.mxu0 %v2624_v15  ;;  %v7014_v15 = vadd.f32 %v7001_v44, %v7997_v41  ;;  %v7041_v41 = vadd.f32 %v6971_v12, %v6830_v33 }
 0x439   : > { %4714 = vmatmul.msk.f32.gmra.mxu3 %vm2707_vm5, %v6810_v30 }
 0x43a   : > { %2829 = vmatpush.msra.mxu0 %v2621_v5 }
 0x43b   : > { %4721 = vmatmul.msk.f32.vlgmr.msra.gmra.mxu0 %vm2707_vm5, %v6802_v32 }
 0x441   : > { %4715 = vmatmul.msk.f32.gmra.mxu3 %vm2707_vm5, %v6818_v54 }
 0x443   : > { %4722 = vmatmul.msk.f32.gmra.mxu0 %vm2707_vm5, %v6810_v30 }
 0x449   : > { %4716 = vmatmul.msk.f32.gmra.mxu3 %vm2707_vm5, %v6822_v53 }
 0x44b   : > { %4723 = vmatmul.msk.f32.gmra.mxu0 %vm2707_vm5, %v6818_v54 }
 0x451   : > { %4717 = vmatmul.msk.f32.gmra.mxu3 %vm2707_vm5, %v7990_v46 }
 0x453   : > { %4724 = vmatmul.msk.f32.gmra.mxu0 %vm2707_vm5, %v6822_v53 }
 0x459   : > { %4718 = vmatmul.msk.f32.gmra.mxu3 %vm2707_vm5, %v6832_v45 }
 0x45b   : > { %4725 = vmatmul.msk.f32.gmra.mxu0 %vm2707_vm5, %v7990_v46 }
 0x461   : > { %4719 = vmatmul.msk.f32.gmra.mxu3 %vm2707_vm5, %v6856_v8 }
 0x463   : > { %4726 = vmatmul.msk.f32.gmra.mxu0 %vm2707_vm5, %v6832_v45 }
 0x469   : > { %4720 = vmatmul.msk.f32.gmra.mxu3 %vm2707_vm5, %v6889_v22 }
 0x46b   : > { %4727 = vmatmul.msk.f32.gmra.mxu0 %vm2707_vm5, %v6856_v8 }
 0x473   : > { %4728 = vmatmul.msk.f32.gmra.mxu0 %vm2707_vm5, %v6889_v22 }
 0x474   : > { %v2749_v34 = vpop.f32.mrf.mxu2 }
 0x47c   : > { %v2752_v6 = vpop.f32.mrf.mxu2 }
 0x484   : > { %v2755_v4 = vpop.f32.mrf.mxu2 }
 0x485   : > { %v2756_v5 = vadd.f32 %v2755_v4, %v7005_v2 }
 0x48c   : > { %v2758_v38 = vpop.f32.mrf.mxu2 }
 0x48d   : > { %v2759_v52 = vadd.f32 %v2758_v38, %v6998_v3  ;;  %v2753_v38 = vadd.f32 %v2752_v6, %v7014_v15 }
 0x48f   : > { %v2864_v9 = vmax.f32 %v2759_v52, 0.0 }
 0x494   : > { %v2761_v19 = vpop.f32.mrf.mxu2 }
 0x495   : > { %v2762_v24 = vadd.f32 %v2761_v19, %v6991_v58 }
 0x497   : > { %v2867_v19 = vmax.f32 %v2762_v24, 0.0 }
 0x49c   : > { %v2764_v43 = vpop.f32.mrf.mxu2 }
 0x49d   : > { %v2765_v0 = vadd.f32 %v2764_v43, %v6985_v36  ;;  %v7998_v43 = vld [vmem:[#allocation31_spill] sm:$0xff] }
 0x49f   : > { %v2870_v35 = vmax.f32 %v2765_v0, 0.0 }
 0x4a4   : > { %v2767_v31 = vpop.f32.mrf.mxu2 }
 0x4a5   : > { %v2768_v51 = vadd.f32 %v2767_v31, %v6977_v49  ;;  %v7019_v31 = vadd.f32 %v7008_v56, %v7998_v43  ;;  %v7049_v43 = vadd.f32 %v6967_v57, %v6834_v59  ;;  %v7070_v59 = vadd.f32 %v6973_v21, %v6844_v23 }
 0x4a7   : > { %v2873_v61 = vmax.f32 %v2768_v51, 0.0  ;;  %v2750_v25 = vadd.f32 %v2749_v34, %v7019_v31  ;;  %v2858_v51 = vmax.f32 %v2753_v38, 0.0 }
 0x4a9   : > { %v2855_v4 = vmax.f32 %v2750_v25, 0.0  ;;  %v7055_v25 = vadd.f32 %v6969_v20, %v6838_v47 }
 0x4ac   : > { %v2770_v26 = vpop.f32.mrf.mxu2 }
 0x4ad   : > { %v2771_v27 = vadd.f32 %v2770_v26, %v6981_v14  ;;  %v2861_v26 = vmax.f32 %v2756_v5, 0.0  ;;  %v7045_v5 = vadd.f32 %v6965_v60, %v6842_v42  ;;  %v7060_v42 = vadd.f32 %v6971_v12, %v6865_v13 }
 0x4ae   : > { %v7075_v13 = vadd.f32 %v6967_v57, %v6876_v7  ;;  %v7091_v57 = vadd.f32 %v7001_v44, %v6860_v37 }
 0x4af   : > { %v2876_v40 = vmax.f32 %v2771_v27, 0.0 }
 0x4b1   : > { %2887 = vmatpush.msrb.mxu1 %v2876_v40 }
 0x4b3   : > { %2888 = vmatpush.msrb.mxu1 %v2873_v61 }
 0x4b4   : > { %v7010_v10 = vpop.f32.mrf.mxu3 }
 0x4b5   : > { %2889 = vmatpush.msrb.mxu1 %v2870_v35 }
 0x4b7   : > { %2890 = vmatpush.msrb.mxu1 %v2867_v19 }
 0x4b8   : > { %v7023_v18 = vpop.f32.mrf.mxu0 }
 0x4b9   : > { %2891 = vmatpush.msrb.mxu1 %v2864_v9 }
 0x4bb   : > { %2892 = vmatpush.msrb.mxu1 %v2861_v26 }
 0x4bc   : > { %v2793_v27 = vpop.f32.mrf.mxu3 }
 0x4bd   : > { %2893 = vmatpush.msrb.mxu1 %v2858_v51  ;;  %v7064_v51 = vadd.f32 %v6965_v60, %v6885_v62  ;;  %v7081_v60 = vadd.f32 %v6994_v29, %v6851_v55  ;;  %v7096_v55 = vadd.f32 %v6973_v21, %v6893_v50 }
 0x4bf   : > { %2894 = vmatpush.msrb.mxu1 %v2855_v4 }
 0x4c0   : > { %4729 = vmatmul.msk.f32.vlgmr.msrb.gmra.mxu1 %vm2707_vm5, %v6802_v32  ;;  %v7027_v39 = vpop.f32.mrf.mxu0 }
 0x4c4   : > { %v2796_v6 = vpop.f32.mrf.mxu3 }
 0x4c8   : > { %4730 = vmatmul.msk.f32.gmra.mxu1 %vm2707_vm5, %v6810_v30  ;;  %v2837_v34 = vpop.f32.mrf.mxu0 }
 0x4cc   : > { %v2799_v0 = vpop.f32.mrf.mxu3 }
 0x4cd   : > { %v2800_v23 = vadd.f32 %v2799_v0, %v7070_v59 }
 0x4cf   : > { %v2865_v37 = vmax.f32 %v2800_v23, 0.0 }
 0x4d0   : > { %4731 = vmatmul.msk.f32.gmra.mxu1 %vm2707_vm5, %v6818_v54  ;;  %v2840_v40 = vpop.f32.mrf.mxu0 }
 0x4d4   : > { %v2802_v48 = vpop.f32.mrf.mxu3 }
 0x4d5   : > { %v2803_v47 = vadd.f32 %v2802_v48, %v7055_v25  ;;  %v7086_v48 = vadd.f32 %v6969_v20, %v6881_v28  ;;  %v7101_v28 = vadd.f32 %v7008_v56, %v6871_v17  ;;  %v2794_v20 = vadd.f32 %v2793_v27, %v7091_v57 }
 0x4d6   : > { %v7115_v27 = vadd.f32 %v7001_v44, %v6913_v11 }
 0x4d7   : > { %v2791_v21 = vadd.f32 %v7010_v10, %v7101_v28 }
 0x4d8   : > { %4732 = vmatmul.msk.f32.gmra.mxu1 %vm2707_vm5, %v6822_v53  ;;  %v2843_v24 = vpop.f32.mrf.mxu0 }
 0x4d9   : > { %v2844_v0 = vadd.f32 %v2843_v24, %v7086_v48 }
 0x4dc   : > { %v2805_v61 = vpop.f32.mrf.mxu3 }
 0x4dd   : > { %v2806_v33 = vadd.f32 %v2805_v61, %v7049_v43 }
 0x4e0   : > { %4733 = vmatmul.msk.f32.gmra.mxu1 %vm2707_vm5, %v7990_v46  ;;  %v2846_v63 = vpop.f32.mrf.mxu0 }
 0x4e4   : > { %v2808_v52 = vpop.f32.mrf.mxu3 }
 0x4e5   : > { %v2809_v38 = vadd.f32 %v2808_v52, %v7041_v41  ;;  %v2871_v52 = vmax.f32 %v2806_v33, 0.0  ;;  %v2835_v33 = vadd.f32 %v7027_v39, %v7115_v27 }
 0x4e7   : > { %v2874_v4 = vmax.f32 %v2809_v38, 0.0  ;;  %v2868_v38 = vmax.f32 %v2803_v47, 0.0 }
 0x4e8   : > { %4734 = vmatmul.msk.f32.gmra.mxu1 %vm2707_vm5, %v6832_v45  ;;  %v2849_v35 = vpop.f32.mrf.mxu0 }
 0x4e9   : > { %v2850_v12 = vadd.f32 %v2849_v35, %v7060_v42  ;;  %v2797_v35 = vadd.f32 %v2796_v6, %v7081_v60  ;;  %v7106_v6 = vadd.f32 %v6994_v29, %v6902_v1  ;;  %v2869_v1 = vmax.f32 %v2844_v0, 0.0 }
 0x4ea   : > { %v2859_v29 = vmax.f32 %v2794_v20, 0.0 }
 0x4eb   : > { %v2862_v17 = vmax.f32 %v2797_v35, 0.0  ;;  %v2838_v24 = vadd.f32 %v2837_v34, %v7106_v6  ;;  %v2860_v34 = vmax.f32 %v2835_v33, 0.0 }
 0x4ec   : > { %v2811_v19 = vpop.f32.mrf.mxu3 }
 0x4ed   : > { %v2812_v9 = vadd.f32 %v2811_v19, %v7045_v5  ;;  %v2847_v19 = vadd.f32 %v2846_v63, %v7075_v13  ;;  %v2841_v63 = vadd.f32 %v2840_v40, %v7096_v55  ;;  %v7120_v40 = vadd.f32 %v7008_v56, %v6920_v16 }
 0x4ee   : > { %v2863_v44 = vmax.f32 %v2838_v24, 0.0 }
 0x4ef   : > { %v2877_v26 = vmax.f32 %v2812_v9, 0.0  ;;  %v2875_v9 = vmax.f32 %v2850_v12, 0.0  ;;  %v2872_v50 = vmax.f32 %v2847_v19, 0.0  ;;  %v2866_v10 = vmax.f32 %v2841_v63, 0.0 }
 0x4f0   : > { %4735 = vmatmul.msk.f32.gmra.mxu1 %vm2707_vm5, %v6856_v8  ;;  %v2852_v61 = vpop.f32.mrf.mxu0  ;;  %v2832_v11 = vadd.f32 %v7023_v18, %v7120_v40 }
 0x4f1   : > { %2928 = vmatpush.msrb.mxu2 %v2877_v26  ;;  %v2853_v62 = vadd.f32 %v2852_v61, %v7064_v51  ;;  %v2856_v26 = vmax.f32 %v2791_v21, 0.0 }
 0x4f2   : > { %v2857_v16 = vmax.f32 %v2832_v11, 0.0 }
 0x4f3   : > { %2929 = vmatpush.msrb.mxu2 %v2874_v4  ;;  %v2878_v7 = vmax.f32 %v2853_v62, 0.0 }
 0x4f5   : > { %2930 = vmatpush.msrb.mxu2 %v2871_v52  ;;  %2969 = vmatpush.msrb.mxu3 %v2878_v7 }
 0x4f7   : > { %2931 = vmatpush.msrb.mxu2 %v2868_v38  ;;  %2970 = vmatpush.msrb.mxu3 %v2875_v9 }
 0x4f8   : > { %4736 = vmatmul.msk.f32.gmra.mxu1 %vm2707_vm5, %v6889_v22 }
 0x4f9   : > { %2932 = vmatpush.msrb.mxu2 %v2865_v37  ;;  %2971 = vmatpush.msrb.mxu3 %v2872_v50 }
 0x4fb   : > { %2933 = vmatpush.msrb.mxu2 %v2862_v17  ;;  %2972 = vmatpush.msrb.mxu3 %v2869_v1 }
 0x4fd   : > { %2934 = vmatpush.msrb.mxu2 %v2859_v29  ;;  %2973 = vmatpush.msrb.mxu3 %v2866_v10 }
 0x4ff   : > { %2935 = vmatpush.msrb.mxu2 %v2856_v26  ;;  %2974 = vmatpush.msrb.mxu3 %v2863_v44 }
 0x500   : > { %4737 = vmatmul.msk.f32.vlgmr.msrb.gmra.mxu2 %vm2707_vm5, %v6802_v32 }
 0x501   : > { %2975 = vmatpush.msrb.mxu3 %v2860_v34 }
 0x503   : > { %2976 = vmatpush.msrb.mxu3 %v2857_v16 }
 0x504   : > { %4745 = vmatmul.msk.f32.vlgmr.msrb.gmra.mxu3 %vm2707_vm5, %v6802_v32 }
 0x508   : > { %4738 = vmatmul.msk.f32.gmra.mxu2 %vm2707_vm5, %v6810_v30 }
 0x50c   : > { %4746 = vmatmul.msk.f32.gmra.mxu3 %vm2707_vm5, %v6810_v30 }
 0x510   : > { %4739 = vmatmul.msk.f32.gmra.mxu2 %vm2707_vm5, %v6818_v54 }
 0x514   : > { %4747 = vmatmul.msk.f32.gmra.mxu3 %vm2707_vm5, %v6818_v54 }
 0x518   : > { %4740 = vmatmul.msk.f32.gmra.mxu2 %vm2707_vm5, %v6822_v53 }
 0x51c   : > { %4748 = vmatmul.msk.f32.gmra.mxu3 %vm2707_vm5, %v6822_v53 }
 0x520   : > { %4741 = vmatmul.msk.f32.gmra.mxu2 %vm2707_vm5, %v7990_v46 }
 0x524   : > { %4749 = vmatmul.msk.f32.gmra.mxu3 %vm2707_vm5, %v7990_v46 }
 0x528   : > { %4742 = vmatmul.msk.f32.gmra.mxu2 %vm2707_vm5, %v6832_v45 }
 0x52c   : > { %4750 = vmatmul.msk.f32.gmra.mxu3 %vm2707_vm5, %v6832_v45 }
 0x530   : > { %4743 = vmatmul.msk.f32.gmra.mxu2 %vm2707_vm5, %v6856_v8 }
 0x534   : > { %4751 = vmatmul.msk.f32.gmra.mxu3 %vm2707_vm5, %v6856_v8 }
 0x538   : > { %4744 = vmatmul.msk.f32.gmra.mxu2 %vm2707_vm5, %v6889_v22 }
 0x53c   : > { %4752 = vmatmul.msk.f32.gmra.mxu3 %vm2707_vm5, %v6889_v22 }
 0x53d   : > { %v2896_v56 = vpop.f32.mrf.mxu1 }
 0x53e   : > { %v2897_v21 = vadd.f32 %v2896_v56, %v7019_v31 }
 0x540   : > { %v3002_v29 = vmax.f32 %v2897_v21, 0.0 }
 0x545   : > { %v2899_v18 = vpop.f32.mrf.mxu1 }
 0x546   : > { %v2900_v63 = vadd.f32 %v2899_v18, %v7014_v15 }
 0x548   : > { %v3005_v1 = vmax.f32 %v2900_v63, 0.0 }
 0x54d   : > { %v2902_v39 = vpop.f32.mrf.mxu1 }
 0x54e   : > { %v2903_v20 = vadd.f32 %v2902_v39, %v7005_v2 }
 0x550   : > { %v3008_v17 = vmax.f32 %v2903_v20, 0.0 }
 0x555   : > { %v2905_v47 = vpop.f32.mrf.mxu1 }
 0x556   : > { %v2906_v0 = vadd.f32 %v2905_v47, %v6998_v3 }
 0x558   : > { %v3011_v50 = vmax.f32 %v2906_v0, 0.0 }
 0x55d   : > { %v2908_v4 = vpop.f32.mrf.mxu1 }
 0x55e   : > { %v2909_v35 = vadd.f32 %v2908_v4, %v6991_v58 }
 0x560   : > { %v3014_v37 = vmax.f32 %v2909_v35, 0.0 }
 0x565   : > { %v2911_v61 = vpop.f32.mrf.mxu1 }
 0x566   : > { %v2912_v19 = vadd.f32 %v2911_v61, %v6985_v36 }
 0x568   : > { %v3017_v9 = vmax.f32 %v2912_v19, 0.0 }
 0x56d   : > { %v2914_v12 = vpop.f32.mrf.mxu1 }
 0x56e   : > { %v2915_v23 = vadd.f32 %v2914_v12, %v6977_v49 }
 0x570   : > { %v3020_v38 = vmax.f32 %v2915_v23, 0.0 }
 0x575   : > { %v2917_v62 = vpop.f32.mrf.mxu1 }
 0x576   : > { %v2918_v52 = vadd.f32 %v2917_v62, %v6981_v14 }
 0x578   : > { %v3023_v7 = vmax.f32 %v2918_v52, 0.0 }
 0x57a   : > { %3034 = vmatpush.msrb.mxu0 %v3023_v7 }
 0x57c   : > { %3035 = vmatpush.msrb.mxu0 %v3020_v38 }
 0x57e   : > { %3036 = vmatpush.msrb.mxu0 %v3017_v9 }
 0x580   : > { %3037 = vmatpush.msrb.mxu0 %v3014_v37 }
 0x582   : > { %3038 = vmatpush.msrb.mxu0 %v3011_v50 }
 0x583   : > { %v2937_v24 = vpop.f32.mrf.mxu2 }
 0x584   : > { %3039 = vmatpush.msrb.mxu0 %v3008_v17 }
 0x586   : > { %3040 = vmatpush.msrb.mxu0 %v3005_v1 }
 0x587   : > { %v7166_v33 = vpop.f32.mrf.mxu3 }
 0x588   : > { %3041 = vmatpush.msrb.mxu0 %v3002_v29 }
 0x589   : > { %4753 = vmatmul.msk.f32.vlgmr.msrb.gmra.mxu0 %vm2707_vm5, %v6802_v32 }
 0x58b   : > { %v2940_v10 = vpop.f32.mrf.mxu2 }
 0x58f   : > { %v2981_v26 = vpop.f32.mrf.mxu3 }
 0x591   : > { %4754 = vmatmul.msk.f32.gmra.mxu0 %vm2707_vm5, %v6810_v30 }
 0x593   : > { %v2943_v11 = vpop.f32.mrf.mxu2 }
 0x594   : > { %v2944_v21 = vadd.f32 %v2943_v11, %v7081_v60 }
 0x597   : > { %v2984_v44 = vpop.f32.mrf.mxu3 }
 0x598   : > { %v2985_v11 = vadd.f32 %v2984_v44, %v7106_v6 }
 0x599   : > { %4755 = vmatmul.msk.f32.gmra.mxu0 %vm2707_vm5, %v6818_v54 }
 0x59b   : > { %v2946_v34 = vpop.f32.mrf.mxu2 }
 0x59c   : > { %v2947_v20 = vadd.f32 %v2946_v34, %v7070_v59 }
 0x59f   : > { %v2987_v16 = vpop.f32.mrf.mxu3 }
 0x5a1   : > { %4756 = vmatmul.msk.f32.gmra.mxu0 %vm2707_vm5, %v6822_v53 }
 0x5a3   : > { %v2949_v56 = vpop.f32.mrf.mxu2 }
 0x5a4   : > { %v2950_v7 = vadd.f32 %v2949_v56, %v7055_v25  ;;  %v2941_v56 = vadd.f32 %v2940_v10, %v7091_v57 }
 0x5a6   : > { %v3015_v17 = vmax.f32 %v2950_v7, 0.0 }
 0x5a7   : > { %v2990_v18 = vpop.f32.mrf.mxu3 }
 0x5a8   : > { %v2991_v1 = vadd.f32 %v2990_v18, %v7086_v48  ;;  %v2982_v18 = vadd.f32 %v2981_v26, %v7115_v27 }
 0x5a9   : > { %4757 = vmatmul.msk.f32.gmra.mxu0 %vm2707_vm5, %v7990_v46 }
 0x5ab   : > { %v2952_v39 = vpop.f32.mrf.mxu2 }
 0x5ac   : > { %v2953_v52 = vadd.f32 %v2952_v39, %v7049_v43  ;;  %v3012_v39 = vmax.f32 %v2947_v20, 0.0 }
 0x5ae   : > { %v3018_v37 = vmax.f32 %v2953_v52, 0.0  ;;  %v3010_v52 = vmax.f32 %v2985_v11, 0.0 }
 0x5af   : > { %v2993_v47 = vpop.f32.mrf.mxu3 }
 0x5b0   : > { %v2994_v63 = vadd.f32 %v2993_v47, %v7075_v13  ;;  %v3009_v47 = vmax.f32 %v2944_v21, 0.0 }
 0x5b1   : > { %4758 = vmatmul.msk.f32.gmra.mxu0 %vm2707_vm5, %v6832_v45 }
 0x5b2   : > { %v3019_v34 = vmax.f32 %v2994_v63, 0.0 }
 0x5b3   : > { %v2955_v4 = vpop.f32.mrf.mxu2 }
 0x5b4   : > { %v2956_v62 = vadd.f32 %v2955_v4, %v7041_v41  ;;  %v2988_v4 = vadd.f32 %v2987_v16, %v7096_v55  ;;  %v2979_v16 = vadd.f32 %v7166_v33, %v7120_v40 }
 0x5b6   : > { %v3021_v35 = vmax.f32 %v2956_v62, 0.0  ;;  %v3006_v62 = vmax.f32 %v2941_v56, 0.0  ;;  %v3004_v44 = vmax.f32 %v2979_v16, 0.0 }
 0x5b7   : > { %v2996_v61 = vpop.f32.mrf.mxu3 }
 0x5b8   : > { %v2997_v0 = vadd.f32 %v2996_v61, %v7060_v42  ;;  %v2938_v61 = vadd.f32 %v2937_v24, %v7101_v28  ;;  %v3007_v24 = vmax.f32 %v2982_v18, 0.0 }
 0x5b9   : > { %4759 = vmatmul.msk.f32.gmra.mxu0 %vm2707_vm5, %v6856_v8 }
 0x5ba   : > { %v3022_v29 = vmax.f32 %v2997_v0, 0.0  ;;  %v3003_v10 = vmax.f32 %v2938_v61, 0.0 }
 0x5bb   : > { %v2958_v12 = vpop.f32.mrf.mxu2 }
 0x5bc   : > { %v2959_v23 = vadd.f32 %v2958_v12, %v7045_v5  ;;  %v3016_v12 = vmax.f32 %v2991_v1, 0.0 }
 0x5be   : > { %v3024_v19 = vmax.f32 %v2959_v23, 0.0  ;;  %v3013_v23 = vmax.f32 %v2988_v4, 0.0 }
 0x5bf   : > { %v2999_v38 = vpop.f32.mrf.mxu3 }
 0x5c0   : > { %3075 = vmatpush.msra.mxu1 %v3024_v19  ;;  %v3000_v9 = vadd.f32 %v2999_v38, %v7064_v51 }
 0x5c1   : > { %4760 = vmatmul.msk.f32.gmra.mxu0 %vm2707_vm5, %v6889_v22 }
 0x5c2   : > { %3076 = vmatpush.msra.mxu1 %v3021_v35  ;;  %v3025_v50 = vmax.f32 %v3000_v9, 0.0 }
 0x5c4   : > { %3077 = vmatpush.msra.mxu1 %v3018_v37  ;;  %3116 = vmatpush.msra.mxu2 %v3025_v50 }
 0x5c6   : > { %3078 = vmatpush.msra.mxu1 %v3015_v17  ;;  %3117 = vmatpush.msra.mxu2 %v3022_v29 }
 0x5c8   : > { %3079 = vmatpush.msra.mxu1 %v3012_v39  ;;  %3118 = vmatpush.msra.mxu2 %v3019_v34 }
 0x5ca   : > { %3080 = vmatpush.msra.mxu1 %v3009_v47  ;;  %3119 = vmatpush.msra.mxu2 %v3016_v12 }
 0x5cc   : > { %3081 = vmatpush.msra.mxu1 %v3006_v62  ;;  %3120 = vmatpush.msra.mxu2 %v3013_v23 }
 0x5ce   : > { %3082 = vmatpush.msra.mxu1 %v3003_v10  ;;  %3121 = vmatpush.msra.mxu2 %v3010_v52 }
 0x5cf   : > { %4761 = vmatmul.msk.f32.vlgmr.msra.gmra.mxu1 %vm2707_vm5, %v6802_v32 }
 0x5d0   : > { %3122 = vmatpush.msra.mxu2 %v3007_v24 }
 0x5d2   : > { %3123 = vmatpush.msra.mxu2 %v3004_v44 }
 0x5d3   : > { %4769 = vmatmul.msk.f32.vlgmr.msra.gmra.mxu2 %vm2707_vm5, %v6802_v32 }
 0x5d7   : > { %4762 = vmatmul.msk.f32.gmra.mxu1 %vm2707_vm5, %v6810_v30 }
 0x5db   : > { %4770 = vmatmul.msk.f32.gmra.mxu2 %vm2707_vm5, %v6810_v30 }
 0x5df   : > { %4763 = vmatmul.msk.f32.gmra.mxu1 %vm2707_vm5, %v6818_v54 }
 0x5e3   : > { %4771 = vmatmul.msk.f32.gmra.mxu2 %vm2707_vm5, %v6818_v54 }
 0x5e7   : > { %4764 = vmatmul.msk.f32.gmra.mxu1 %vm2707_vm5, %v6822_v53 }
 0x5eb   : > { %4772 = vmatmul.msk.f32.gmra.mxu2 %vm2707_vm5, %v6822_v53 }
 0x5ef   : > { %4765 = vmatmul.msk.f32.gmra.mxu1 %vm2707_vm5, %v7990_v46 }
 0x5f3   : > { %4773 = vmatmul.msk.f32.gmra.mxu2 %vm2707_vm5, %v7990_v46 }
 0x5f7   : > { %4766 = vmatmul.msk.f32.gmra.mxu1 %vm2707_vm5, %v6832_v45 }
 0x5fb   : > { %4774 = vmatmul.msk.f32.gmra.mxu2 %vm2707_vm5, %v6832_v45 }
 0x5ff   : > { %4767 = vmatmul.msk.f32.gmra.mxu1 %vm2707_vm5, %v6856_v8 }
 0x603   : > { %4775 = vmatmul.msk.f32.gmra.mxu2 %vm2707_vm5, %v6856_v8 }
 0x606   : > { %v3043_v33 = vpop.f32.mrf.mxu0 }
 0x607   : > { %4768 = vmatmul.msk.f32.gmra.mxu1 %vm2707_vm5, %v6889_v22  ;;  %v3044_v61 = vadd.f32 %v3043_v33, %v7019_v31 }
 0x609   : > { %v3149_v62 = vmax.f32 %v3044_v61, 0.0 }
 0x60b   : > { %4776 = vmatmul.msk.f32.gmra.mxu2 %vm2707_vm5, %v6889_v22 }
 0x60e   : > { %v3046_v26 = vpop.f32.mrf.mxu0 }
 0x60f   : > { %v3047_v4 = vadd.f32 %v3046_v26, %v7014_v15 }
 0x611   : > { %v3152_v12 = vmax.f32 %v3047_v4, 0.0 }
 0x616   : > { %v3049_v19 = vpop.f32.mrf.mxu0 }
 0x617   : > { %v3050_v56 = vadd.f32 %v3049_v19, %v7005_v2 }
 0x619   : > { %v3155_v47 = vmax.f32 %v3050_v56, 0.0 }
 0x61e   : > { %v3052_v7 = vpop.f32.mrf.mxu0 }
 0x61f   : > { %v3053_v1 = vadd.f32 %v3052_v7, %v6998_v3 }
 0x621   : > { %v3158_v34 = vmax.f32 %v3053_v1, 0.0 }
 0x626   : > { %v3055_v35 = vpop.f32.mrf.mxu0 }
 0x627   : > { %v3056_v21 = vadd.f32 %v3055_v35, %v6991_v58 }
 0x629   : > { %v3161_v39 = vmax.f32 %v3056_v21, 0.0 }
 0x62e   : > { %v3058_v38 = vpop.f32.mrf.mxu0 }
 0x62f   : > { %v3059_v63 = vadd.f32 %v3058_v38, %v6985_v36 }
 0x631   : > { %v3164_v29 = vmax.f32 %v3059_v63, 0.0 }
 0x636   : > { %v3061_v0 = vpop.f32.mrf.mxu0 }
 0x637   : > { %v3062_v20 = vadd.f32 %v3061_v0, %v6977_v49 }
 0x639   : > { %v3167_v17 = vmax.f32 %v3062_v20, 0.0 }
 0x63e   : > { %v3064_v9 = vpop.f32.mrf.mxu0 }
 0x63f   : > { %v3065_v37 = vadd.f32 %v3064_v9, %v6981_v14 }
 0x641   : > { %v3170_v50 = vmax.f32 %v3065_v37, 0.0 }
 0x643   : > { %3181 = vmatpush.msra.mxu3 %v3170_v50 }
 0x645   : > { %3182 = vmatpush.msra.mxu3 %v3167_v17 }
 0x647   : > { %3183 = vmatpush.msra.mxu3 %v3164_v29 }
 0x649   : > { %3184 = vmatpush.msra.mxu3 %v3161_v39 }
 0x64b   : > { %3185 = vmatpush.msra.mxu3 %v3158_v34 }
 0x64c   : > { %v3084_v11 = vpop.f32.mrf.mxu1 }
 0x64d   : > { %3186 = vmatpush.msra.mxu3 %v3155_v47 }
 0x64f   : > { %3187 = vmatpush.msra.mxu3 %v3152_v12  ;;  %v3085_v12 = vadd.f32 %v3084_v11, %v7101_v28 }
 0x651   : > { %3188 = vmatpush.msra.mxu3 %v3149_v62 }
 0x652   : > { %4777 = vmatmul.msk.f32.vlgmr.msra.gmra.mxu3 %vm2707_vm5, %v6802_v32 }
 0x654   : > { %v3087_v18 = vpop.f32.mrf.mxu1 }
 0x655   : > { %v3088_v39 = vadd.f32 %v3087_v18, %v7091_v57  ;;  %v3150_v18 = vmax.f32 %v3085_v12, 0.0 }
 0x656   : > { %v3125_v23 = vpop.f32.mrf.mxu2 }
 0x65a   : > { %4778 = vmatmul.msk.f32.gmra.mxu3 %vm2707_vm5, %v6810_v30 }
 0x65c   : > { %v3090_v10 = vpop.f32.mrf.mxu1 }
 0x65d   : > { %v3091_v29 = vadd.f32 %v3090_v10, %v7081_v60 }
 0x65e   : > { %v3128_v16 = vpop.f32.mrf.mxu2 }
 0x65f   : > { %v3156_v62 = vmax.f32 %v3091_v29, 0.0 }
 0x662   : > { %4779 = vmatmul.msk.f32.gmra.mxu3 %vm2707_vm5, %v6818_v54 }
 0x664   : > { %v3093_v52 = vpop.f32.mrf.mxu1 }
 0x665   : > { %v3094_v17 = vadd.f32 %v3093_v52, %v7070_v59 }
 0x666   : > { %v3131_v24 = vpop.f32.mrf.mxu2 }
 0x667   : > { %v3159_v4 = vmax.f32 %v3094_v17, 0.0  ;;  %v3132_v11 = vadd.f32 %v3131_v24, %v7106_v6  ;;  %v7277_v24 = vld [vmem:[#allocation5 + $0x188] sm:$0xff] }
 0x66a   : > { %4780 = vmatmul.msk.f32.gmra.mxu3 %vm2707_vm5, %v6822_v53 }
 0x66c   : > { %v3096_v44 = vpop.f32.mrf.mxu1 }
 0x66d   : > { %v3097_v50 = vadd.f32 %v3096_v44, %v7055_v25 }
 0x66e   : > { %v3134_v33 = vpop.f32.mrf.mxu2 }
 0x66f   : > { %v3162_v56 = vmax.f32 %v3097_v50, 0.0 }
 0x672   : > { %4781 = vmatmul.msk.f32.gmra.mxu3 %vm2707_vm5, %v7990_v46 }
 0x674   : > { %v3099_v26 = vpop.f32.mrf.mxu1 }
 0x675   : > { %v3100_v20 = vadd.f32 %v3099_v26, %v7049_v43  ;;  %v3153_v26 = vmax.f32 %v3088_v39, 0.0 }
 0x676   : > { %v3137_v19 = vpop.f32.mrf.mxu2 }
 0x677   : > { %v3165_v1 = vmax.f32 %v3100_v20, 0.0  ;;  %v3138_v10 = vadd.f32 %v3137_v19, %v7086_v48  ;;  %v3126_v19 = vadd.f32 %v3125_v23, %v7120_v40 }
 0x67a   : > { %4782 = vmatmul.msk.f32.gmra.mxu3 %vm2707_vm5, %v6832_v45 }
 0x67c   : > { %v3102_v7 = vpop.f32.mrf.mxu1 }
 0x67d   : > { %v3103_v0 = vadd.f32 %v3102_v7, %v7041_v41 }
 0x67e   : > { %v3140_v35 = vpop.f32.mrf.mxu2 }
 0x67f   : > { %v3168_v21 = vmax.f32 %v3103_v0, 0.0  ;;  %v3141_v52 = vadd.f32 %v3140_v35, %v7075_v13  ;;  %v3129_v35 = vadd.f32 %v3128_v16, %v7115_v27 }
 0x681   : > { %v3166_v0 = vmax.f32 %v3141_v52, 0.0 }
 0x682   : > { %4783 = vmatmul.msk.f32.gmra.mxu3 %vm2707_vm5, %v6856_v8 }
 0x684   : > { %v3105_v38 = vpop.f32.mrf.mxu1 }
 0x685   : > { %v3106_v9 = vadd.f32 %v3105_v38, %v7045_v5  ;;  %v3135_v38 = vadd.f32 %v3134_v33, %v7096_v55  ;;  %v3151_v33 = vmax.f32 %v3126_v19, 0.0  ;;  %v7331_v19 = vld [vmem:[#allocation5 + $0x1a0] sm:$0xff] }
 0x686   : > { %v3143_v63 = vpop.f32.mrf.mxu2 }
 0x687   : > { %v3171_v37 = vmax.f32 %v3106_v9, 0.0  ;;  %v3144_v61 = vadd.f32 %v3143_v63, %v7060_v42  ;;  %v3163_v9 = vmax.f32 %v3138_v10, 0.0  ;;  %v3160_v20 = vmax.f32 %v3135_v38, 0.0  ;;  %v7323_v38 = vld [vmem:[#allocation5 + $0x190] sm:$0xff] }
 0x688   : > { %v3154_v63 = vmax.f32 %v3129_v35, 0.0 }
 0x689   : > { %3222 = vmatpush.msra.mxu0 %v3171_v37  ;;  %v3169_v7 = vmax.f32 %v3144_v61, 0.0  ;;  %v3157_v37 = vmax.f32 %v3132_v11, 0.0 }
 0x68a   : > { %4784 = vmatmul.msk.f32.gmra.mxu3 %vm2707_vm5, %v6889_v22 }
 0x68b   : > { %3223 = vmatpush.msra.mxu0 %v3168_v21 }
 0x68d   : > { %3224 = vmatpush.msra.mxu0 %v3165_v1 }
 0x68e   : > { %v3146_v34 = vpop.f32.mrf.mxu2 }
 0x68f   : > { %3225 = vmatpush.msra.mxu0 %v3162_v56  ;;  %v3147_v47 = vadd.f32 %v3146_v34, %v7064_v51 }
 0x691   : > { %3226 = vmatpush.msra.mxu0 %v3159_v4  ;;  %v3172_v44 = vmax.f32 %v3147_v47, 0.0 }
 0x693   : > { %3227 = vmatpush.msra.mxu0 %v3156_v62  ;;  %3263 = vmatpush.msrb.mxu1 %v3172_v44 }
 0x695   : > { %3228 = vmatpush.msra.mxu0 %v3153_v26  ;;  %3264 = vmatpush.msrb.mxu1 %v3169_v7 }
 0x697   : > { %3229 = vmatpush.msra.mxu0 %v3150_v18  ;;  %3265 = vmatpush.msrb.mxu1 %v3166_v0 }
 0x698   : > { %4785 = vmatmul.msk.f32.vlgmr.msra.gmra.mxu0 %vm2707_vm5, %v6802_v32 }
 0x699   : > { %3266 = vmatpush.msrb.mxu1 %v3163_v9  ;;  %v7327_v9 = vld [vmem:[#allocation5 + $0x198] sm:$0xff] }
 0x69b   : > { %3267 = vmatpush.msrb.mxu1 %v3160_v20 }
 0x69d   : > { %3268 = vmatpush.msrb.mxu1 %v3157_v37 }
 0x69f   : > { %3269 = vmatpush.msrb.mxu1 %v3154_v63 }
 0x6a0   : > { %4786 = vmatmul.msk.f32.gmra.mxu0 %vm2707_vm5, %v6810_v30 }
 0x6a1   : > { %3270 = vmatpush.msrb.mxu1 %v3151_v33  ;;  %v7335_v33 = vld [vmem:[#allocation5 + $0x1a8] sm:$0xff] }
 0x6a2   : > { %4793 = vmatmul.msk.f32.vlgmr.msrb.gmra.mxu1 %vm2707_vm5, %v7277_v24 }
 0x6a8   : > { %4787 = vmatmul.msk.f32.gmra.mxu0 %vm2707_vm5, %v6818_v54 }
 0x6aa   : > { %4794 = vmatmul.msk.f32.gmra.mxu1 %vm2707_vm5, %v6810_v30 }
 0x6b0   : > { %4788 = vmatmul.msk.f32.gmra.mxu0 %vm2707_vm5, %v6822_v53 }
 0x6b2   : > { %4795 = vmatmul.msk.f32.gmra.mxu1 %vm2707_vm5, %v6818_v54 }
 0x6b8   : > { %4789 = vmatmul.msk.f32.gmra.mxu0 %vm2707_vm5, %v7990_v46 }
 0x6ba   : > { %4796 = vmatmul.msk.f32.gmra.mxu1 %vm2707_vm5, %v6822_v53 }
 0x6c0   : > { %4790 = vmatmul.msk.f32.gmra.mxu0 %vm2707_vm5, %v6832_v45 }
 0x6c2   : > { %4797 = vmatmul.msk.f32.gmra.mxu1 %vm2707_vm5, %v7990_v46 }
 0x6c8   : > { %4791 = vmatmul.msk.f32.gmra.mxu0 %vm2707_vm5, %v6856_v8 }
 0x6ca   : > { %4798 = vmatmul.msk.f32.gmra.mxu1 %vm2707_vm5, %v6832_v45 }
 0x6d0   : > { %4792 = vmatmul.msk.f32.gmra.mxu0 %vm2707_vm5, %v6889_v22 }
 0x6d2   : > { %4799 = vmatmul.msk.f32.gmra.mxu1 %vm2707_vm5, %v6856_v8 }
 0x6d5   : > { %v3190_v32 = vpop.f32.mrf.mxu3 }
 0x6d6   : > { %v3191_v12 = vadd.f32 %v3190_v32, %v7019_v31 }
 0x6d8   : > { %v3296_v26 = vmax.f32 %v3191_v12, 0.0 }
 0x6da   : > { %4800 = vmatmul.msk.f32.gmra.mxu1 %vm2707_vm5, %v6889_v22 }
 0x6dd   : > { %v3193_v30 = vpop.f32.mrf.mxu3 }
 0x6de   : > { %v3194_v61 = vadd.f32 %v3193_v30, %v7014_v15 }
 0x6e0   : > { %v3299_v52 = vmax.f32 %v3194_v61, 0.0 }
 0x6e5   : > { %v3196_v54 = vpop.f32.mrf.mxu3 }
 0x6e6   : > { %v3197_v4 = vadd.f32 %v3196_v54, %v7005_v2  ;;  %v7339_v54 = vld [vmem:[#allocation5 + $0x1b0] sm:$0xff] }
 0x6e8   : > { %v3302_v62 = vmax.f32 %v3197_v4, 0.0 }
 0x6ed   : > { %v3199_v53 = vpop.f32.mrf.mxu3 }
 0x6ee   : > { %v3200_v22 = vadd.f32 %v3199_v53, %v6998_v3 }
 0x6f0   : > { %v3305_v47 = vmax.f32 %v3200_v22, 0.0 }
 0x6f5   : > { %v3202_v46 = vpop.f32.mrf.mxu3 }
 0x6f6   : > { %v3203_v8 = vadd.f32 %v3202_v46, %v6991_v58 }
 0x6f8   : > { %v3308_v34 = vmax.f32 %v3203_v8, 0.0 }
 0x6fd   : > { %v3205_v23 = vpop.f32.mrf.mxu3 }
 0x6fe   : > { %v3206_v17 = vadd.f32 %v3205_v23, %v6985_v36 }
 0x700   : > { %v3311_v56 = vmax.f32 %v3206_v17, 0.0 }
 0x705   : > { %v3208_v16 = vpop.f32.mrf.mxu3 }
 0x706   : > { %v3209_v21 = vadd.f32 %v3208_v16, %v6977_v49 }
 0x708   : > { %v3314_v29 = vmax.f32 %v3209_v21, 0.0 }
 0x70d   : > { %v3211_v50 = vpop.f32.mrf.mxu3 }
 0x70e   : > { %v3212_v45 = vadd.f32 %v3211_v50, %v6981_v14 }
 0x710   : > { %v3317_v1 = vmax.f32 %v3212_v45, 0.0  ;;  %v7346_v45 = vld [vmem:[#allocation5 + $0x1b8] sm:$0xff] }
 0x712   : > { %3328 = vmatpush.msrb.mxu2 %v3317_v1 }
 0x714   : > { %3329 = vmatpush.msrb.mxu2 %v3314_v29 }
 0x715   : > { %v7312_v39 = vpop.f32.mrf.mxu0 }
 0x716   : > { %3330 = vmatpush.msrb.mxu2 %v3311_v56 }
 0x718   : > { %3331 = vmatpush.msrb.mxu2 %v3308_v34 }
 0x71a   : > { %3332 = vmatpush.msrb.mxu2 %v3305_v47 }
 0x71c   : > { %3333 = vmatpush.msrb.mxu2 %v3302_v62  ;;  %v7356_v62 = vld [vmem:[#allocation5 + $0x1c0] sm:$0xff] }
 0x71d   : > { %v3234_v44 = vpop.f32.mrf.mxu0 }
 0x71e   : > { %3334 = vmatpush.msrb.mxu2 %v3299_v52  ;;  %v3235_v4 = vadd.f32 %v3234_v44, %v7091_v57  ;;  %v3232_v52 = vadd.f32 %v7312_v39, %v7101_v28 }
 0x71f   : > { %v7317_v10 = vpop.f32.mrf.mxu1 }
 0x720   : > { %3335 = vmatpush.msrb.mxu2 %v3296_v26 }
 0x721   : > { %4801 = vmatmul.msk.f32.vlgmr.msrb.gmra.mxu2 %vm2707_vm5, %v7277_v24 }
 0x725   : > { %v3237_v7 = vpop.f32.mrf.mxu0 }
 0x726   : > { %v3238_v22 = vadd.f32 %v3237_v7, %v7081_v60 }
 0x727   : > { %v7321_v18 = vpop.f32.mrf.mxu1 }
 0x728   : > { %v3303_v26 = vmax.f32 %v3238_v22, 0.0 }
 0x729   : > { %4802 = vmatmul.msk.f32.gmra.mxu2 %vm2707_vm5, %v7323_v38 }
 0x72d   : > { %v3240_v0 = vpop.f32.mrf.mxu0 }
 0x72e   : > { %v3241_v8 = vadd.f32 %v3240_v0, %v7070_v59  ;;  %v3300_v0 = vmax.f32 %v3235_v4, 0.0 }
 0x72f   : > { %v3278_v11 = vpop.f32.mrf.mxu1 }
 0x730   : > { %v3306_v34 = vmax.f32 %v3241_v8, 0.0  ;;  %v3279_v39 = vadd.f32 %v3278_v11, %v7106_v6 }
 0x731   : > { %4803 = vmatmul.msk.f32.gmra.mxu2 %vm2707_vm5, %v7327_v9 }
 0x735   : > { %v3243_v35 = vpop.f32.mrf.mxu0 }
 0x736   : > { %v3244_v17 = vadd.f32 %v3243_v35, %v7055_v25 }
 0x737   : > { %v3281_v20 = vpop.f32.mrf.mxu1 }
 0x738   : > { %v3309_v56 = vmax.f32 %v3244_v17, 0.0 }
 0x739   : > { %4804 = vmatmul.msk.f32.gmra.mxu2 %vm2707_vm5, %v7331_v19 }
 0x73d   : > { %v3246_v37 = vpop.f32.mrf.mxu0 }
 0x73e   : > { %v3247_v16 = vadd.f32 %v3246_v37, %v7049_v43 }
 0x73f   : > { %v3284_v63 = vpop.f32.mrf.mxu1 }
 0x740   : > { %v3312_v29 = vmax.f32 %v3247_v16, 0.0  ;;  %v3285_v35 = vadd.f32 %v3284_v63, %v7086_v48  ;;  %v3273_v16 = vadd.f32 %v7317_v10, %v7120_v40 }
 0x741   : > { %4805 = vmatmul.msk.f32.gmra.mxu2 %vm2707_vm5, %v7335_v33 }
 0x745   : > { %v3249_v32 = vpop.f32.mrf.mxu0 }
 0x746   : > { %v3250_v46 = vadd.f32 %v3249_v32, %v7041_v41  ;;  %v3297_v32 = vmax.f32 %v3232_v52, 0.0 }
 0x747   : > { %v3287_v30 = vpop.f32.mrf.mxu1 }
 0x748   : > { %v3315_v1 = vmax.f32 %v3250_v46, 0.0  ;;  %v3288_v7 = vadd.f32 %v3287_v30, %v7075_v13  ;;  %v3276_v30 = vadd.f32 %v7321_v18, %v7115_v27 }
 0x749   : > { %4806 = vmatmul.msk.f32.gmra.mxu2 %vm2707_vm5, %v7339_v54 }
 0x74a   : > { %v3313_v46 = vmax.f32 %v3288_v7, 0.0 }
 0x74d   : > { %v3252_v53 = vpop.f32.mrf.mxu0 }
 0x74e   : > { %v3253_v23 = vadd.f32 %v3252_v53, %v7045_v5  ;;  %v3282_v53 = vadd.f32 %v3281_v20, %v7096_v55  ;;  %v3301_v20 = vmax.f32 %v3276_v30, 0.0 }
 0x74f   : > { %v3290_v21 = vpop.f32.mrf.mxu1 }
 0x750   : > { %v3318_v50 = vmax.f32 %v3253_v23, 0.0  ;;  %v3291_v47 = vadd.f32 %v3290_v21, %v7060_v42  ;;  %v3310_v23 = vmax.f32 %v3285_v35, 0.0  ;;  %v3307_v63 = vmax.f32 %v3282_v53, 0.0 }
 0x751   : > { %4807 = vmatmul.msk.f32.gmra.mxu2 %vm2707_vm5, %v7346_v45  ;;  %v3298_v21 = vmax.f32 %v3273_v16, 0.0 }
 0x752   : > { %3369 = vmatpush.msrb.mxu3 %v3318_v50  ;;  %v3316_v37 = vmax.f32 %v3291_v47, 0.0  ;;  %v3304_v50 = vmax.f32 %v3279_v39, 0.0 }
 0x754   : > { %3370 = vmatpush.msrb.mxu3 %v3315_v1 }
 0x756   : > { %3371 = vmatpush.msrb.mxu3 %v3312_v29 }
 0x757   : > { %v3293_v61 = vpop.f32.mrf.mxu1 }
 0x758   : > { %3372 = vmatpush.msrb.mxu3 %v3309_v56  ;;  %v3294_v12 = vadd.f32 %v3293_v61, %v7064_v51 }
 0x759   : > { %4808 = vmatmul.msk.f32.gmra.mxu2 %vm2707_vm5, %v7356_v62 }
 0x75a   : > { %3373 = vmatpush.msrb.mxu3 %v3306_v34  ;;  %v3319_v44 = vmax.f32 %v3294_v12, 0.0 }
 0x75c   : > { %3374 = vmatpush.msrb.mxu3 %v3303_v26  ;;  %3410 = vmatpush.msrb.mxu0 %v3319_v44 }
 0x75e   : > { %3375 = vmatpush.msrb.mxu3 %v3300_v0  ;;  %3411 = vmatpush.msrb.mxu0 %v3316_v37 }
 0x760   : > { %3376 = vmatpush.msrb.mxu3 %v3297_v32  ;;  %3412 = vmatpush.msrb.mxu0 %v3313_v46 }
 0x761   : > { %4809 = vmatmul.msk.f32.vlgmr.msrb.gmra.mxu3 %vm2707_vm5, %v7277_v24 }
 0x762   : > { %3413 = vmatpush.msrb.mxu0 %v3310_v23 }
 0x764   : > { %3414 = vmatpush.msrb.mxu0 %v3307_v63 }
 0x766   : > { %3415 = vmatpush.msrb.mxu0 %v3304_v50 }
 0x768   : > { %3416 = vmatpush.msrb.mxu0 %v3301_v20 }
 0x769   : > { %4810 = vmatmul.msk.f32.gmra.mxu3 %vm2707_vm5, %v7323_v38 }
 0x76a   : > { %3417 = vmatpush.msrb.mxu0 %v3298_v21 }
 0x76b   : > { %4817 = vmatmul.msk.f32.vlgmr.msrb.gmra.mxu0 %vm2707_vm5, %v7277_v24 }
 0x771   : > { %4811 = vmatmul.msk.f32.gmra.mxu3 %vm2707_vm5, %v7327_v9 }
 0x773   : > { %4818 = vmatmul.msk.f32.gmra.mxu0 %vm2707_vm5, %v7323_v38 }
 0x779   : > { %4812 = vmatmul.msk.f32.gmra.mxu3 %vm2707_vm5, %v7331_v19 }
 0x77b   : > { %4819 = vmatmul.msk.f32.gmra.mxu0 %vm2707_vm5, %v7327_v9 }
 0x781   : > { %4813 = vmatmul.msk.f32.gmra.mxu3 %vm2707_vm5, %v7335_v33 }
 0x783   : > { %4820 = vmatmul.msk.f32.gmra.mxu0 %vm2707_vm5, %v7331_v19 }
 0x789   : > { %4814 = vmatmul.msk.f32.gmra.mxu3 %vm2707_vm5, %v7339_v54 }
 0x78b   : > { %4821 = vmatmul.msk.f32.gmra.mxu0 %vm2707_vm5, %v7335_v33 }
 0x791   : > { %4815 = vmatmul.msk.f32.gmra.mxu3 %vm2707_vm5, %v7346_v45 }
 0x793   : > { %4822 = vmatmul.msk.f32.gmra.mxu0 %vm2707_vm5, %v7339_v54 }
 0x799   : > { %4816 = vmatmul.msk.f32.gmra.mxu3 %vm2707_vm5, %v7356_v62 }
 0x79b   : > { %4823 = vmatmul.msk.f32.gmra.mxu0 %vm2707_vm5, %v7346_v45 }
 0x7a3   : > { %4824 = vmatmul.msk.f32.gmra.mxu0 %vm2707_vm5, %v7356_v62 }
 0x7a4   : > { %v3337_v10 = vpop.f32.mrf.mxu2 }
 0x7a5   : > { %v3338_v32 = vadd.f32 %v3337_v10, %v7019_v31 }
 0x7a7   : > { %v3443_v30 = vmax.f32 %v3338_v32, 0.0 }
 0x7ac   : > { %v3340_v18 = vpop.f32.mrf.mxu2 }
 0x7ad   : > { %v3341_v35 = vadd.f32 %v3340_v18, %v7014_v15 }
 0x7af   : > { %v3446_v39 = vmax.f32 %v3341_v35, 0.0 }
 0x7b4   : > { %v3343_v11 = vpop.f32.mrf.mxu2 }
 0x7b5   : > { %v3344_v44 = vadd.f32 %v3343_v11, %v7005_v2 }
 0x7b7   : > { %v3449_v53 = vmax.f32 %v3344_v44, 0.0 }
 0x7bc   : > { %v3346_v17 = vpop.f32.mrf.mxu2 }
 0x7bd   : > { %v3347_v52 = vadd.f32 %v3346_v17, %v6998_v3 }
 0x7bf   : > { %v3452_v37 = vmax.f32 %v3347_v52, 0.0 }
 0x7c4   : > { %v3349_v1 = vpop.f32.mrf.mxu2 }
 0x7c5   : > { %v3350_v47 = vadd.f32 %v3349_v1, %v6991_v58 }
 0x7c7   : > { %v3455_v0 = vmax.f32 %v3350_v47, 0.0 }
 0x7cc   : > { %v3352_v8 = vpop.f32.mrf.mxu2 }
 0x7cd   : > { %v3353_v34 = vadd.f32 %v3352_v8, %v6985_v36 }
 0x7cf   : > { %v3458_v26 = vmax.f32 %v3353_v34, 0.0 }
 0x7d4   : > { %v3355_v29 = vpop.f32.mrf.mxu2 }
 0x7d5   : > { %v3356_v56 = vadd.f32 %v3355_v29, %v6977_v49 }
 0x7d7   : > { %v3461_v12 = vmax.f32 %v3356_v56, 0.0 }
 0x7dc   : > { %v3358_v22 = vpop.f32.mrf.mxu2 }
 0x7dd   : > { %v3359_v4 = vadd.f32 %v3358_v22, %v6981_v14 }
 0x7df   : > { %v3464_v61 = vmax.f32 %v3359_v4, 0.0 }
 0x7e1   : > { %3475 = vmatpush.msra.mxu1 %v3464_v61 }
 0x7e3   : > { %3476 = vmatpush.msra.mxu1 %v3461_v12 }
 0x7e4   : > { %v7407_v7 = vpop.f32.mrf.mxu3 }
 0x7e5   : > { %3477 = vmatpush.msra.mxu1 %v3458_v26 }
 0x7e7   : > { %3478 = vmatpush.msra.mxu1 %v3455_v0 }
 0x7e8   : > { %v7412_v46 = vpop.f32.mrf.mxu0 }
 0x7e9   : > { %3479 = vmatpush.msra.mxu1 %v3452_v37 }
 0x7eb   : > { %3480 = vmatpush.msra.mxu1 %v3449_v53 }
 0x7ec   : > { %v3381_v23 = vpop.f32.mrf.mxu3 }
 0x7ed   : > { %3481 = vmatpush.msra.mxu1 %v3446_v39 }
 0x7ef   : > { %3482 = vmatpush.msra.mxu1 %v3443_v30 }
 0x7f0   : > { %4825 = vmatmul.msk.f32.vlgmr.msra.gmra.mxu1 %vm2707_vm5, %v7277_v24  ;;  %v3422_v63 = vpop.f32.mrf.mxu0 }
 0x7f4   : > { %v3384_v16 = vpop.f32.mrf.mxu3 }
 0x7f5   : > { %v3385_v32 = vadd.f32 %v3384_v16, %v7081_v60  ;;  %v3379_v16 = vadd.f32 %v7407_v7, %v7101_v28 }
 0x7f8   : > { %4826 = vmatmul.msk.f32.gmra.mxu1 %vm2707_vm5, %v7323_v38  ;;  %v3425_v50 = vpop.f32.mrf.mxu0 }
 0x7fc   : > { %v3387_v20 = vpop.f32.mrf.mxu3 }
 0x7fd   : > { %v3388_v44 = vadd.f32 %v3387_v20, %v7070_v59 }
 0x800   : > { %4827 = vmatmul.msk.f32.gmra.mxu1 %vm2707_vm5, %v7327_v9  ;;  %v3428_v21 = vpop.f32.mrf.mxu0 }
 0x804   : > { %v3390_v10 = vpop.f32.mrf.mxu3 }
 0x805   : > { %v3391_v61 = vadd.f32 %v3390_v10, %v7055_v25  ;;  %v3382_v10 = vadd.f32 %v3381_v23, %v7091_v57  ;;  %v3423_v23 = vadd.f32 %v3422_v63, %v7115_v27 }
 0x807   : > { %v3456_v53 = vmax.f32 %v3391_v61, 0.0  ;;  %v3448_v7 = vmax.f32 %v3423_v23, 0.0 }
 0x808   : > { %4828 = vmatmul.msk.f32.gmra.mxu1 %vm2707_vm5, %v7331_v19  ;;  %v3431_v18 = vpop.f32.mrf.mxu0 }
 0x809   : > { %v3432_v39 = vadd.f32 %v3431_v18, %v7086_v48  ;;  %v3426_v18 = vadd.f32 %v3425_v50, %v7106_v6 }
 0x80c   : > { %v3393_v11 = vpop.f32.mrf.mxu3 }
 0x80d   : > { %v3394_v4 = vadd.f32 %v3393_v11, %v7049_v43  ;;  %v3453_v11 = vmax.f32 %v3388_v44, 0.0 }
 0x80f   : > { %v3459_v0 = vmax.f32 %v3394_v4, 0.0  ;;  %v3451_v4 = vmax.f32 %v3426_v18, 0.0 }
 0x810   : > { %4829 = vmatmul.msk.f32.gmra.mxu1 %vm2707_vm5, %v7335_v33  ;;  %v3434_v17 = vpop.f32.mrf.mxu0 }
 0x811   : > { %v3435_v35 = vadd.f32 %v3434_v17, %v7075_v13  ;;  %v3450_v17 = vmax.f32 %v3385_v32, 0.0 }
 0x813   : > { %v3460_v20 = vmax.f32 %v3435_v35, 0.0 }
 0x814   : > { %v3396_v1 = vpop.f32.mrf.mxu3 }
 0x815   : > { %v3397_v22 = vadd.f32 %v3396_v1, %v7041_v41  ;;  %v3429_v1 = vadd.f32 %v3428_v21, %v7096_v55  ;;  %v3444_v21 = vmax.f32 %v3379_v16, 0.0 }
 0x817   : > { %v3462_v47 = vmax.f32 %v3397_v22, 0.0  ;;  %v3454_v22 = vmax.f32 %v3429_v1, 0.0 }
 0x818   : > { %4830 = vmatmul.msk.f32.gmra.mxu1 %vm2707_vm5, %v7339_v54  ;;  %v3437_v8 = vpop.f32.mrf.mxu0 }
 0x819   : > { %v3438_v52 = vadd.f32 %v3437_v8, %v7060_v42  ;;  %v3457_v8 = vmax.f32 %v3432_v39, 0.0 }
 0x81b   : > { %v3463_v30 = vmax.f32 %v3438_v52, 0.0 }
 0x81c   : > { %v3399_v29 = vpop.f32.mrf.mxu3 }
 0x81d   : > { %v3400_v56 = vadd.f32 %v3399_v29, %v7045_v5  ;;  %v3447_v29 = vmax.f32 %v3382_v10, 0.0 }
 0x81f   : > { %v3465_v34 = vmax.f32 %v3400_v56, 0.0  ;;  %v3420_v56 = vadd.f32 %v7412_v46, %v7120_v40 }
 0x820   : > { %4831 = vmatmul.msk.f32.gmra.mxu1 %vm2707_vm5, %v7346_v45  ;;  %v3440_v12 = vpop.f32.mrf.mxu0 }
 0x821   : > { %3516 = vmatpush.msra.mxu2 %v3465_v34  ;;  %v3441_v26 = vadd.f32 %v3440_v12, %v7064_v51  ;;  %v3445_v50 = vmax.f32 %v3420_v56, 0.0 }
 0x823   : > { %3517 = vmatpush.msra.mxu2 %v3462_v47  ;;  %v3466_v37 = vmax.f32 %v3441_v26, 0.0 }
 0x825   : > { %3518 = vmatpush.msra.mxu2 %v3459_v0  ;;  %3557 = vmatpush.msra.mxu3 %v3466_v37 }
 0x827   : > { %3519 = vmatpush.msra.mxu2 %v3456_v53  ;;  %3558 = vmatpush.msra.mxu3 %v3463_v30 }
 0x828   : > { %4832 = vmatmul.msk.f32.gmra.mxu1 %vm2707_vm5, %v7356_v62 }
 0x829   : > { %3520 = vmatpush.msra.mxu2 %v3453_v11  ;;  %3559 = vmatpush.msra.mxu3 %v3460_v20 }
 0x82b   : > { %3521 = vmatpush.msra.mxu2 %v3450_v17  ;;  %3560 = vmatpush.msra.mxu3 %v3457_v8 }
 0x82d   : > { %3522 = vmatpush.msra.mxu2 %v3447_v29  ;;  %3561 = vmatpush.msra.mxu3 %v3454_v22 }
 0x82f   : > { %3523 = vmatpush.msra.mxu2 %v3444_v21  ;;  %3562 = vmatpush.msra.mxu3 %v3451_v4 }
 0x830   : > { %4833 = vmatmul.msk.f32.vlgmr.msra.gmra.mxu2 %vm2707_vm5, %v7277_v24 }
 0x831   : > { %3563 = vmatpush.msra.mxu3 %v3448_v7 }
 0x833   : > { %3564 = vmatpush.msra.mxu3 %v3445_v50 }
 0x834   : > { %4841 = vmatmul.msk.f32.vlgmr.msra.gmra.mxu3 %vm2707_vm5, %v7277_v24 }
 0x838   : > { %4834 = vmatmul.msk.f32.gmra.mxu2 %vm2707_vm5, %v7323_v38 }
 0x83c   : > { %4842 = vmatmul.msk.f32.gmra.mxu3 %vm2707_vm5, %v7323_v38 }
 0x840   : > { %4835 = vmatmul.msk.f32.gmra.mxu2 %vm2707_vm5, %v7327_v9 }
 0x844   : > { %4843 = vmatmul.msk.f32.gmra.mxu3 %vm2707_vm5, %v7327_v9 }
 0x848   : > { %4836 = vmatmul.msk.f32.gmra.mxu2 %vm2707_vm5, %v7331_v19 }
 0x84c   : > { %4844 = vmatmul.msk.f32.gmra.mxu3 %vm2707_vm5, %v7331_v19 }
 0x850   : > { %4837 = vmatmul.msk.f32.gmra.mxu2 %vm2707_vm5, %v7335_v33 }
 0x854   : > { %4845 = vmatmul.msk.f32.gmra.mxu3 %vm2707_vm5, %v7335_v33 }
 0x858   : > { %4838 = vmatmul.msk.f32.gmra.mxu2 %vm2707_vm5, %v7339_v54 }
 0x85c   : > { %4846 = vmatmul.msk.f32.gmra.mxu3 %vm2707_vm5, %v7339_v54 }
 0x860   : > { %4839 = vmatmul.msk.f32.gmra.mxu2 %vm2707_vm5, %v7346_v45 }
 0x864   : > { %4847 = vmatmul.msk.f32.gmra.mxu3 %vm2707_vm5, %v7346_v45 }
 0x868   : > { %4840 = vmatmul.msk.f32.gmra.mxu2 %vm2707_vm5, %v7356_v62 }
 0x86c   : > { %4848 = vmatmul.msk.f32.gmra.mxu3 %vm2707_vm5, %v7356_v62 }
 0x86d   : > { %v3484_v46 = vpop.f32.mrf.mxu1 }
 0x86e   : > { %v3485_v16 = vadd.f32 %v3484_v46, %v7019_v31 }
 0x870   : > { %v3590_v29 = vmax.f32 %v3485_v16, 0.0 }
 0x875   : > { %v3487_v63 = vpop.f32.mrf.mxu1 }
 0x876   : > { %v3488_v1 = vadd.f32 %v3487_v63, %v7014_v15 }
 0x878   : > { %v3593_v8 = vmax.f32 %v3488_v1, 0.0 }
 0x87d   : > { %v3490_v34 = vpop.f32.mrf.mxu1 }
 0x87e   : > { %v3491_v10 = vadd.f32 %v3490_v34, %v7005_v2 }
 0x880   : > { %v3596_v17 = vmax.f32 %v3491_v10, 0.0 }
 0x885   : > { %v3493_v61 = vpop.f32.mrf.mxu1 }
 0x886   : > { %v3494_v39 = vadd.f32 %v3493_v61, %v6998_v3 }
 0x888   : > { %v3599_v20 = vmax.f32 %v3494_v39, 0.0 }
 0x88d   : > { %v3496_v47 = vpop.f32.mrf.mxu1 }
 0x88e   : > { %v3497_v32 = vadd.f32 %v3496_v47, %v6991_v58 }
 0x890   : > { %v3602_v11 = vmax.f32 %v3497_v32, 0.0 }
 0x895   : > { %v3499_v12 = vpop.f32.mrf.mxu1 }
 0x896   : > { %v3500_v35 = vadd.f32 %v3499_v12, %v6985_v36 }
 0x898   : > { %v3605_v30 = vmax.f32 %v3500_v35, 0.0 }
 0x89d   : > { %v3502_v52 = vpop.f32.mrf.mxu1 }
 0x89e   : > { %v3503_v44 = vadd.f32 %v3502_v52, %v6977_v49 }
 0x8a0   : > { %v3608_v53 = vmax.f32 %v3503_v44, 0.0 }
 0x8a5   : > { %v3505_v26 = vpop.f32.mrf.mxu1 }
 0x8a6   : > { %v3506_v0 = vadd.f32 %v3505_v26, %v6981_v14 }
 0x8a8   : > { %v3611_v37 = vmax.f32 %v3506_v0, 0.0 }
 0x8aa   : > { %3622 = vmatpush.msra.mxu0 %v3611_v37 }
 0x8ac   : > { %3623 = vmatpush.msra.mxu0 %v3608_v53 }
 0x8ae   : > { %3624 = vmatpush.msra.mxu0 %v3605_v30 }
 0x8b0   : > { %3625 = vmatpush.msra.mxu0 %v3602_v11 }
 0x8b2   : > { %3626 = vmatpush.msra.mxu0 %v3599_v20 }
 0x8b3   : > { %v3525_v18 = vpop.f32.mrf.mxu2 }
 0x8b4   : > { %3627 = vmatpush.msra.mxu0 %v3596_v17 }
 0x8b6   : > { %3628 = vmatpush.msra.mxu0 %v3593_v8 }
 0x8b7   : > { %v7488_v23 = vpop.f32.mrf.mxu3 }
 0x8b8   : > { %3629 = vmatpush.msra.mxu0 %v3590_v29 }
 0x8b9   : > { %4849 = vmatmul.msk.f32.vlgmr.msra.gmra.mxu0 %vm2707_vm5, %v7277_v24 }
 0x8bb   : > { %v3528_v22 = vpop.f32.mrf.mxu2 }
 0x8bf   : > { %v3569_v21 = vpop.f32.mrf.mxu3 }
 0x8c1   : > { %4850 = vmatmul.msk.f32.gmra.mxu0 %vm2707_vm5, %v7323_v38 }
 0x8c3   : > { %v3531_v56 = vpop.f32.mrf.mxu2 }
 0x8c4   : > { %v3532_v16 = vadd.f32 %v3531_v56, %v7081_v60 }
 0x8c7   : > { %v3572_v4 = vpop.f32.mrf.mxu3 }
 0x8c8   : > { %v3573_v56 = vadd.f32 %v3572_v4, %v7106_v6 }
 0x8c9   : > { %4851 = vmatmul.msk.f32.gmra.mxu0 %vm2707_vm5, %v7327_v9 }
 0x8cb   : > { %v3534_v7 = vpop.f32.mrf.mxu2 }
 0x8cc   : > { %v3535_v10 = vadd.f32 %v3534_v7, %v7070_v59 }
 0x8cf   : > { %v3575_v50 = vpop.f32.mrf.mxu3 }
 0x8d1   : > { %4852 = vmatmul.msk.f32.gmra.mxu0 %vm2707_vm5, %v7331_v19 }
 0x8d3   : > { %v3537_v46 = vpop.f32.mrf.mxu2 }
 0x8d4   : > { %v3538_v37 = vadd.f32 %v3537_v46, %v7055_v25  ;;  %v3529_v46 = vadd.f32 %v3528_v22, %v7091_v57 }
 0x8d6   : > { %v3603_v17 = vmax.f32 %v3538_v37, 0.0 }
 0x8d7   : > { %v3578_v63 = vpop.f32.mrf.mxu3 }
 0x8d8   : > { %v3579_v8 = vadd.f32 %v3578_v63, %v7086_v48  ;;  %v3570_v63 = vadd.f32 %v3569_v21, %v7115_v27 }
 0x8d9   : > { %4853 = vmatmul.msk.f32.gmra.mxu0 %vm2707_vm5, %v7335_v33 }
 0x8db   : > { %v3540_v34 = vpop.f32.mrf.mxu2 }
 0x8dc   : > { %v3541_v0 = vadd.f32 %v3540_v34, %v7049_v43  ;;  %v3600_v34 = vmax.f32 %v3535_v10, 0.0 }
 0x8de   : > { %v3606_v11 = vmax.f32 %v3541_v0, 0.0  ;;  %v3598_v0 = vmax.f32 %v3573_v56, 0.0 }
 0x8df   : > { %v3581_v61 = vpop.f32.mrf.mxu3 }
 0x8e0   : > { %v3582_v1 = vadd.f32 %v3581_v61, %v7075_v13  ;;  %v3597_v61 = vmax.f32 %v3532_v16, 0.0 }
 0x8e1   : > { %4854 = vmatmul.msk.f32.gmra.mxu0 %vm2707_vm5, %v7339_v54 }
 0x8e2   : > { %v3607_v7 = vmax.f32 %v3582_v1, 0.0 }
 0x8e3   : > { %v3543_v47 = vpop.f32.mrf.mxu2 }
 0x8e4   : > { %v3544_v26 = vadd.f32 %v3543_v47, %v7041_v41  ;;  %v3576_v47 = vadd.f32 %v3575_v50, %v7096_v55  ;;  %v3567_v50 = vadd.f32 %v7488_v23, %v7120_v40 }
 0x8e6   : > { %v3609_v32 = vmax.f32 %v3544_v26, 0.0  ;;  %v3594_v26 = vmax.f32 %v3529_v46, 0.0  ;;  %v3592_v4 = vmax.f32 %v3567_v50, 0.0  ;;  %v3776_v50 = vld [vmem:[#allocation7 + $0x30] sm:$0xff] }
 0x8e7   : > { %v3584_v12 = vpop.f32.mrf.mxu3 }
 0x8e8   : > { %v3585_v39 = vadd.f32 %v3584_v12, %v7060_v42  ;;  %v3526_v12 = vadd.f32 %v3525_v18, %v7101_v28  ;;  %v3595_v18 = vmax.f32 %v3570_v63, 0.0 }
 0x8e9   : > { %4855 = vmatmul.msk.f32.gmra.mxu0 %vm2707_vm5, %v7346_v45 }
 0x8ea   : > { %v3610_v29 = vmax.f32 %v3585_v39, 0.0  ;;  %v3591_v22 = vmax.f32 %v3526_v12, 0.0 }
 0x8eb   : > { %v3546_v52 = vpop.f32.mrf.mxu2 }
 0x8ec   : > { %v3547_v44 = vadd.f32 %v3546_v52, %v7045_v5  ;;  %v3604_v52 = vmax.f32 %v3579_v8, 0.0 }
 0x8ee   : > { %v3612_v35 = vmax.f32 %v3547_v44, 0.0  ;;  %v3601_v44 = vmax.f32 %v3576_v47, 0.0  ;;  %v7583_v47 = vld [vmem:[#allocation5 + $0x1e0] sm:$0xff] }
 0x8ef   : > { %v3587_v53 = vpop.f32.mrf.mxu3 }
 0x8f0   : > { %3663 = vmatpush.msrb.mxu1 %v3612_v35  ;;  %v3588_v30 = vadd.f32 %v3587_v53, %v7064_v51 }
 0x8f1   : > { %4856 = vmatmul.msk.f32.gmra.mxu0 %vm2707_vm5, %v7356_v62 }
 0x8f2   : > { %3664 = vmatpush.msrb.mxu1 %v3609_v32  ;;  %v3613_v20 = vmax.f32 %v3588_v30, 0.0 }
 0x8f4   : > { %3665 = vmatpush.msrb.mxu1 %v3606_v11  ;;  %3704 = vmatpush.msrb.mxu2 %v3613_v20 }
 0x8f6   : > { %3666 = vmatpush.msrb.mxu1 %v3603_v17  ;;  %3705 = vmatpush.msrb.mxu2 %v3610_v29  ;;  %v7571_v17 = vld [vmem:[#allocation5 + $0x1d0] sm:$0xff]  ;;  %v7577_v29 = vld [vmem:[#allocation5 + $0x1d8] sm:$0xff] }
 0x8f8   : > { %3667 = vmatpush.msrb.mxu1 %v3600_v34  ;;  %3706 = vmatpush.msrb.mxu2 %v3607_v7 }
 0x8fa   : > { %3668 = vmatpush.msrb.mxu1 %v3597_v61  ;;  %3707 = vmatpush.msrb.mxu2 %v3604_v52  ;;  %v7589_v61 = vld [vmem:[#allocation5 + $0x1e8] sm:$0xff]  ;;  %v5370_v52 = vmov 5  }
 0x8fb   : > { %5043 = vset.pattern.permute.xlu1 %v5370_v52  ;;  %5042 = vset.pattern.permute.xlu0 %v5370_v52 }
 0x8fc   : > { %3669 = vmatpush.msrb.mxu1 %v3594_v26  ;;  %3708 = vmatpush.msrb.mxu2 %v3601_v44  ;;  %v3775_v26 = vld [vmem:[#allocation7 + $0x28] sm:$0xff]  ;;  %v7595_v44 = vld [vmem:[#allocation5 + $0x1f0] sm:$0xff] }
 0x8fd   : > { %3806 = vperm.xlu1 %5043, %v3775_v26   ;;  %5041 = vset.pattern.permute.xlu2 %v5370_v52 }
 0x8fe   : > { %3670 = vmatpush.msrb.mxu1 %v3591_v22  ;;  %3709 = vmatpush.msrb.mxu2 %v3598_v0  ;;  %v7600_v0 = vld [vmem:[#allocation7 + $0x18] sm:$0xff] }
 0x8ff   : > { %4857 = vmatmul.msk.f32.vlgmr.msrb.gmra.mxu1 %vm2707_vm5, %v7277_v24  ;;  %3811 = vperm.xlu0 %5042, %v3776_v50  }
 0x900   : > { %3710 = vmatpush.msrb.mxu2 %v3595_v18 }
 0x902   : > { %3711 = vmatpush.msrb.mxu2 %v3592_v4  ;;  %v7602_v4 = vld [vmem:[#allocation5 + $0x1f8] sm:$0xff] }
 0x903   : > { %4865 = vmatmul.msk.f32.vlgmr.msrb.gmra.mxu2 %vm2707_vm5, %v7277_v24 }
 0x905   : > { %3796 = vperm.xlu1 %5043, %v7600_v0  }
 0x907   : > { %4858 = vmatmul.msk.f32.gmra.mxu1 %vm2707_vm5, %v7323_v38 }
 0x90b   : > { %4866 = vmatmul.msk.f32.gmra.mxu2 %vm2707_vm5, %v7323_v38 }
 0x90f   : > { %4859 = vmatmul.msk.f32.gmra.mxu1 %vm2707_vm5, %v7327_v9 }
 0x913   : > { %4867 = vmatmul.msk.f32.gmra.mxu2 %vm2707_vm5, %v7327_v9 }
 0x917   : > { %4860 = vmatmul.msk.f32.gmra.mxu1 %vm2707_vm5, %v7331_v19 }
 0x91b   : > { %4868 = vmatmul.msk.f32.gmra.mxu2 %vm2707_vm5, %v7331_v19 }
 0x91f   : > { %4861 = vmatmul.msk.f32.gmra.mxu1 %vm2707_vm5, %v7335_v33 }
 0x923   : > { %4869 = vmatmul.msk.f32.gmra.mxu2 %vm2707_vm5, %v7335_v33 }
 0x927   : > { %4862 = vmatmul.msk.f32.gmra.mxu1 %vm2707_vm5, %v7339_v54 }
 0x92b   : > { %4870 = vmatmul.msk.f32.gmra.mxu2 %vm2707_vm5, %v7339_v54 }
 0x92f   : > { %4863 = vmatmul.msk.f32.gmra.mxu1 %vm2707_vm5, %v7346_v45 }
 0x933   : > { %4871 = vmatmul.msk.f32.gmra.mxu2 %vm2707_vm5, %v7346_v45 }
 0x936   : > { %v3631_v24 = vpop.f32.mrf.mxu0 }
 0x937   : > { %4864 = vmatmul.msk.f32.gmra.mxu1 %vm2707_vm5, %v7356_v62 }
 0x93b   : > { %4872 = vmatmul.msk.f32.gmra.mxu2 %vm2707_vm5, %v7356_v62 }
 0x93e   : > { %v3634_v38 = vpop.f32.mrf.mxu0 }
 0x93f   : > { %v3635_v1 = vadd.f32 %v3634_v38, %v7014_v15 }
 0x946   : > { %v3637_v9 = vpop.f32.mrf.mxu0 }
 0x947   : > { %v3638_v10 = vadd.f32 %v3637_v9, %v7005_v2 }
 0x94e   : > { %v3640_v19 = vpop.f32.mrf.mxu0 }
 0x94f   : > { %v3641_v62 = vadd.f32 %v3640_v19, %v6998_v3  ;;  %v7565_v3 = vld [vmem:[#allocation5 + $0x1c8] sm:$0xff] }
 0x956   : > { %v3643_v33 = vpop.f32.mrf.mxu0 }
 0x957   : > { %v3644_v53 = vadd.f32 %v3643_v33, %v6991_v58  ;;  %v3740_v58 = vmax.f32 %v3635_v1, 0.0  ;;  %v7612_v33 = vld [vmem:[#allocation7] sm:$0xff] }
 0x958   : > { %3781 = vperm.xlu1 %5043, %v7612_v33  }
 0x959   : > { %v3749_v11 = vmax.f32 %v3644_v53, 0.0 }
 0x95e   : > { %v3646_v23 = vpop.f32.mrf.mxu0 }
 0x95f   : > { %v3647_v45 = vadd.f32 %v3646_v23, %v6985_v36  ;;  %v3743_v36 = vmax.f32 %v3638_v10, 0.0 }
 0x961   : > { %v3752_v30 = vmax.f32 %v3647_v45, 0.0 }
 0x966   : > { %v3649_v21 = vpop.f32.mrf.mxu0 }
 0x967   : > { %v3650_v35 = vadd.f32 %v3649_v21, %v6977_v49  ;;  %v3746_v49 = vmax.f32 %v3641_v62, 0.0 }
 0x969   : > { %v3755_v39 = vmax.f32 %v3650_v35, 0.0  ;;  %v7615_v35 = vld [vmem:[#allocation5 + $0x200] sm:$0xff] }
 0x96e   : > { %v3652_v54 = vpop.f32.mrf.mxu0 }
 0x96f   : > { %v3653_v37 = vadd.f32 %v3652_v54, %v6981_v14  ;;  %v3632_v14 = vadd.f32 %v3631_v24, %v7019_v31  ;;  %v7607_v24 = vld [vmem:[#allocation7 + $0x8] sm:$0xff] }
 0x970   : > { %3786 = vperm.xlu0 %5042, %v7607_v24  }
 0x971   : > { %v3758_v32 = vmax.f32 %v3653_v37, 0.0  ;;  %v3737_v16 = vmax.f32 %v3632_v14, 0.0  ;;  %v3774_v14 = vld [vmem:[#allocation7 + $0x20] sm:$0xff] }
 0x973   : > { %3859 = vmatpush.msrb.mxu3 %v3758_v32  ;;  %v3777_v32 = vld [vmem:[#allocation7 + $0x38] sm:$0xff] }
 0x974   : > { %3816 = vperm.xlu2 %5041, %v3777_v32  }
 0x975   : > { %3860 = vmatpush.msrb.mxu3 %v3755_v39 }
 0x977   : > { %3861 = vmatpush.msrb.mxu3 %v3752_v30 }
 0x979   : > { %3862 = vmatpush.msrb.mxu3 %v3749_v11 }
 0x97b   : > { %3863 = vmatpush.msrb.mxu3 %v3746_v49 }
 0x97c   : > { %v7563_v20 = vpop.f32.mrf.mxu1  ;;  %3801 = vperm.xlu2 %5041, %v3774_v14   ;;  %v5194_v14 = vld [vmem:[%s5495_s4 + $0x40] sm:$0xff] }
 0x97d   : > { %3864 = vmatpush.msrb.mxu3 %v3743_v36 }
 0x97f   : > { %3865 = vmatpush.msrb.mxu3 %v3740_v58 }
 0x981   : > { %3866 = vmatpush.msrb.mxu3 %v3737_v16  ;;  %v7638_v16 = vld [vmem:[#allocation7 + $0x10] sm:$0xff] }
 0x982   : > { %4873 = vmatmul.msk.f32.vlgmr.msrb.gmra.mxu3 %vm2707_vm5, %v7565_v3 }
 0x984   : > { %v3675_v2 = vpop.f32.mrf.mxu1  ;;  %3791 = vperm.xlu2 %5041, %v7638_v16  }
 0x985   : > { %v3676_v39 = vadd.f32 %v3675_v2, %v7091_v57 }
 0x986   : > { %v7569_v15 = vpop.f32.mrf.mxu2 }
 0x98a   : > { %4874 = vmatmul.msk.f32.gmra.mxu3 %vm2707_vm5, %v7571_v17 }
 0x98c   : > { %v3678_v31 = vpop.f32.mrf.mxu1 }
 0x98e   : > { %v7575_v8 = vpop.f32.mrf.mxu2 }
 0x992   : > { %4875 = vmatmul.msk.f32.gmra.mxu3 %vm2707_vm5, %v7577_v29 }
 0x994   : > { %v3681_v46 = vpop.f32.mrf.mxu1 }
 0x996   : > { %v7581_v34 = vpop.f32.mrf.mxu2 }
 0x99a   : > { %4876 = vmatmul.msk.f32.gmra.mxu3 %vm2707_vm5, %v7583_v47 }
 0x99c   : > { %v3684_v7 = vpop.f32.mrf.mxu1 }
 0x99d   : > { %v3685_v37 = vadd.f32 %v3684_v7, %v7055_v25 }
 0x99e   : > { %v7587_v12 = vpop.f32.mrf.mxu2 }
 0x99f   : > { %v3750_v53 = vmax.f32 %v3685_v37, 0.0 }
 0x9a2   : > { %4877 = vmatmul.msk.f32.gmra.mxu3 %vm2707_vm5, %v7589_v61 }
 0x9a4   : > { %v3687_v56 = vpop.f32.mrf.mxu1 }
 0x9a5   : > { %v3688_v23 = vadd.f32 %v3687_v56, %v7049_v43  ;;  %v3679_v43 = vadd.f32 %v3678_v31, %v7081_v60  ;;  %v3741_v60 = vmax.f32 %v3676_v39, 0.0  ;;  %v7689_v56 = vld [vmem:[#allocation5 + $0x248] sm:$0xff]  ;;  %v7722_v39 = vld [vmem:[#allocation5 + $0x210] sm:$0xff] }
 0x9a6   : > { %v3725_v63 = vpop.f32.mrf.mxu2 }
 0x9a7   : > { %v3744_v11 = vmax.f32 %v3679_v43, 0.0  ;;  %v3726_v57 = vadd.f32 %v3725_v63, %v7086_v48  ;;  %v3717_v48 = vadd.f32 %v7575_v8, %v7115_v27 }
 0x9aa   : > { %4878 = vmatmul.msk.f32.gmra.mxu3 %vm2707_vm5, %v7595_v44 }
 0x9ac   : > { %v3690_v22 = vpop.f32.mrf.mxu1 }
 0x9ad   : > { %v3691_v9 = vadd.f32 %v3690_v22, %v7041_v41  ;;  %v3682_v41 = vadd.f32 %v3681_v46, %v7070_v59  ;;  %v3673_v59 = vadd.f32 %v7563_v20, %v7101_v28  ;;  %v3751_v28 = vmax.f32 %v3726_v57, 0.0  ;;  %v7695_v22 = vpop.permute.xlu1 %3806 }
 0x9ae   : > { %v3728_v18 = vpop.f32.mrf.mxu2  ;;  %v4003_v57 = vrot.slane %v5194_v14, 7 }
 0x9af   : > { %v3756_v45 = vmax.f32 %v3691_v9, 0.0  ;;  %v3747_v62 = vmax.f32 %v3682_v41, 0.0  ;;  %v3729_v1 = vadd.f32 %v3728_v18, %v7075_v13  ;;  %v3738_v58 = vmax.f32 %v3673_v59, 0.0  ;;  %v7699_v18 = vpop.permute.xlu0 %3811 }
 0x9b0   : > { %v3720_v13 = vadd.f32 %v7581_v34, %v7106_v6  ;;  %v3742_v6 = vmax.f32 %v3717_v48, 0.0 }
 0x9b2   : > { %4879 = vmatmul.msk.f32.gmra.mxu3 %vm2707_vm5, %v7602_v4  ;;  %v3745_v2 = vmax.f32 %v3720_v13, 0.0  ;;  %v7747_v13 = vld [vmem:[#allocation5 + $0x220] sm:$0xff] }
 0x9b4   : > { %v3693_v38 = vpop.f32.mrf.mxu1 }
 0x9b5   : > { %v3694_v19 = vadd.f32 %v3693_v38, %v7045_v5  ;;  %v3753_v5 = vmax.f32 %v3688_v23, 0.0 }
 0x9b6   : > { %v3731_v54 = vpop.f32.mrf.mxu2 }
 0x9b7   : > { %v3759_v21 = vmax.f32 %v3694_v19, 0.0  ;;  %v3732_v25 = vadd.f32 %v3731_v54, %v7060_v42  ;;  %v3723_v42 = vadd.f32 %v7587_v12, %v7096_v55  ;;  %v3714_v55 = vadd.f32 %v7569_v15, %v7120_v40  ;;  %v5192_v40 = vld [vmem:[%s5495_s4 + $0x30] sm:$0xff]  ;;  %v7685_v12 = vld [vmem:[#allocation5 + $0x240] sm:$0xff]  ;;  %v7703_v19 = vpop.permute.xlu1 %3796 }
 0x9b9   : > { %3903 = vmatpush.msrb.mxu0 %v3759_v21  ;;  %v3757_v36 = vmax.f32 %v3732_v25, 0.0  ;;  %v3748_v20 = vmax.f32 %v3723_v42, 0.0  ;;  %v3739_v31 = vmax.f32 %v3714_v55, 0.0 }
 0x9ba   : > { %4880 = vmatmul.msk.f32.gmra.mxu3 %vm2707_vm5, %v7615_v35 }
 0x9bb   : > { %3904 = vmatpush.msrb.mxu0 %v3756_v45 }
 0x9bd   : > { %3905 = vmatpush.msrb.mxu0 %v3753_v5  ;;  %v3769_v5 = vld [vmem:[#allocation5 + $0x208] sm:$0x1] }
 0x9be   : > { %v3734_v30 = vpop.f32.mrf.mxu2 }
 0x9bf   : > { %3906 = vmatpush.msrb.mxu0 %v3750_v53  ;;  %v3735_v10 = vadd.f32 %v3734_v30, %v7064_v51  ;;  %v3754_v51 = vmax.f32 %v3729_v1, 0.0 }
 0x9c1   : > { %3907 = vmatpush.msrb.mxu0 %v3747_v62  ;;  %v3760_v49 = vmax.f32 %v3735_v10, 0.0  ;;  %v5193_v62 = vld [vmem:[%s5495_s4 + $0x38] sm:$0xff]  ;;  %v236_v10 = vld [vmem:[%s5495_s4 + $0x50] sm:$0x3] }
 0x9c2   : > { %4881 = vmatmul.msk.f32.gmra.mxu3 %vm2707_vm5, %v3769_v5  ;;  %v4000_v30 = vrot.slane %v5193_v62, 7  ;;  %v4001_v59 = vrot.slane %v236_v10, 7 }
 0x9c3   : > { %3908 = vmatpush.msrb.mxu0 %v3744_v11  ;;  %3947 = vmatpush.msra.mxu1 %v3760_v49  ;;  %v7736_v49 = vld [vmem:[#allocation5 + $0x218] sm:$0xff] }
 0x9c4   : > { %v4002_v1 = vsel %vm1231_vm4, %v4000_v30, %v4001_v59 }
 0x9c5   : > { %3909 = vmatpush.msrb.mxu0 %v3741_v60  ;;  %3948 = vmatpush.msra.mxu1 %v3757_v36 }
 0x9c6   : > { %4905 = vmatpush.msk.msra.mxu3 %vm2132_vm11, %v4002_v1 }
 0x9c7   : > { %3910 = vmatpush.msrb.mxu0 %v3738_v58  ;;  %3949 = vmatpush.msra.mxu1 %v3754_v51  ;;  %v237_v58 = vld [vmem:[%s5495_s4 + $0x58] sm:$0x3]  ;;  %v5371_v51 = vmov 6  }
 0x9c8   : > { %4882 = vmatmul.msk.f32.vlgmr.msrb.gmra.mxu0 %vm2707_vm5, %v7565_v3  ;;  %v4004_v42 = vrot.slane %v237_v58, 7  ;;  %5045 = vset.pattern.permute.xlu0 %v5371_v51 }
 0x9c9   : > { %3950 = vmatpush.msra.mxu1 %v3751_v28  ;;  %5046 = vset.pattern.permute.xlu1 %v5371_v51 }
 0x9ca   : > { %v7719_v43 = vpop.permute.xlu1 %3781  ;;  %4226 = vperm.xlu0 %5045, %v7638_v16   ;;  %v4005_v28 = vsel %vm1231_vm4, %v4003_v57, %v4004_v42  ;;  %4221 = vperm.xlu1 %5046, %v7607_v24   ;;  %v3989_v16 = vld [vmem:[#allocation5 + $0x228] sm:$0xff]  ;;  %v4258_v42 = vld [vmem:[#allocation5 + $0x250] sm:$0x7] }
 0x9cb   : > { %3951 = vmatpush.msra.mxu1 %v3748_v20  ;;  %5044 = vset.pattern.permute.xlu2 %v5371_v51 }
 0x9cc   : > { %4910 = vmatpush.msk.msra.mxu0 %vm2132_vm11, %v4005_v28  ;;  %4231 = vperm.xlu2 %5044, %v7600_v0  }
 0x9cd   : > { %3952 = vmatpush.msra.mxu1 %v3745_v2 }
 0x9ce   : > { %v7693_v63 = vpop.permute.xlu2 %3816 }
 0x9cf   : > { %3953 = vmatpush.msra.mxu1 %v3742_v6 }
 0x9d0   : > { %4883 = vmatmul.msk.f32.gmra.mxu0 %vm2707_vm5, %v7571_v17 }
 0x9d1   : > { %3954 = vmatpush.msra.mxu1 %v3739_v31  ;;  %v3778_v31 = vld [vmem:[#allocation7 + $0x40] sm:$0x1] }
 0x9d2   : > { %4891 = vmatmul.msk.f32.vlgmr.msra.gmra.mxu1 %vm2707_vm5, %v7565_v3  ;;  %v3997_v3 = vrot.slane %v5192_v40, 7 }
 0x9d4   : > { %4216 = vperm.xlu2 %5044, %v7612_v33  }
 0x9d6   : > { %v7697_v50 = vpop.permute.xlu2 %3801 }
 0x9d8   : > { %4884 = vmatmul.msk.f32.gmra.mxu0 %vm2707_vm5, %v7577_v29 }
 0x9da   : > { %4892 = vmatmul.msk.f32.gmra.mxu1 %vm2707_vm5, %v7571_v17  ;;  %v235_v17 = vld [vmem:[%s5495_s4 + $0x48] sm:$0x3] }
 0x9db   : > { %v3998_v8 = vrot.slane %v235_v17, 7 }
 0x9dc   : > { %5048 = vset.pattern.permute.xlu2 %v5370_v52 }
 0x9dd   : > { %v3999_v46 = vsel %vm1231_vm4, %v3997_v3, %v3998_v8  ;;  %3821 = vperm.xlu2 %5048, %v3778_v31   ;;  %vm4265_vm4 = vcmask 261120  }
 0x9de   : > { %4900 = vmatpush.msk.msra.mxu2 %vm2132_vm11, %v3999_v46  ;;  %v7707_v54 = vpop.permute.xlu2 %3791 }
 0x9e0   : > { %4885 = vmatmul.msk.f32.gmra.mxu0 %vm2707_vm5, %v7583_v47 }
 0x9e2   : > { %4893 = vmatmul.msk.f32.gmra.mxu1 %vm2707_vm5, %v7577_v29  ;;  %v7675_v29 = vld [vmem:[#allocation5 + $0x230] sm:$0xff]  ;;  %v7712_v45 = vpop.permute.xlu0 %3786 }
 0x9e3   : > { %4901 = vmatmul.msk.f32.vlgmr.msra.gmra.mxu2 %vm2342_vm6, %v7675_v29  ;;  %4906 = vmatmul.msk.f32.vlgmr.msra.gmra.mxu3 %vm2342_vm6, %v7675_v29 }
 0x9e8   : > { %4886 = vmatmul.msk.f32.gmra.mxu0 %vm2707_vm5, %v7589_v61 }
 0x9ea   : > { %4894 = vmatmul.msk.f32.gmra.mxu1 %vm2707_vm5, %v7583_v47  ;;  %v7681_v47 = vld [vmem:[#allocation5 + $0x238] sm:$0xff] }
 0x9eb   : > { %4902 = vmatmul.msk.f32.gmra.mxu2 %vm2342_vm6, %v7681_v47  ;;  %4907 = vmatmul.msk.f32.gmra.mxu3 %vm2342_vm6, %v7681_v47 }
 0x9f0   : > { %4887 = vmatmul.msk.f32.gmra.mxu0 %vm2707_vm5, %v7595_v44 }
 0x9f2   : > { %4895 = vmatmul.msk.f32.gmra.mxu1 %vm2707_vm5, %v7589_v61 }
 0x9f3   : > { %4903 = vmatmul.msk.f32.gmra.mxu2 %vm2342_vm6, %v7685_v12  ;;  %4908 = vmatmul.msk.f32.gmra.mxu3 %vm2342_vm6, %v7685_v12 }
 0x9f8   : > { %4888 = vmatmul.msk.f32.gmra.mxu0 %vm2707_vm5, %v7602_v4 }
 0x9fa   : > { %4896 = vmatmul.msk.f32.gmra.mxu1 %vm2707_vm5, %v7595_v44 }
 0x9fb   : > { %4904 = vmatmul.msk.f32.gmra.mxu2 %vm2342_vm6, %v7689_v56  ;;  %4909 = vmatmul.msk.f32.gmra.mxu3 %vm2342_vm6, %v7689_v56 }
 0xa00   : > { %4889 = vmatmul.msk.f32.gmra.mxu0 %vm2707_vm5, %v7615_v35 }
 0xa02   : > { %4897 = vmatmul.msk.f32.gmra.mxu1 %vm2707_vm5, %v7602_v4 }
 0xa05   : > { %v3868_v27 = vpop.f32.mrf.mxu3 }
 0xa06   : > { %v3869_v53 = vadd.f32 %v3868_v27, %v7719_v43 }
 0xa08   : > { %4890 = vmatmul.msk.f32.gmra.mxu0 %vm2707_vm5, %v3769_v5 }
 0xa0a   : > { %4898 = vmatmul.msk.f32.gmra.mxu1 %vm2707_vm5, %v7615_v35 }
 0xa0d   : > { %v3871_v15 = vpop.f32.mrf.mxu3 }
 0xa0e   : > { %v3872_v32 = vadd.f32 %v3871_v15, %v7712_v45 }
 0xa10   : > { %4911 = vmatmul.msk.f32.vlgmr.msra.gmra.mxu0 %vm2342_vm6, %v7675_v29 }
 0xa12   : > { %4899 = vmatmul.msk.f32.gmra.mxu1 %vm2707_vm5, %v3769_v5 }
 0xa15   : > { %v3874_v34 = vpop.f32.mrf.mxu3 }
 0xa16   : > { %v3875_v41 = vadd.f32 %v3874_v34, %v7707_v54 }
 0xa18   : > { %4912 = vmatmul.msk.f32.gmra.mxu0 %vm2342_vm6, %v7681_v47 }
 0xa1d   : > { %v3877_v7 = vpop.f32.mrf.mxu3 }
 0xa1e   : > { %v3878_v35 = vadd.f32 %v3877_v7, %v7703_v19 }
 0xa20   : > { %4913 = vmatmul.msk.f32.gmra.mxu0 %vm2342_vm6, %v7685_v12 }
 0xa25   : > { %v3880_v61 = vpop.f32.mrf.mxu3 }
 0xa26   : > { %v3881_v21 = vadd.f32 %v3880_v61, %v7697_v50 }
 0xa28   : > { %4914 = vmatmul.msk.f32.gmra.mxu0 %vm2342_vm6, %v7689_v56 }
 0xa2d   : > { %v3883_v26 = vpop.f32.mrf.mxu3 }
 0xa2e   : > { %v3884_v23 = vadd.f32 %v3883_v26, %v7695_v22 }
 0xa35   : > { %v3886_v44 = vpop.f32.mrf.mxu3 }
 0xa36   : > { %v3887_v9 = vadd.f32 %v3886_v44, %v7699_v18 }
 0xa3c   : > { %v4227_v5 = vpop.permute.xlu0 %4226 }
 0xa3d   : > { %v3889_v4 = vpop.f32.mrf.mxu3 }
 0xa3e   : > { %v3890_v38 = vadd.f32 %v3889_v4, %v7693_v63 }
 0xa40   : > { %4131 = vmatpush.msrb.mxu2 %v3890_v38 }
 0xa42   : > { %4132 = vmatpush.msrb.mxu2 %v3887_v9 }
 0xa44   : > { %4133 = vmatpush.msrb.mxu2 %v3884_v23  ;;  %v5372_v23 = vmov 7  }
 0xa45   : > { %v7710_v37 = vpop.f32.mrf.mxu0  ;;  %5047 = vset.pattern.permute.xlu1 %v5372_v23  ;;  %5049 = vset.pattern.permute.xlu0 %v5372_v23 }
 0xa46   : > { %4134 = vmatpush.msrb.mxu2 %v3881_v21  ;;  %v3913_v12 = vadd.f32 %v7710_v37, %v7719_v43 }
 0xa48   : > { %4135 = vmatpush.msrb.mxu2 %v3878_v35 }
 0xa4a   : > { %4136 = vmatpush.msrb.mxu2 %v3875_v41 }
 0xa4c   : > { %4137 = vmatpush.msrb.mxu2 %v3872_v32 }
 0xa4d   : > { %v7725_v25 = vpop.f32.mrf.mxu0 }
 0xa4e   : > { %4138 = vmatpush.msrb.mxu2 %v3869_v53  ;;  %v3916_v47 = vadd.f32 %v7725_v25, %v7712_v45 }
 0xa4f   : > { %4915 = vmatmul.msk.f32.vlgmr.msrb.gmra.mxu2 %vm2707_vm5, %v7722_v39  ;;  %v7730_v11 = vpop.f32.mrf.mxu1 }
 0xa55   : > { %v3918_v60 = vpop.f32.mrf.mxu0 }
 0xa56   : > { %v3919_v29 = vadd.f32 %v3918_v60, %v7707_v54 }
 0xa57   : > { %4916 = vmatmul.msk.f32.gmra.mxu2 %vm2707_vm5, %v7736_v49  ;;  %v7741_v36 = vpop.f32.mrf.mxu1 }
 0xa58   : > { %v3960_v44 = vadd.f32 %v7741_v36, %v7712_v45  ;;  %v4232_v45 = vpop.permute.xlu2 %4231 }
 0xa5d   : > { %v3921_v48 = vpop.f32.mrf.mxu0 }
 0xa5e   : > { %v3922_v8 = vadd.f32 %v3921_v48, %v7703_v19 }
 0xa5f   : > { %4917 = vmatmul.msk.f32.gmra.mxu2 %vm2707_vm5, %v7747_v13  ;;  %v3962_v20 = vpop.f32.mrf.mxu1 }
 0xa60   : > { %v4217_v60 = vpop.permute.xlu2 %4216 }
 0xa65   : > { %v3924_v55 = vpop.f32.mrf.mxu0 }
 0xa66   : > { %v3925_v17 = vadd.f32 %v3924_v55, %v7697_v50 }
 0xa67   : > { %4918 = vmatmul.msk.f32.gmra.mxu2 %vm2707_vm5, %v3989_v16  ;;  %v3965_v0 = vpop.f32.mrf.mxu1 }
 0xa68   : > { %v3966_v26 = vadd.f32 %v3965_v0, %v7703_v19  ;;  %v4259_v19 = vld [vmem:[#allocation7] sm:$0x7] }
 0xa69   : > { %4262 = vperm.xlu1 %5047, %v4259_v19  }
 0xa6d   : > { %v3927_v24 = vpop.f32.mrf.mxu0 }
 0xa6e   : > { %v3928_v52 = vadd.f32 %v3927_v24, %v7695_v22 }
 0xa6f   : > { %v3968_v2 = vpop.f32.mrf.mxu1 }
 0xa70   : > { %v3969_v56 = vadd.f32 %v3968_v2, %v7697_v50  ;;  %v4041_v50 = vpop.f32.mrf.mxu2 }
 0xa75   : > { %v3930_v6 = vpop.f32.mrf.mxu0 }
 0xa76   : > { %v3931_v3 = vadd.f32 %v3930_v6, %v7699_v18 }
 0xa77   : > { %v3971_v33 = vpop.f32.mrf.mxu1 }
 0xa78   : > { %v3972_v61 = vadd.f32 %v3971_v33, %v7695_v22  ;;  %v3957_v22 = vadd.f32 %v7730_v11, %v7719_v43  ;;  %v4222_v43 = vpop.permute.xlu1 %4221 }
 0xa7d   : > { %v3933_v27 = vpop.f32.mrf.mxu0 }
 0xa7e   : > { %v3934_v40 = vadd.f32 %v3933_v27, %v7693_v63 }
 0xa7f   : > { %v3974_v15 = vpop.f32.mrf.mxu1 }
 0xa80   : > { %4160 = vmatpush.msrb.mxu3 %v3934_v40  ;;  %v3975_v7 = vadd.f32 %v3974_v15, %v7699_v18  ;;  %v4044_v18 = vpop.f32.mrf.mxu2 }
 0xa82   : > { %4161 = vmatpush.msrb.mxu3 %v3931_v3 }
 0xa84   : > { %4162 = vmatpush.msrb.mxu3 %v3928_v52 }
 0xa85   : > { %v7806_v37 = vpop.f32.mrf.mxu0 }
 0xa86   : > { %4163 = vmatpush.msrb.mxu3 %v3925_v17 }
 0xa87   : > { %v3977_v46 = vpop.f32.mrf.mxu1 }
 0xa88   : > { %4164 = vmatpush.msrb.mxu3 %v3922_v8  ;;  %v3978_v34 = vadd.f32 %v3977_v46, %v7693_v63  ;;  %v3963_v63 = vadd.f32 %v3962_v20, %v7707_v54  ;;  %v4047_v4 = vpop.f32.mrf.mxu2  ;;  %v7804_v54 = vpop.f32.mrf.mxu3 }
 0xa8a   : > { %4165 = vmatpush.msrb.mxu3 %v3919_v29  ;;  %4189 = vmatpush.msrb.mxu0 %v3978_v34 }
 0xa8c   : > { %4166 = vmatpush.msrb.mxu3 %v3916_v47  ;;  %4190 = vmatpush.msrb.mxu0 %v3975_v7 }
 0xa8e   : > { %4167 = vmatpush.msrb.mxu3 %v3913_v12  ;;  %4191 = vmatpush.msrb.mxu0 %v3972_v61 }
 0xa8f   : > { %4919 = vmatmul.msk.f32.vlgmr.msrb.gmra.mxu3 %vm2707_vm5, %v7722_v39 }
 0xa90   : > { %4192 = vmatpush.msrb.mxu0 %v3969_v56  ;;  %v4050_v38 = vpop.f32.mrf.mxu2 }
 0xa92   : > { %4193 = vmatpush.msrb.mxu0 %v3966_v26 }
 0xa94   : > { %4194 = vmatpush.msrb.mxu0 %v3963_v63 }
 0xa96   : > { %4195 = vmatpush.msrb.mxu0 %v3960_v44 }
 0xa97   : > { %4920 = vmatmul.msk.f32.gmra.mxu3 %vm2707_vm5, %v7736_v49 }
 0xa98   : > { %4196 = vmatpush.msrb.mxu0 %v3957_v22 }
 0xa99   : > { %4923 = vmatmul.msk.f32.vlgmr.msrb.gmra.mxu0 %vm2707_vm5, %v7722_v39  ;;  %v4070_v39 = vpop.f32.mrf.mxu3 }
 0xa9f   : > { %4921 = vmatmul.msk.f32.gmra.mxu3 %vm2707_vm5, %v7747_v13 }
 0xaa1   : > { %4924 = vmatmul.msk.f32.gmra.mxu0 %vm2707_vm5, %v7736_v49  ;;  %v4099_v49 = vpop.f32.mrf.mxu0  ;;  %v4073_v36 = vpop.f32.mrf.mxu3 }
 0xaa7   : > { %4922 = vmatmul.msk.f32.gmra.mxu3 %vm2707_vm5, %v3989_v16 }
 0xaa9   : > { %4925 = vmatmul.msk.f32.gmra.mxu0 %vm2707_vm5, %v7747_v13  ;;  %v4102_v51 = vpop.f32.mrf.mxu0  ;;  %v4076_v13 = vpop.f32.mrf.mxu3 }
 0xab1   : > { %4926 = vmatmul.msk.f32.gmra.mxu0 %vm2707_vm5, %v3989_v16  ;;  %v4105_v28 = vpop.f32.mrf.mxu0  ;;  %v4079_v48 = vpop.f32.mrf.mxu3 }
 0xab9   : > { %v4108_v20 = vpop.f32.mrf.mxu0 }
 0xad2   : > { %v4140_v9 = vpop.f32.mrf.mxu2 }
 0xad3   : > { %v4141_v25 = vadd.f32 %v4140_v9, %v4041_v50 }
 0xad5   : > { %v4234_v14 = vadd.f32 %v4217_v60, %v4141_v25 }
 0xad7   : > { %v4246_v58 = vmax.f32 %v4234_v14, 0.0 }
 0xada   : > { %v4143_v21 = vpop.f32.mrf.mxu2 }
 0xadb   : > { %v4144_v32 = vadd.f32 %v4143_v21, %v4044_v18  ;;  %v4263_v19 = vpop.permute.xlu1 %4262 }
 0xadd   : > { %v4237_v59 = vadd.f32 %v4222_v43, %v4144_v32  ;;  %v3822_v32 = vpop.permute.xlu2 %3821 }
 0xadf   : > { %v4249_v57 = vmax.f32 %v4237_v59, 0.0 }
 0xae2   : > { %v4146_v35 = vpop.f32.mrf.mxu2 }
 0xae3   : > { %v4147_v41 = vadd.f32 %v4146_v35, %v4047_v4 }
 0xae5   : > { %v4240_v30 = vadd.f32 %v4227_v5, %v4147_v41 }
 0xae7   : > { %v4252_v1 = vmax.f32 %v4240_v30, 0.0 }
 0xaea   : > { %v4149_v53 = vpop.f32.mrf.mxu2 }
 0xaeb   : > { %v4150_v62 = vadd.f32 %v4149_v53, %v4050_v38 }
 0xaed   : > { %v4243_v10 = vadd.f32 %v4232_v45, %v4150_v62 }
 0xaef   : > { %v4255_v11 = vmax.f32 %v4243_v10, 0.0 }
 0xaf1   : > { %4281 = vmatpush.msra.mxu2 %v4255_v11 }
 0xaf3   : > { %4282 = vmatpush.msra.mxu2 %v4252_v1 }
 0xaf5   : > { %4283 = vmatpush.msra.mxu2 %v4249_v57 }
 0xaf7   : > { %4284 = vmatpush.msra.mxu2 %v4246_v58 }
 0xaf8   : > { %4927 = vmatmul.msk.f32.vlgmr.msra.gmra.mxu2 %vm4265_vm4, %v4258_v42 }
 0xb12   : > { %v4169_v16 = vpop.f32.mrf.mxu3 }
 0xb13   : > { %v4170_v3 = vadd.f32 %v4169_v16, %v4070_v39 }
 0xb15   : > { %v4235_v7 = vadd.f32 %v4217_v60, %v4170_v3 }
 0xb16   : > { %v4198_v55 = vpop.f32.mrf.mxu0 }
 0xb17   : > { %v4199_v61 = vadd.f32 %v4198_v55, %v4099_v49  ;;  %v4247_v50 = vmax.f32 %v4235_v7, 0.0 }
 0xb19   : > { %v4236_v18 = vadd.f32 %v4217_v60, %v4199_v61  ;;  %v7999_v60 = vld [vmem:[#allocation38_spill] sm:$0xff] }
 0xb1a   : > { %v4172_v0 = vpop.f32.mrf.mxu3  ;;  %v4395_v14 = vrot.slane %v7999_v60, 4  ;;  %v8000_v58 = vrot.slane %v7999_v60, 1 }
 0xb1b   : > { %v4173_v27 = vadd.f32 %v4172_v0, %v4073_v36  ;;  %v4248_v9 = vmax.f32 %v4236_v18, 0.0 }
 0xb1d   : > { %v4238_v8 = vadd.f32 %v4222_v43, %v4173_v27 }
 0xb1e   : > { %v4201_v24 = vpop.f32.mrf.mxu0 }
 0xb1f   : > { %v4202_v34 = vadd.f32 %v4201_v24, %v4102_v51  ;;  %v4250_v63 = vmax.f32 %v4238_v8, 0.0  ;;  %v3980_v51 = vpop.f32.mrf.mxu1 }
 0xb21   : > { %v4239_v44 = vadd.f32 %v4222_v43, %v4202_v34  ;;  %v3893_v43 = vadd.f32 %v7804_v54, %v3822_v32 }
 0xb22   : > { %v4175_v2 = vpop.f32.mrf.mxu3 }
 0xb23   : > { %v4176_v33 = vadd.f32 %v4175_v2, %v4076_v13  ;;  %v4251_v38 = vmax.f32 %v4239_v44, 0.0  ;;  %v3983_v25 = vmax.f32 %v3893_v43, 0.0 }
 0xb25   : > { %v4241_v15 = vadd.f32 %v4227_v5, %v4176_v33  ;;  %v4389_v1 = vrot.slane %v3983_v25, 5 }
 0xb26   : > { %v4204_v6 = vpop.f32.mrf.mxu0 }
 0xb27   : > { %v4205_v17 = vadd.f32 %v4204_v6, %v4105_v28  ;;  %v4253_v12 = vmax.f32 %v4241_v15, 0.0  ;;  %v3937_v6 = vadd.f32 %v7806_v37, %v3822_v32  ;;  %v8001_v37 = vld [vmem:[#allocation36_spill] sm:$0xff] }
 0xb29   : > { %v4242_v56 = vadd.f32 %v4227_v5, %v4205_v17 }
 0xb2a   : > { %v4178_v31 = vpop.f32.mrf.mxu3 }
 0xb2b   : > { %v4179_v40 = vadd.f32 %v4178_v31, %v4079_v48  ;;  %v4254_v4 = vmax.f32 %v4242_v56, 0.0 }
 0xb2d   : > { %v4244_v52 = vadd.f32 %v4232_v45, %v4179_v40  ;;  %v3984_v40 = vmax.f32 %v3937_v6, 0.0 }
 0xb2e   : > { %v4207_v46 = vpop.f32.mrf.mxu0 }
 0xb2f   : > { %v4256_v29 = vmax.f32 %v4244_v52, 0.0  ;;  %v4208_v47 = vadd.f32 %v4207_v46, %v4108_v20  ;;  %v4390_v46 = vrot.slane %v3984_v40, 5 }
 0xb31   : > { %4301 = vmatpush.msrb.mxu1 %v4256_v29  ;;  %v4245_v26 = vadd.f32 %v4232_v45, %v4208_v47  ;;  %v4396_v47 = vrot.slane %v8001_v37, 4 }
 0xb33   : > { %4302 = vmatpush.msrb.mxu1 %v4253_v12  ;;  %v4257_v22 = vmax.f32 %v4245_v26, 0.0  ;;  %v3981_v26 = vadd.f32 %v3980_v51, %v3822_v32 }
 0xb35   : > { %4303 = vmatpush.msrb.mxu1 %v4250_v63  ;;  %4321 = vmatpush.msrb.mxu2 %v4257_v22  ;;  %v8002_v63 = vrot.slane %v8001_v37, 1 }
 0xb37   : > { %4304 = vmatpush.msrb.mxu1 %v4247_v50  ;;  %4322 = vmatpush.msrb.mxu2 %v4254_v4  ;;  %v3985_v4 = vmax.f32 %v3981_v26, 0.0 }
 0xb38   : > { %4928 = vmatmul.msk.f32.vlgmr.msrb.gmra.mxu1 %vm4265_vm4, %v4258_v42 }
 0xb39   : > { %4323 = vmatpush.msrb.mxu2 %v4251_v38 }
 0xb3b   : > { %4324 = vmatpush.msrb.mxu2 %v4248_v9 }
 0xb3c   : > { %4929 = vmatmul.msk.f32.vlgmr.msrb.gmra.mxu2 %vm4265_vm4, %v4258_v42 }
 0xb7b   : > { %v4286_v23 = vpop.f32.mrf.mxu2 }
 0xb7c   : > { %v4287_v21 = vadd.f32 %v4286_v23, %v4263_v19 }
 0xb7e   : > { %v4930_v35 = vmul.f32 -1.442695, %v4287_v21  ;;  %v4391_v21 = vrot.slane %v3985_v4, 5 }
 0xb80   : > { %5166 = vpow2.f32 %v4930_v35 }
 0xb86   : > { %v5167_v45 = vpop.eup %5166 }
 0xb87   : > { %v4338_v41 = vadd.f32 1.0, %v5167_v45  ;;  %v8003_v45 = vld [vmem:[#allocation37_spill] sm:$0xff] }
 0xb89   : > { %5168 = vrcp.f32 %v4338_v41  ;;  %v4352_v39 = vand.u32 2147483648, %v4338_v41  ;;  %vm4346_vm6 = vweird.f32 %v4338_v41  ;;  %v4350_v30 = vand.u32 2147483647, %v4338_v41 }
 0xb8b   : > { %v4353_v59 = vor.u32 1.1754944e-38, %v4352_v39  ;;  %vm4351_vm1 = vcmp.eq.f32.partialorder %v4350_v30, 8.507059e+37 }
 0xb8f   : > { %v5169_v5 = vpop.eup %5168 }
 0xb90   : > { %v4342_v53 = vmul.f32 %v5169_v5, %v4338_v41  ;;  %vm4347_vm12 = vweird.f32 %v5169_v5  ;;  %v4397_v41 = vrot.slane %v8003_v45, 4 }
 0xb91   : > { %vm4348_vm14 = vmor %vm4346_vm6, %vm4347_vm12 }
 0xb92   : > { %v4343_v62 = vsub.f32 1.0, %v4342_v53  ;;  %v8004_v53 = vrot.slane %v8003_v45, 1 }
 0xb94   : > { %v4344_v10 = vmul.f32 %v5169_v5, %v4343_v62 }
 0xb96   : > { %v4345_v11 = vadd.f32 %v5169_v5, %v4344_v10 }
 0xb98   : > { %v4349_v49 = vsel %vm4348_vm14, %v5169_v5, %v4345_v11 }
 0xb99   : > { %v4354_v57 = vsel %vm4351_vm1, %v4353_v59, %v4349_v49 }
 0xb9a   : > { %v4407_v54 = vsel %vm2132_vm11, %v4354_v57, %v4389_v1 }
 0xb9b   : > { %v4410_v36 = vsel %vm342_vm0, %v4407_v54, %v4395_v14 }
 0xb9c   : > { %v4414_v42 = vsel %vm4413_vm13, %v4410_v36, %v8000_v58 }
 0xb9d   : > { %4417 = vst [vmem:[%s6589_s23] sm:$0xff] %v4414_v42 }
 0xbb5   : > { %v4306_v13 = vpop.f32.mrf.mxu1 }
 0xbb6   : > { %v4307_v28 = vadd.f32 %v4306_v13, %v4263_v19 }
 0xbb8   : > { %v4931_v48 = vmul.f32 -1.442695, %v4307_v28 }
 0xbba   : > { %5170 = vpow2.f32 %v4931_v48 }
 0xbbf   : > { %v4326_v16 = vpop.f32.mrf.mxu2 }
 0xbc0   : > { %v5171_v20 = vpop.eup %5170  ;;  %v4327_v0 = vadd.f32 %v4326_v16, %v4263_v19 }
 0xbc1   : > { %v4339_v55 = vadd.f32 1.0, %v5171_v20 }
 0xbc2   : > { %v4932_v24 = vmul.f32 -1.442695, %v4327_v0 }
 0xbc3   : > { %5172 = vrcp.f32 %v4339_v55  ;;  %v4367_v3 = vand.u32 2147483648, %v4339_v55  ;;  %vm4361_vm2 = vweird.f32 %v4339_v55  ;;  %v4365_v17 = vand.u32 2147483647, %v4339_v55 }
 0xbc4   : > { %5174 = vpow2.f32 %v4932_v24 }
 0xbc5   : > { %v4368_v29 = vor.u32 1.1754944e-38, %v4367_v3  ;;  %vm4366_vm8 = vcmp.eq.f32.partialorder %v4365_v17, 8.507059e+37 }
 0xbc9   : > { %v5173_v2 = vpop.eup %5172 }
 0xbca   : > { %v4357_v33 = vmul.f32 %v5173_v2, %v4339_v55  ;;  %v5175_v31 = vpop.eup %5174  ;;  %vm4362_vm3 = vweird.f32 %v5173_v2 }
 0xbcb   : > { %v4340_v15 = vadd.f32 1.0, %v5175_v31  ;;  %vm4363_vm7 = vmor %vm4361_vm2, %vm4362_vm3 }
 0xbcc   : > { %v4358_v27 = vsub.f32 1.0, %v4357_v33 }
 0xbcd   : > { %5176 = vrcp.f32 %v4340_v15  ;;  %v4382_v18 = vand.u32 2147483648, %v4340_v15  ;;  %v4380_v9 = vand.u32 2147483647, %v4340_v15  ;;  %vm4376_vm9 = vweird.f32 %v4340_v15 }
 0xbce   : > { %v4359_v52 = vmul.f32 %v5173_v2, %v4358_v27 }
 0xbcf   : > { %v4383_v23 = vor.u32 1.1754944e-38, %v4382_v18  ;;  %vm4381_vm5 = vcmp.eq.f32.partialorder %v4380_v9, 8.507059e+37 }
 0xbd0   : > { %v4360_v8 = vadd.f32 %v5173_v2, %v4359_v52 }
 0xbd2   : > { %v4364_v34 = vsel %vm4363_vm7, %v5173_v2, %v4360_v8 }
 0xbd3   : > { %v4369_v7 = vsel %vm4366_vm8, %v4368_v29, %v4364_v34  ;;  %v5177_v61 = vpop.eup %5176 }
 0xbd4   : > { %v4408_v12 = vsel %vm2132_vm11, %v4369_v7, %v4390_v46  ;;  %v4372_v22 = vmul.f32 %v5177_v61, %v4340_v15  ;;  %vm4377_vm15 = vweird.f32 %v5177_v61 }
 0xbd5   : > { %v4411_v56 = vsel %vm342_vm0, %v4408_v12, %v4396_v47  ;;  %vm4378_vm10 = vmor %vm4376_vm9, %vm4377_vm15 }
 0xbd6   : > { %v4415_v44 = vsel %vm4413_vm13, %v4411_v56, %v8002_v63  ;;  %v4373_v50 = vsub.f32 1.0, %v4372_v22 }
 0xbd7   : > { %4418 = vst [vmem:[%s6589_s23 + $0x8] sm:$0xff] %v4415_v44 }
 0xbd8   : > { %v4374_v38 = vmul.f32 %v5177_v61, %v4373_v50 }
 0xbda   : > { %v4375_v19 = vadd.f32 %v5177_v61, %v4374_v38 }
 0xbdc   : > { %v4379_v35 = vsel %vm4378_vm10, %v5177_v61, %v4375_v19 }
 0xbdd   : > { %v4384_v5 = vsel %vm4381_vm5, %v4383_v23, %v4379_v35 }
 0xbde   : > { %v4409_v32 = vsel %vm2132_vm11, %v4384_v5, %v4391_v21 }
 0xbdf   : > { %v4412_v43 = vsel %vm342_vm0, %v4409_v32, %v4397_v41 }
 0xbe0   : > { %v4416_v39 = vsel %vm4413_vm13, %v4412_v43, %v8004_v53 }
 0xbe1   : > { %4419 = vst [vmem:[%s6589_s23 + $0x10] sm:$0xff] %v4416_v39 }
 0xbe2   : > { %5312 = shalt.err (!%p5309_p10)
}
 0xbe3   : > { %s5373_s25 = smov 384   ;;  %s5374_s30 = smov 3072  }
 0xbe4   : > { %s5375_s4 = smov 24  }
 0xbe5   : > { %4951 = dma.vmem_to_hbm [thread:$0]  (%p5461_p0), %s4437_s5, 768, %s4439_s16, %s4424_s7, %s5373_s25, %s5374_s30, %s5375_s4  }
 0xbe6 PF: > { %p4973_p11 = scmp.ge.s32.totalorder %s5355_s15, 2  ;;  %s4453_s18 = sand.u32 1, %s5343_s12  }
 0xbe7   : > { %s4454_s23 = scalar_lea.sflag [#allocation4], %s4453_s18 }
 0xbe8   : > { %p4965_p12 = pnand %p4973_p11, %p5431_p6 }
 0xbea   : > { %p4966_p13 = pneg %p4965_p12 }
 0xbec   : > { %5338 = dma.done.wait (%p4966_p13), %s4454_s23, 768  }
 0xbed   : > { %5340 = vsyncadd (%p4966_p13), %s4454_s23, 4294966528  ;;  %p17_p3 = scmp.ge.s32.totalorder %s5451_s6, 10   ;;  %s8005_s12 = smov %s5347_s13 }
 0xbee   : > { %s8006_s13 = smov %s5351_s14  ;;  %s8007_s14 = smov %s5467_s10 }
 0xbef   : > { %s8008_s15 = smov %s5451_s6  ;;  %19 = sbr.rel (!%p17_p3) target bundleno = 6 (0x6), region = 85 }
 0xbf4   :  { %4460 = vsyncpa [#allocation3], 1 }
 0xbf5   :  { %4462 = vsyncpa [#allocation3 + $0x1], 1 }
 0xbf6   :  { %4463 = vsyncpa [#allocation6], 1 }
 0xbf7   :  { %4464 = vsyncpa [#allocation4], 1 }
 0xbf8   :  { %4466 = vsyncpa [#allocation4 + $0x1], 1 }

</bundles_post_ra>
